<compile_context>
chip_gen: v6e
topology: v6e:2x2x1
jax: 0.10.0
libtpu: 0.0.40
codegen_flags: <defaults>
</compile_context>

<pallas_src>
import jax
import jax.numpy as jnp
from jax import lax
from jax.experimental import pallas as pl
from jax.experimental.pallas import tpu as pltpu


def make_xdfm_kernel(b_tile, F, E, cin_specs, n_mlp):
    """cin_specs: tuple of (C_i, Hprev_i, keep_i) per CIN layer (static)."""
    n_cin = len(cin_specs)
    BE = b_tile * E

    def kernel(*refs):
        x0_ref, flat_ref, lin_ref = refs[0], refs[1], refs[2]
        idx = 3
        cin_w, cin_b = [], []
        for _ in range(n_cin):
            cin_w.append(refs[idx])
            cin_b.append(refs[idx + 1])
            idx += 2
        fc_w_ref, fc_b_ref = refs[idx], refs[idx + 1]
        idx += 2
        mlp = []
        for _ in range(n_mlp):
            mlp.append((refs[idx], refs[idx + 1]))
            idx += 2
        wo_ref, bo_ref = refs[idx], refs[idx + 1]
        idx += 2
        out_ref = refs[idx]

        # ---------------- CIN: whole batch tile stacked along lanes ----------
        # Feature maps are (rows, b_tile*E): channel rows on sublanes,
        # (embed, sample) on lanes (embed-major: lane = e*b_tile + s) -> every
        # MXU matmul has full lane occupancy and the final per-sample E-sum is
        # E static 128-aligned lane slices.
        x0 = x0_ref[...]                              # (F, BE)
        h = x0
        cin_acc = jnp.zeros((1, BE), jnp.float32)
        off = 0
        for i, (C, Hp, keep) in enumerate(cin_specs):
            acc = jnp.zeros((C, BE), jnp.float32)
            # Static unroll over fields.  (A single fused (C, F*Hp) matmul
            # would need an in-kernel sublane concat at non-8-aligned offsets
            # when Hp % 8 != 0, so the safe accumulate form is used.)
            for f in range(F):
                zf = x0[f:f + 1, :] * h               # (Hp, BE) outer-product slab
                acc = acc + jnp.dot(cin_w[i][f], zf,
                                    preferred_element_type=jnp.float32)
            out = jnp.maximum(acc + cin_b[i][...], 0.0)        # relu, (C, BE)
            if keep < C:                              # split_half (non-last layer)
                x_part = out[:keep, :]
                h = out[keep:, :]
            else:
                x_part = out
                h = out
            # fc weights applied per layer; per-sample E-sum deferred to the end
            cin_acc = cin_acc + jnp.dot(fc_w_ref[:, off:off + keep], x_part,
                                        preferred_element_type=jnp.float32)
            off += keep
        # per-sample sum over the E embedding positions: lanes are embed-major,
        # so this is E static, b_tile-aligned lane slices added on the VPU.
        cin_row = cin_acc[:, 0:b_tile]
        for e in range(1, E):
            cin_row = cin_row + cin_acc[:, e * b_tile:(e + 1) * b_tile]
        cin_row = cin_row + fc_b_ref[...]             # (1, b_tile)

        # ---------------- MLP on the whole batch tile (rows = samples) -------
        # BatchNorm (eval mode) is folded into weights/bias wrapper-side.
        # TODO(synk): training-mode dropout / batch statistics not implemented.
        z = flat_ref[...]                             # (b_tile, F*E)
        for (w_ref, b_ref) in mlp:
            z = jnp.dot(z, w_ref[...], preferred_element_type=jnp.float32) + b_ref[...]
            z = jnp.maximum(z, 0.0)
        # (1, last) x (b_tile, last)^T -> lane-dense (1, b_tile) row
        mlp_row = lax.dot_general(wo_ref[...], z, (((1,), (1,)), ((), ())),
                                  preferred_element_type=jnp.float32) + bo_ref[...]

        out_ref[...] = jax.nn.sigmoid(lin_ref[...] + cin_row + mlp_row)

    return kernel


def init_params(key, field_dims, embed_dim, mlp_dims, cross_layer_sizes, split_half):
    total_vocab = int(sum(field_dims))
    F = len(field_dims)
    keys = iter(jax.random.split(key, 64))
    p = {}
    p["embed_table"] = jax.random.normal(next(keys), (total_vocab, embed_dim), jnp.float32) * 0.1
    p["lin_table"] = jax.random.normal(next(keys), (total_vocab, 1), jnp.float32) * 0.1
    p["lin_bias"] = jnp.zeros((1,), jnp.float32)

    prev, fc_dim, n = F, 0, len(cross_layer_sizes)
    cin_w, cin_b = [], []
    for i, C in enumerate(cross_layer_sizes):
        cin_w.append(jax.random.normal(next(keys), (C, F * prev), jnp.float32) * 0.1)
        cin_b.append(jax.random.normal(next(keys), (C,), jnp.float32) * 0.1)
        keep = C // 2 if (split_half and i != n - 1) else C
        fc_dim += keep
        prev = keep
    p["cin_w"], p["cin_b"] = cin_w, cin_b
    p["cin_fc_w"] = jax.random.normal(next(keys), (1, fc_dim), jnp.float32) * 0.1
    p["cin_fc_b"] = jnp.zeros((1,), jnp.float32)

    in_dim = F * embed_dim
    mlp = []
    for d in mlp_dims:
        mlp.append(dict(
            w=jax.random.normal(next(keys), (d, in_dim), jnp.float32) * 0.1,
            b=jax.random.normal(next(keys), (d,), jnp.float32) * 0.1,
            gamma=1.0 + 0.1 * jax.random.normal(next(keys), (d,), jnp.float32),
            beta=0.1 * jax.random.normal(next(keys), (d,), jnp.float32),
            mean=0.1 * jax.random.normal(next(keys), (d,), jnp.float32),
            var=0.5 + jax.random.uniform(next(keys), (d,), jnp.float32),
        ))
        in_dim = d
    p["mlp"] = mlp
    p["mlp_out_w"] = jax.random.normal(next(keys), (1, in_dim), jnp.float32) * 0.1
    p["mlp_out_b"] = jnp.zeros((1,), jnp.float32)
    return p


def xdeepfm_forward(x_int, params, field_dims, embed_dim, mlp_dims,
                    cross_layer_sizes, split_half=True, b_tile=128, eps=1e-5):
    B, F = x_int.shape
    E = embed_dim
    n_tiles = pl.cdiv(B, b_tile)
    Bp = n_tiles * b_tile
    BE = b_tile * E

    # ---- glue: embedding / linear-term gathers (plain JAX) ----
    fd = jnp.asarray(field_dims, jnp.int32)
    offsets = jnp.concatenate([jnp.zeros((1,), jnp.int32), jnp.cumsum(fd)[:-1]])
    idx = x_int + offsets[None, :]                                    # (B, F)
    embed_x = params["embed_table"][idx]                              # (B, F, E)
    lin = jnp.sum(params["lin_table"][idx], axis=1) + params["lin_bias"]  # (B, 1)

    if Bp != B:                                                       # pad batch to tile
        embed_x = jnp.pad(embed_x, ((0, Bp - B), (0, 0), (0, 0)))
        lin = jnp.pad(lin, ((0, Bp - B), (0, 0)))

    # activation layouts consumed by the kernel (both wrapper-side, cheap XLA):
    #   CIN : (n_tiles, F, E*b_tile)  fields on sublanes, (embed, sample) on lanes
    #   MLP : (Bp, F*E)               samples on sublanes, features on lanes
    x0_cin = (embed_x.reshape(n_tiles, b_tile, F, E)
              .transpose(0, 2, 3, 1).reshape(n_tiles, F, BE))
    flat = embed_x.reshape(Bp, F * E)
    lin_rows = lin[:, 0].reshape(n_tiles, 1, b_tile)                  # batch on lanes

    # ---- CIN params: (C, F*prev) conv weight split per field -> (F, C, prev) ----
    cin_specs, cin_inputs = [], []
    prev, n = F, len(cross_layer_sizes)
    for i, C in enumerate(cross_layer_sizes):
        W = params["cin_w"][i]                                        # (C, F*prev)
        w3 = W.reshape(C, F, prev).transpose(1, 0, 2)                 # (F, C, prev)
        keep = C // 2 if (split_half and i != n - 1) else C
        cin_specs.append((C, prev, keep))
        cin_inputs += [w3, params["cin_b"][i].reshape(C, 1)]
        prev = keep
    fc_w = params["cin_fc_w"]                                         # (1, fc_dim)
    fc_b = params["cin_fc_b"].reshape(1, 1)

    # ---- MLP params with eval-mode BatchNorm folded into weight/bias ----
    mlp_inputs = []
    for layer in params["mlp"]:
        a = layer["gamma"] * lax.rsqrt(layer["var"] + eps)            # (d,)
        w_fold_t = layer["w"].T * a[None, :]                          # (in, d)
        b_fold = ((layer["b"] - layer["mean"]) * a + layer["beta"]).reshape(1, -1)
        mlp_inputs += [w_fold_t, b_fold]
    wo = params["mlp_out_w"]                                          # (1, last)
    bo = params["mlp_out_b"].reshape(1, 1)

    param_arrays = cin_inputs + [fc_w, fc_b] + mlp_inputs + [wo, bo]
    inputs = [x0_cin, flat, lin_rows] + param_arrays

    def param_spec(arr):                    # resident full-array block, constant index
        nd = arr.ndim
        return pl.BlockSpec(arr.shape, lambda t, _nd=nd: (0,) * _nd)

    in_specs = [
        pl.BlockSpec((None, F, BE), lambda t: (t, 0, 0)),             # x0_cin
        pl.BlockSpec((b_tile, F * E), lambda t: (t, 0)),              # flat
        pl.BlockSpec((None, 1, b_tile), lambda t: (t, 0, 0)),         # lin
    ] + [param_spec(a) for a in param_arrays]

    out_specs = pl.BlockSpec((None, 1, b_tile), lambda t: (t, 0, 0))

    kernel = make_xdfm_kernel(b_tile, F, E, tuple(cin_specs), len(mlp_dims))
    out = pl.pallas_call(
        kernel,
        out_shape=jax.ShapeDtypeStruct((n_tiles, 1, b_tile), jnp.float32),
        grid_spec=pltpu.PrefetchScalarGridSpec(
            num_scalar_prefetch=0,
            grid=(n_tiles,),
            in_specs=in_specs,
            out_specs=out_specs),
        compiler_params=pltpu.CompilerParams(
            dimension_semantics=("parallel",),
            vmem_limit_bytes=32 * 1024 * 1024),
    )(*inputs)
    return out.reshape(Bp)[:B]                                        # matches squeeze(1)


def reference_forward(x_int, params, field_dims, embed_dim, mlp_dims,
                      cross_layer_sizes, split_half=True, eps=1e-5):
    """Pure-JAX mirror of the PyTorch module (eval mode), for validation."""
    B, F = x_int.shape
    fd = jnp.asarray(field_dims, jnp.int32)
    offsets = jnp.concatenate([jnp.zeros((1,), jnp.int32), jnp.cumsum(fd)[:-1]])
    idx = x_int + offsets[None, :]
    embed_x = params["embed_table"][idx]                              # (B, F, E)
    lin = jnp.sum(params["lin_table"][idx], axis=1) + params["lin_bias"]

    x0, h = embed_x, embed_x
    xs = []
    n = len(cross_layer_sizes)
    for i, C in enumerate(cross_layer_sizes):
        z = (x0[:, :, None, :] * h[:, None, :, :]).reshape(B, -1, embed_dim)
        out = jnp.einsum('cj,bje->bce', params["cin_w"][i], z)
        out = jnp.maximum(out + params["cin_b"][i][None, :, None], 0.0)
        if split_half and i != n - 1:
            half = C // 2
            x_part, h = out[:, :half, :], out[:, half:, :]
        else:
            x_part, h = out, out
        xs.append(x_part)
    cin_feat = jnp.sum(jnp.concatenate(xs, axis=1), axis=2)           # (B, fc_dim)
    cin_out = cin_feat @ params["cin_fc_w"].T + params["cin_fc_b"]

    z = embed_x.reshape(B, -1)
    for layer in params["mlp"]:
        z = z @ layer["w"].T + layer["b"]
        z = (z - layer["mean"]) / jnp.sqrt(layer["var"] + eps) * layer["gamma"] + layer["beta"]
        z = jnp.maximum(z, 0.0)
    mlp_out = z @ params["mlp_out_w"].T + params["mlp_out_b"]

    return jax.nn.sigmoid((lin + cin_out + mlp_out)[:, 0])


if __name__ == "__main__":
    field_dims = (10, 20, 30, 40)
    embed_dim = 16
    mlp_dims = (32, 16)
    dropout = 0.2                     # eval mode -> identity
    cross_layer_sizes = (16, 16)
    split_half = True
    B = 200                           # 2 grid tiles at b_tile=128, exercises padding
    b_tile = 128                      # lane-dense (1, 128) output rows per grid step

    key = jax.random.PRNGKey(0)
    pkey, xkey = jax.random.split(key)
    params = init_params(pkey, field_dims, embed_dim, mlp_dims,
                         cross_layer_sizes, split_half)
    # categorical inputs, valid for every field (all field dims >= 10)
    x = jax.random.randint(xkey, (B, len(field_dims)), 0, 10, dtype=jnp.int32)

    y = xdeepfm_forward(x, params, field_dims, embed_dim, mlp_dims,
                        cross_layer_sizes, split_half, b_tile=b_tile)
    jax.block_until_ready(y)

    y_ref = reference_forward(x, params, field_dims, embed_dim, mlp_dims,
                              cross_layer_sizes, split_half)
    assert y.shape == (B,)
    assert bool(jnp.all(jnp.isfinite(y)))
    assert bool(jnp.allclose(y, y_ref, atol=1e-4, rtol=1e-4))
    print("KERNEL_OK")
</pallas_src>

<mosaic_0001>
module attributes {stable_mosaic.version = 11 : i64} {
  func.func @kernel(%arg0: i32, %arg1: memref<1x4x2048xf32, #tpu.memory_space<vmem>>, %arg2: memref<128x64xf32, #tpu.memory_space<vmem>>, %arg3: memref<1x1x128xf32, #tpu.memory_space<vmem>>, %arg4: memref<4x16x4xf32, #tpu.memory_space<vmem>>, %arg5: memref<16x1xf32, #tpu.memory_space<vmem>>, %arg6: memref<4x16x8xf32, #tpu.memory_space<vmem>>, %arg7: memref<16x1xf32, #tpu.memory_space<vmem>>, %arg8: memref<1x24xf32, #tpu.memory_space<vmem>>, %arg9: memref<1x1xf32, #tpu.memory_space<vmem>>, %arg10: memref<64x32xf32, #tpu.memory_space<vmem>>, %arg11: memref<1x32xf32, #tpu.memory_space<vmem>>, %arg12: memref<32x16xf32, #tpu.memory_space<vmem>>, %arg13: memref<1x16xf32, #tpu.memory_space<vmem>>, %arg14: memref<1x16xf32, #tpu.memory_space<vmem>>, %arg15: memref<1x1xf32, #tpu.memory_space<vmem>>, %arg16: memref<1x1x128xf32, #tpu.memory_space<vmem>>) attributes {dimension_semantics = [#tpu.dimension_semantics<parallel>], iteration_bounds = array<i64: 2>, scalar_prefetch = 0 : i64, scratch_operands = 0 : i64, tpu.core_type = #tpu.core_type<tc>, window_params = [{transform_indices = @transform_0, window_bounds = array<i64: 1, 4, 2048>}, {transform_indices = @transform_1, window_bounds = array<i64: 128, 64>}, {transform_indices = @transform_2, window_bounds = array<i64: 1, 1, 128>}, {pipeline_mode = #tpu.pipeline_mode<synchronous>, transform_indices = @transform_3, window_bounds = array<i64: 4, 16, 4>}, {pipeline_mode = #tpu.pipeline_mode<synchronous>, transform_indices = @transform_4, window_bounds = array<i64: 16, 1>}, {pipeline_mode = #tpu.pipeline_mode<synchronous>, transform_indices = @transform_5, window_bounds = array<i64: 4, 16, 8>}, {pipeline_mode = #tpu.pipeline_mode<synchronous>, transform_indices = @transform_6, window_bounds = array<i64: 16, 1>}, {pipeline_mode = #tpu.pipeline_mode<synchronous>, transform_indices = @transform_7, window_bounds = array<i64: 1, 24>}, {pipeline_mode = #tpu.pipeline_mode<synchronous>, transform_indices = @transform_8, window_bounds = array<i64: 1, 1>}, {pipeline_mode = #tpu.pipeline_mode<synchronous>, transform_indices = @transform_9, window_bounds = array<i64: 64, 32>}, {pipeline_mode = #tpu.pipeline_mode<synchronous>, transform_indices = @transform_10, window_bounds = array<i64: 1, 32>}, {pipeline_mode = #tpu.pipeline_mode<synchronous>, transform_indices = @transform_11, window_bounds = array<i64: 32, 16>}, {pipeline_mode = #tpu.pipeline_mode<synchronous>, transform_indices = @transform_12, window_bounds = array<i64: 1, 16>}, {pipeline_mode = #tpu.pipeline_mode<synchronous>, transform_indices = @transform_13, window_bounds = array<i64: 1, 16>}, {pipeline_mode = #tpu.pipeline_mode<synchronous>, transform_indices = @transform_14, window_bounds = array<i64: 1, 1>}, {transform_indices = @transform_15, window_bounds = array<i64: 1, 1, 128>}]} {
    %c0 = arith.constant 0 : index
    %c0_0 = arith.constant 0 : index
    %c0_1 = arith.constant 0 : index
    %0 = vector.load %arg1[%c0, %c0_0, %c0_1] : memref<1x4x2048xf32, #tpu.memory_space<vmem>>, vector<1x4x2048xf32>
    %1 = vector.shape_cast %0 : vector<1x4x2048xf32> to vector<4x2048xf32>
    %cst = arith.constant 0.000000e+00 : f32
    %2 = vector.broadcast %cst : f32 to vector<1x2048xf32>
    %cst_2 = arith.constant 0.000000e+00 : f32
    %3 = vector.broadcast %cst_2 : f32 to vector<16x2048xf32>
    %4 = vector.extract_strided_slice %1 {offsets = [0, 0], sizes = [1, 2048], strides = [1, 1]} : vector<4x2048xf32> to vector<1x2048xf32>
    %5 = vector.broadcast %4 : vector<1x2048xf32> to vector<4x2048xf32>
    %6 = arith.mulf %5, %1 : vector<4x2048xf32>
    %c0_3 = arith.constant 0 : index
    %c0_4 = arith.constant 0 : index
    %c0_5 = arith.constant 0 : index
    %7 = vector.load %arg4[%c0_3, %c0_4, %c0_5] : memref<4x16x4xf32, #tpu.memory_space<vmem>>, vector<1x16x4xf32>
    %8 = vector.shape_cast %7 : vector<1x16x4xf32> to vector<16x4xf32>
    %cst_6 = arith.constant dense<0.000000e+00> : vector<16x2048xf32>
    %9 = tpu.matmul %8, %6, %cst_6 {dimension_numbers = #tpu.dot_dimension_numbers<[1], [0], [0], [1], [0, 0, 1, 1], [], []>} : vector<16x4xf32>, vector<4x2048xf32>, vector<16x2048xf32> -> vector<16x2048xf32>
    %10 = arith.addf %3, %9 : vector<16x2048xf32>
    %11 = vector.extract_strided_slice %1 {offsets = [1, 0], sizes = [1, 2048], strides = [1, 1]} : vector<4x2048xf32> to vector<1x2048xf32>
    %12 = vector.broadcast %11 : vector<1x2048xf32> to vector<4x2048xf32>
    %13 = arith.mulf %12, %1 : vector<4x2048xf32>
    %c1 = arith.constant 1 : index
    %c0_7 = arith.constant 0 : index
    %c0_8 = arith.constant 0 : index
    %14 = vector.load %arg4[%c1, %c0_7, %c0_8] : memref<4x16x4xf32, #tpu.memory_space<vmem>>, vector<1x16x4xf32>
    %15 = vector.shape_cast %14 : vector<1x16x4xf32> to vector<16x4xf32>
    %cst_9 = arith.constant dense<0.000000e+00> : vector<16x2048xf32>
    %16 = tpu.matmul %15, %13, %cst_9 {dimension_numbers = #tpu.dot_dimension_numbers<[1], [0], [0], [1], [0, 0, 1, 1], [], []>} : vector<16x4xf32>, vector<4x2048xf32>, vector<16x2048xf32> -> vector<16x2048xf32>
    %17 = arith.addf %10, %16 : vector<16x2048xf32>
    %18 = vector.extract_strided_slice %1 {offsets = [2, 0], sizes = [1, 2048], strides = [1, 1]} : vector<4x2048xf32> to vector<1x2048xf32>
    %19 = vector.broadcast %18 : vector<1x2048xf32> to vector<4x2048xf32>
    %20 = arith.mulf %19, %1 : vector<4x2048xf32>
    %c2 = arith.constant 2 : index
    %c0_10 = arith.constant 0 : index
    %c0_11 = arith.constant 0 : index
    %21 = vector.load %arg4[%c2, %c0_10, %c0_11] : memref<4x16x4xf32, #tpu.memory_space<vmem>>, vector<1x16x4xf32>
    %22 = vector.shape_cast %21 : vector<1x16x4xf32> to vector<16x4xf32>
    %cst_12 = arith.constant dense<0.000000e+00> : vector<16x2048xf32>
    %23 = tpu.matmul %22, %20, %cst_12 {dimension_numbers = #tpu.dot_dimension_numbers<[1], [0], [0], [1], [0, 0, 1, 1], [], []>} : vector<16x4xf32>, vector<4x2048xf32>, vector<16x2048xf32> -> vector<16x2048xf32>
    %24 = arith.addf %17, %23 : vector<16x2048xf32>
    %25 = vector.extract_strided_slice %1 {offsets = [3, 0], sizes = [1, 2048], strides = [1, 1]} : vector<4x2048xf32> to vector<1x2048xf32>
    %26 = vector.broadcast %25 : vector<1x2048xf32> to vector<4x2048xf32>
    %27 = arith.mulf %26, %1 : vector<4x2048xf32>
    %c3 = arith.constant 3 : index
    %c0_13 = arith.constant 0 : index
    %c0_14 = arith.constant 0 : index
    %28 = vector.load %arg4[%c3, %c0_13, %c0_14] : memref<4x16x4xf32, #tpu.memory_space<vmem>>, vector<1x16x4xf32>
    %29 = vector.shape_cast %28 : vector<1x16x4xf32> to vector<16x4xf32>
    %cst_15 = arith.constant dense<0.000000e+00> : vector<16x2048xf32>
    %30 = tpu.matmul %29, %27, %cst_15 {dimension_numbers = #tpu.dot_dimension_numbers<[1], [0], [0], [1], [0, 0, 1, 1], [], []>} : vector<16x4xf32>, vector<4x2048xf32>, vector<16x2048xf32> -> vector<16x2048xf32>
    %31 = arith.addf %24, %30 : vector<16x2048xf32>
    %c0_16 = arith.constant 0 : index
    %c0_17 = arith.constant 0 : index
    %32 = vector.load %arg5[%c0_16, %c0_17] : memref<16x1xf32, #tpu.memory_space<vmem>>, vector<16x1xf32>
    %33 = vector.broadcast %32 : vector<16x1xf32> to vector<16x2048xf32>
    %34 = arith.addf %31, %33 : vector<16x2048xf32>
    %cst_18 = arith.constant 0.000000e+00 : f32
    %35 = vector.broadcast %cst_18 : f32 to vector<16x2048xf32>
    %36 = arith.maximumf %34, %35 : vector<16x2048xf32>
    %37 = vector.extract_strided_slice %36 {offsets = [0, 0], sizes = [8, 2048], strides = [1, 1]} : vector<16x2048xf32> to vector<8x2048xf32>
    %38 = vector.extract_strided_slice %36 {offsets = [8, 0], sizes = [8, 2048], strides = [1, 1]} : vector<16x2048xf32> to vector<8x2048xf32>
    %c0_19 = arith.constant 0 : index
    %c0_20 = arith.constant 0 : index
    %39 = vector.load %arg8[%c0_19, %c0_20] : memref<1x24xf32, #tpu.memory_space<vmem>>, vector<1x8xf32>
    %cst_21 = arith.constant dense<0.000000e+00> : vector<1x2048xf32>
    %40 = tpu.matmul %39, %37, %cst_21 {dimension_numbers = #tpu.dot_dimension_numbers<[1], [0], [0], [1], [0, 0, 1, 1], [], []>} : vector<1x8xf32>, vector<8x2048xf32>, vector<1x2048xf32> -> vector<1x2048xf32>
    %41 = arith.addf %2, %40 : vector<1x2048xf32>
    %cst_22 = arith.constant 0.000000e+00 : f32
    %42 = vector.broadcast %cst_22 : f32 to vector<16x2048xf32>
    %43 = vector.extract_strided_slice %1 {offsets = [0, 0], sizes = [1, 2048], strides = [1, 1]} : vector<4x2048xf32> to vector<1x2048xf32>
    %44 = vector.broadcast %43 : vector<1x2048xf32> to vector<8x2048xf32>
    %45 = arith.mulf %44, %38 : vector<8x2048xf32>
    %c0_23 = arith.constant 0 : index
    %c0_24 = arith.constant 0 : index
    %c0_25 = arith.constant 0 : index
    %46 = vector.load %arg6[%c0_23, %c0_24, %c0_25] : memref<4x16x8xf32, #tpu.memory_space<vmem>>, vector<1x16x8xf32>
    %47 = vector.shape_cast %46 : vector<1x16x8xf32> to vector<16x8xf32>
    %cst_26 = arith.constant dense<0.000000e+00> : vector<16x2048xf32>
    %48 = tpu.matmul %47, %45, %cst_26 {dimension_numbers = #tpu.dot_dimension_numbers<[1], [0], [0], [1], [0, 0, 1, 1], [], []>} : vector<16x8xf32>, vector<8x2048xf32>, vector<16x2048xf32> -> vector<16x2048xf32>
    %49 = arith.addf %42, %48 : vector<16x2048xf32>
    %50 = vector.extract_strided_slice %1 {offsets = [1, 0], sizes = [1, 2048], strides = [1, 1]} : vector<4x2048xf32> to vector<1x2048xf32>
    %51 = vector.broadcast %50 : vector<1x2048xf32> to vector<8x2048xf32>
    %52 = arith.mulf %51, %38 : vector<8x2048xf32>
    %c1_27 = arith.constant 1 : index
    %c0_28 = arith.constant 0 : index
    %c0_29 = arith.constant 0 : index
    %53 = vector.load %arg6[%c1_27, %c0_28, %c0_29] : memref<4x16x8xf32, #tpu.memory_space<vmem>>, vector<1x16x8xf32>
    %54 = vector.shape_cast %53 : vector<1x16x8xf32> to vector<16x8xf32>
    %cst_30 = arith.constant dense<0.000000e+00> : vector<16x2048xf32>
    %55 = tpu.matmul %54, %52, %cst_30 {dimension_numbers = #tpu.dot_dimension_numbers<[1], [0], [0], [1], [0, 0, 1, 1], [], []>} : vector<16x8xf32>, vector<8x2048xf32>, vector<16x2048xf32> -> vector<16x2048xf32>
    %56 = arith.addf %49, %55 : vector<16x2048xf32>
    %57 = vector.extract_strided_slice %1 {offsets = [2, 0], sizes = [1, 2048], strides = [1, 1]} : vector<4x2048xf32> to vector<1x2048xf32>
    %58 = vector.broadcast %57 : vector<1x2048xf32> to vector<8x2048xf32>
    %59 = arith.mulf %58, %38 : vector<8x2048xf32>
    %c2_31 = arith.constant 2 : index
    %c0_32 = arith.constant 0 : index
    %c0_33 = arith.constant 0 : index
    %60 = vector.load %arg6[%c2_31, %c0_32, %c0_33] : memref<4x16x8xf32, #tpu.memory_space<vmem>>, vector<1x16x8xf32>
    %61 = vector.shape_cast %60 : vector<1x16x8xf32> to vector<16x8xf32>
    %cst_34 = arith.constant dense<0.000000e+00> : vector<16x2048xf32>
    %62 = tpu.matmul %61, %59, %cst_34 {dimension_numbers = #tpu.dot_dimension_numbers<[1], [0], [0], [1], [0, 0, 1, 1], [], []>} : vector<16x8xf32>, vector<8x2048xf32>, vector<16x2048xf32> -> vector<16x2048xf32>
    %63 = arith.addf %56, %62 : vector<16x2048xf32>
    %64 = vector.extract_strided_slice %1 {offsets = [3, 0], sizes = [1, 2048], strides = [1, 1]} : vector<4x2048xf32> to vector<1x2048xf32>
    %65 = vector.broadcast %64 : vector<1x2048xf32> to vector<8x2048xf32>
    %66 = arith.mulf %65, %38 : vector<8x2048xf32>
    %c3_35 = arith.constant 3 : index
    %c0_36 = arith.constant 0 : index
    %c0_37 = arith.constant 0 : index
    %67 = vector.load %arg6[%c3_35, %c0_36, %c0_37] : memref<4x16x8xf32, #tpu.memory_space<vmem>>, vector<1x16x8xf32>
    %68 = vector.shape_cast %67 : vector<1x16x8xf32> to vector<16x8xf32>
    %cst_38 = arith.constant dense<0.000000e+00> : vector<16x2048xf32>
    %69 = tpu.matmul %68, %66, %cst_38 {dimension_numbers = #tpu.dot_dimension_numbers<[1], [0], [0], [1], [0, 0, 1, 1], [], []>} : vector<16x8xf32>, vector<8x2048xf32>, vector<16x2048xf32> -> vector<16x2048xf32>
    %70 = arith.addf %63, %69 : vector<16x2048xf32>
    %c0_39 = arith.constant 0 : index
    %c0_40 = arith.constant 0 : index
    %71 = vector.load %arg7[%c0_39, %c0_40] : memref<16x1xf32, #tpu.memory_space<vmem>>, vector<16x1xf32>
    %72 = vector.broadcast %71 : vector<16x1xf32> to vector<16x2048xf32>
    %73 = arith.addf %70, %72 : vector<16x2048xf32>
    %cst_41 = arith.constant 0.000000e+00 : f32
    %74 = vector.broadcast %cst_41 : f32 to vector<16x2048xf32>
    %75 = arith.maximumf %73, %74 : vector<16x2048xf32>
    %c0_42 = arith.constant 0 : index
    %c8 = arith.constant 8 : index
    %76 = vector.load %arg8[%c0_42, %c8] : memref<1x24xf32, #tpu.memory_space<vmem>>, vector<1x16xf32>
    %cst_43 = arith.constant dense<0.000000e+00> : vector<1x2048xf32>
    %77 = tpu.matmul %76, %75, %cst_43 {dimension_numbers = #tpu.dot_dimension_numbers<[1], [0], [0], [1], [0, 0, 1, 1], [], []>} : vector<1x16xf32>, vector<16x2048xf32>, vector<1x2048xf32> -> vector<1x2048xf32>
    %78 = arith.addf %41, %77 : vector<1x2048xf32>
    %79 = vector.extract_strided_slice %78 {offsets = [0, 0], sizes = [1, 128], strides = [1, 1]} : vector<1x2048xf32> to vector<1x128xf32>
    %80 = vector.extract_strided_slice %78 {offsets = [0, 128], sizes = [1, 128], strides = [1, 1]} : vector<1x2048xf32> to vector<1x128xf32>
    %81 = arith.addf %79, %80 : vector<1x128xf32>
    %82 = vector.extract_strided_slice %78 {offsets = [0, 256], sizes = [1, 128], strides = [1, 1]} : vector<1x2048xf32> to vector<1x128xf32>
    %83 = arith.addf %81, %82 : vector<1x128xf32>
    %84 = vector.extract_strided_slice %78 {offsets = [0, 384], sizes = [1, 128], strides = [1, 1]} : vector<1x2048xf32> to vector<1x128xf32>
    %85 = arith.addf %83, %84 : vector<1x128xf32>
    %86 = vector.extract_strided_slice %78 {offsets = [0, 512], sizes = [1, 128], strides = [1, 1]} : vector<1x2048xf32> to vector<1x128xf32>
    %87 = arith.addf %85, %86 : vector<1x128xf32>
    %88 = vector.extract_strided_slice %78 {offsets = [0, 640], sizes = [1, 128], strides = [1, 1]} : vector<1x2048xf32> to vector<1x128xf32>
    %89 = arith.addf %87, %88 : vector<1x128xf32>
    %90 = vector.extract_strided_slice %78 {offsets = [0, 768], sizes = [1, 128], strides = [1, 1]} : vector<1x2048xf32> to vector<1x128xf32>
    %91 = arith.addf %89, %90 : vector<1x128xf32>
    %92 = vector.extract_strided_slice %78 {offsets = [0, 896], sizes = [1, 128], strides = [1, 1]} : vector<1x2048xf32> to vector<1x128xf32>
    %93 = arith.addf %91, %92 : vector<1x128xf32>
    %94 = vector.extract_strided_slice %78 {offsets = [0, 1024], sizes = [1, 128], strides = [1, 1]} : vector<1x2048xf32> to vector<1x128xf32>
    %95 = arith.addf %93, %94 : vector<1x128xf32>
    %96 = vector.extract_strided_slice %78 {offsets = [0, 1152], sizes = [1, 128], strides = [1, 1]} : vector<1x2048xf32> to vector<1x128xf32>
    %97 = arith.addf %95, %96 : vector<1x128xf32>
    %98 = vector.extract_strided_slice %78 {offsets = [0, 1280], sizes = [1, 128], strides = [1, 1]} : vector<1x2048xf32> to vector<1x128xf32>
    %99 = arith.addf %97, %98 : vector<1x128xf32>
    %100 = vector.extract_strided_slice %78 {offsets = [0, 1408], sizes = [1, 128], strides = [1, 1]} : vector<1x2048xf32> to vector<1x128xf32>
    %101 = arith.addf %99, %100 : vector<1x128xf32>
    %102 = vector.extract_strided_slice %78 {offsets = [0, 1536], sizes = [1, 128], strides = [1, 1]} : vector<1x2048xf32> to vector<1x128xf32>
    %103 = arith.addf %101, %102 : vector<1x128xf32>
    %104 = vector.extract_strided_slice %78 {offsets = [0, 1664], sizes = [1, 128], strides = [1, 1]} : vector<1x2048xf32> to vector<1x128xf32>
    %105 = arith.addf %103, %104 : vector<1x128xf32>
    %106 = vector.extract_strided_slice %78 {offsets = [0, 1792], sizes = [1, 128], strides = [1, 1]} : vector<1x2048xf32> to vector<1x128xf32>
    %107 = arith.addf %105, %106 : vector<1x128xf32>
    %108 = vector.extract_strided_slice %78 {offsets = [0, 1920], sizes = [1, 128], strides = [1, 1]} : vector<1x2048xf32> to vector<1x128xf32>
    %109 = arith.addf %107, %108 : vector<1x128xf32>
    %c0_44 = arith.constant 0 : index
    %c0_45 = arith.constant 0 : index
    %110 = vector.load %arg9[%c0_44, %c0_45] : memref<1x1xf32, #tpu.memory_space<vmem>>, vector<1x1xf32>
    %111 = vector.broadcast %110 : vector<1x1xf32> to vector<1x128xf32>
    %112 = arith.addf %109, %111 : vector<1x128xf32>
    %c0_46 = arith.constant 0 : index
    %c0_47 = arith.constant 0 : index
    %113 = vector.load %arg2[%c0_46, %c0_47] : memref<128x64xf32, #tpu.memory_space<vmem>>, vector<128x64xf32>
    %c0_48 = arith.constant 0 : index
    %c0_49 = arith.constant 0 : index
    %114 = vector.load %arg10[%c0_48, %c0_49] : memref<64x32xf32, #tpu.memory_space<vmem>>, vector<64x32xf32>
    %cst_50 = arith.constant dense<0.000000e+00> : vector<128x32xf32>
    %115 = tpu.matmul %113, %114, %cst_50 {dimension_numbers = #tpu.dot_dimension_numbers<[1], [0], [0], [1], [0, 0, 1, 1], [], []>} : vector<128x64xf32>, vector<64x32xf32>, vector<128x32xf32> -> vector<128x32xf32>
    %c0_51 = arith.constant 0 : index
    %c0_52 = arith.constant 0 : index
    %116 = vector.load %arg11[%c0_51, %c0_52] : memref<1x32xf32, #tpu.memory_space<vmem>>, vector<1x32xf32>
    %117 = vector.broadcast %116 : vector<1x32xf32> to vector<128x32xf32>
    %118 = arith.addf %115, %117 : vector<128x32xf32>
    %cst_53 = arith.constant 0.000000e+00 : f32
    %119 = vector.broadcast %cst_53 : f32 to vector<128x32xf32>
    %120 = arith.maximumf %118, %119 : vector<128x32xf32>
    %c0_54 = arith.constant 0 : index
    %c0_55 = arith.constant 0 : index
    %121 = vector.load %arg12[%c0_54, %c0_55] : memref<32x16xf32, #tpu.memory_space<vmem>>, vector<32x16xf32>
    %cst_56 = arith.constant dense<0.000000e+00> : vector<128x16xf32>
    %122 = tpu.matmul %120, %121, %cst_56 {dimension_numbers = #tpu.dot_dimension_numbers<[1], [0], [0], [1], [0, 0, 1, 1], [], []>} : vector<128x32xf32>, vector<32x16xf32>, vector<128x16xf32> -> vector<128x16xf32>
    %c0_57 = arith.constant 0 : index
    %c0_58 = arith.constant 0 : index
    %123 = vector.load %arg13[%c0_57, %c0_58] : memref<1x16xf32, #tpu.memory_space<vmem>>, vector<1x16xf32>
    %124 = vector.broadcast %123 : vector<1x16xf32> to vector<128x16xf32>
    %125 = arith.addf %122, %124 : vector<128x16xf32>
    %cst_59 = arith.constant 0.000000e+00 : f32
    %126 = vector.broadcast %cst_59 : f32 to vector<128x16xf32>
    %127 = arith.maximumf %125, %126 : vector<128x16xf32>
    %c0_60 = arith.constant 0 : index
    %c0_61 = arith.constant 0 : index
    %128 = vector.load %arg14[%c0_60, %c0_61] : memref<1x16xf32, #tpu.memory_space<vmem>>, vector<1x16xf32>
    %cst_62 = arith.constant dense<0.000000e+00> : vector<1x128xf32>
    %129 = tpu.matmul %128, %127, %cst_62 {dimension_numbers = #tpu.dot_dimension_numbers<[1], [1], [0], [0], [0, 0, 1, 0], [], []>} : vector<1x16xf32>, vector<128x16xf32>, vector<1x128xf32> -> vector<1x128xf32>
    %c0_63 = arith.constant 0 : index
    %c0_64 = arith.constant 0 : index
    %130 = vector.load %arg15[%c0_63, %c0_64] : memref<1x1xf32, #tpu.memory_space<vmem>>, vector<1x1xf32>
    %131 = vector.broadcast %130 : vector<1x1xf32> to vector<1x128xf32>
    %132 = arith.addf %129, %131 : vector<1x128xf32>
    %c0_65 = arith.constant 0 : index
    %c0_66 = arith.constant 0 : index
    %c0_67 = arith.constant 0 : index
    %133 = vector.load %arg3[%c0_65, %c0_66, %c0_67] : memref<1x1x128xf32, #tpu.memory_space<vmem>>, vector<1x1x128xf32>
    %134 = vector.shape_cast %133 : vector<1x1x128xf32> to vector<1x128xf32>
    %135 = arith.addf %134, %112 : vector<1x128xf32>
    %136 = arith.addf %135, %132 : vector<1x128xf32>
    %137 = arith.negf %136 : vector<1x128xf32>
    %138 = math.exp %137 : vector<1x128xf32>
    %cst_68 = arith.constant 1.000000e+00 : f32
    %139 = vector.broadcast %cst_68 : f32 to vector<1x128xf32>
    %140 = arith.addf %139, %138 : vector<1x128xf32>
    %141 = arith.divf %139, %140 : vector<1x128xf32>
    %c0_69 = arith.constant 0 : index
    %c0_70 = arith.constant 0 : index
    %c0_71 = arith.constant 0 : index
    %142 = vector.load %arg16[%c0_69, %c0_70, %c0_71] : memref<1x1x128xf32, #tpu.memory_space<vmem>>, vector<1x1x128xf32>
    %143 = vector.shape_cast %142 : vector<1x1x128xf32> to vector<1x128xf32>
    %144 = vector.shape_cast %141 : vector<1x128xf32> to vector<1x1x128xf32>
    tpu.vector_store %arg16[%c0_69, %c0_70, %c0_71], %144 {strides = array<i32>} : memref<1x1x128xf32, #tpu.memory_space<vmem>>, vector<1x1x128xf32>,
    return
  }
  func.func @transform_0(%arg0: i32) -> (i32, i32, i32) {
    %c0_i32 = arith.constant 0 : i32
    %c0_i32_0 = arith.constant 0 : i32
    %c0_i32_1 = arith.constant 0 : i32
    return %arg0, %c0_i32, %c0_i32_0 : i32, i32, i32
  }
  func.func @transform_1(%arg0: i32) -> (i32, i32) {
    %c0_i32 = arith.constant 0 : i32
    %c0_i32_0 = arith.constant 0 : i32
    return %arg0, %c0_i32 : i32, i32
  }
  func.func @transform_2(%arg0: i32) -> (i32, i32, i32) {
    %c0_i32 = arith.constant 0 : i32
    %c0_i32_0 = arith.constant 0 : i32
    %c0_i32_1 = arith.constant 0 : i32
    return %arg0, %c0_i32, %c0_i32_0 : i32, i32, i32
  }
  func.func @transform_3(%arg0: i32) -> (i32, i32, i32) {
    %c0_i32 = arith.constant 0 : i32
    %c0_i32_0 = arith.constant 0 : i32
    %c0_i32_1 = arith.constant 0 : i32
    %c0_i32_2 = arith.constant 0 : i32
    return %c0_i32, %c0_i32_0, %c0_i32_1 : i32, i32, i32
  }
  func.func @transform_4(%arg0: i32) -> (i32, i32) {
    %c0_i32 = arith.constant 0 : i32
    %c0_i32_0 = arith.constant 0 : i32
    %c0_i32_1 = arith.constant 0 : i32
    return %c0_i32, %c0_i32_0 : i32, i32
  }
  func.func @transform_5(%arg0: i32) -> (i32, i32, i32) {
    %c0_i32 = arith.constant 0 : i32
    %c0_i32_0 = arith.constant 0 : i32
    %c0_i32_1 = arith.constant 0 : i32
    %c0_i32_2 = arith.constant 0 : i32
    return %c0_i32, %c0_i32_0, %c0_i32_1 : i32, i32, i32
  }
  func.func @transform_6(%arg0: i32) -> (i32, i32) {
    %c0_i32 = arith.constant 0 : i32
    %c0_i32_0 = arith.constant 0 : i32
    %c0_i32_1 = arith.constant 0 : i32
    return %c0_i32, %c0_i32_0 : i32, i32
  }
  func.func @transform_7(%arg0: i32) -> (i32, i32) {
    %c0_i32 = arith.constant 0 : i32
    %c0_i32_0 = arith.constant 0 : i32
    %c0_i32_1 = arith.constant 0 : i32
    return %c0_i32, %c0_i32_0 : i32, i32
  }
  func.func @transform_8(%arg0: i32) -> (i32, i32) {
    %c0_i32 = arith.constant 0 : i32
    %c0_i32_0 = arith.constant 0 : i32
    %c0_i32_1 = arith.constant 0 : i32
    return %c0_i32, %c0_i32_0 : i32, i32
  }
  func.func @transform_9(%arg0: i32) -> (i32, i32) {
    %c0_i32 = arith.constant 0 : i32
    %c0_i32_0 = arith.constant 0 : i32
    %c0_i32_1 = arith.constant 0 : i32
    return %c0_i32, %c0_i32_0 : i32, i32
  }
  func.func @transform_10(%arg0: i32) -> (i32, i32) {
    %c0_i32 = arith.constant 0 : i32
    %c0_i32_0 = arith.constant 0 : i32
    %c0_i32_1 = arith.constant 0 : i32
    return %c0_i32, %c0_i32_0 : i32, i32
  }
  func.func @transform_11(%arg0: i32) -> (i32, i32) {
    %c0_i32 = arith.constant 0 : i32
    %c0_i32_0 = arith.constant 0 : i32
    %c0_i32_1 = arith.constant 0 : i32
    return %c0_i32, %c0_i32_0 : i32, i32
  }
  func.func @transform_12(%arg0: i32) -> (i32, i32) {
    %c0_i32 = arith.constant 0 : i32
    %c0_i32_0 = arith.constant 0 : i32
    %c0_i32_1 = arith.constant 0 : i32
    return %c0_i32, %c0_i32_0 : i32, i32
  }
  func.func @transform_13(%arg0: i32) -> (i32, i32) {
    %c0_i32 = arith.constant 0 : i32
    %c0_i32_0 = arith.constant 0 : i32
    %c0_i32_1 = arith.constant 0 : i32
    return %c0_i32, %c0_i32_0 : i32, i32
  }
  func.func @transform_14(%arg0: i32) -> (i32, i32) {
    %c0_i32 = arith.constant 0 : i32
    %c0_i32_0 = arith.constant 0 : i32
    %c0_i32_1 = arith.constant 0 : i32
    return %c0_i32, %c0_i32_0 : i32, i32
  }
  func.func @transform_15(%arg0: i32) -> (i32, i32, i32) {
    %c0_i32 = arith.constant 0 : i32
    %c0_i32_0 = arith.constant 0 : i32
    %c0_i32_1 = arith.constant 0 : i32
    return %arg0, %c0_i32, %c0_i32_0 : i32, i32, i32
  }
}

</mosaic_0001>

<bundles_post_ra>
// kernel: tpu_custom_call.1
= control target key start
LH: loop header
LB: loop body
LE: loop exit
PB: predicated region body
PF: predicated region fallthrough
CT: control target
= control target key end

     0   :  { %s11381_s0 = inlined_call_operand.vmem [shape: f32[2,4,2048], index: 0, kind: input, shape index: {}]   ;;  %s11382_s1 = inlined_call_operand.vmem [shape: f32[256,64], index: 1, kind: input, shape index: {}]   ;;  %s11383_s2 = inlined_call_operand.vmem [shape: f32[2,1,128], index: 2, kind: input, shape index: {}]   ;;  %s11384_s3 = inlined_call_operand.vmem [shape: f32[4,16,4], index: 3, kind: input, shape index: {}]   ;;  %s11385_s4 = inlined_call_operand.vmem [shape: f32[16,1], index: 4, kind: input, shape index: {}]   ;;  %s11386_s5 = inlined_call_operand.vmem [shape: f32[4,16,8], index: 5, kind: input, shape index: {}]   ;;  %s11387_s6 = inlined_call_operand.vmem [shape: f32[16,1], index: 6, kind: input, shape index: {}]   ;;  %s11388_s7 = inlined_call_operand.vmem [shape: f32[1,24], index: 7, kind: input, shape index: {}]   ;;  %s11389_s8 = inlined_call_operand.<no memory space> [shape: f32[1,1], index: 8, kind: input, shape index: {}]   ;;  %s11390_s9 = inlined_call_operand.vmem [shape: f32[64,32], index: 9, kind: input, shape index: {}]   ;;  %s11391_s10 = inlined_call_operand.vmem [shape: f32[1,32], index: 10, kind: input, shape index: {}]   ;;  %s11392_s11 = inlined_call_operand.vmem [shape: f32[32,16], index: 11, kind: input, shape index: {}]   ;;  %s11393_s12 = inlined_call_operand.vmem [shape: f32[1,16], index: 12, kind: input, shape index: {}]   ;;  %s11394_s13 = inlined_call_operand.vmem [shape: f32[1,16], index: 13, kind: input, shape index: {}]   ;;  %s11395_s15 = inlined_call_operand.hbm [shape: f32[2,1,128], index: 15, kind: output, shape index: {}]   ;;  %s11396_s14 = inlined_call_operand.<no memory space> [shape: f32[1,1], index: 14, kind: input, shape index: {}]  }
   0x1   :  { %11457 = sst [smem:[#allocation100_spill]] %s11381_s0  ;;  %v20_v0 = vstv %s11389_s8  ;;  %v22_v1 = vstv %s11396_s14 }
   0x2   :  { %11458 = sst [smem:[#allocation101_spill]] %s11382_s1  ;;  %21 = vst [vmem:[#allocation2] sm:$0x1] %v20_v0  ;;  %23 = vst [vmem:[#allocation3] sm:$0x1] %v22_v1 }
   0x3   :  { %11459 = sst [smem:[#allocation102_spill]] %s11383_s2 }
   0x4   :  { %24 = vsyncpa [#allocation5], 0 }
   0x5   :  { %26 = vsyncpa [#allocation5 + $0x1], 0  ;;  %s9272_s22 = smov 0   ;;  %s9274_s23 = smov 0  }
   0x6   :  { %s9276_s24 = smov 0   ;;  %s9278_s25 = smov 0  }
   0x7 LB: > { %s9293_s8 = sadd.s32 4294967295, %s9179_s25   ;;  %s8609_s14 = sadd.s32 4294967294, %s9179_s25   ;;  %s9179_s25 = sphi %s9278_s25, %s11700_s25   ;;  %s9175_s24 = sphi %s9276_s24, %s11699_s24   ;;  %s9171_s23 = sphi %s9274_s23, %s11698_s23   ;;  %s9167_s22 = sphi %s9272_s22, %s11697_s22  }
   0x8   : > { %s9297_s26 = sadd.s32 1, %s9179_s25   ;;  %s369_s27 = sadd.s32 1, %s9175_s24 }
   0x9   : > { %s366_s28 = ssub.s32 %s9179_s25, %s9297_s26  ;;  %p379_p0 = scmp.ne.s32.totalorder %s9175_s24, %s9171_s23 }
   0xa   : > { %p367_p1 = scmp.eq.s32.totalorder %s366_s28, 0  ;;  %p380_p2 = scmp.eq.s32.totalorder %s9293_s8, 1 }
   0xb   : > { %p385_p3 = scmp.ne.s32.totalorder %s9171_s23, %s9167_s22  ;;  %p386_p4 = scmp.eq.s32.totalorder %s8609_s14, 1 }
   0xc   : > { %s9308_s29 = scalar_select %p367_p1, %s9175_s24, %s369_s27  }
   0xd   : > { %p9310_p5 = por %p380_p2, %p379_p0  ;;  %p9314_p6 = por %p386_p4, %p385_p3 }
   0xe   : > { %p8612_p7 = scmp.ge.s32.totalorder %s9179_s25, 1  ;;  %p463_p8 = scmp.lt.s32.totalorder %s9179_s25, 3 }
  0x10   : > { %p464_p9 = pnand %p8612_p7, %p463_p8 }
  0x12   : > { %467 = sbr.rel (%p464_p9) target bundleno = 1451 (0x5ab), region = 80 }
  0x17   : > { %p518_p10 = scmp.lt.s32.totalorder %s9293_s8, 1  ;;  %v548_v2 = vlaneseq  ;;  %v11397_v3 = vmov 0.0   ;;  %s11462_s0 = sld [smem:[#allocation100_spill]]  ;;  %vm896_vm0 = vcmask 1043456   ;;  %vm889_vm1 = vcmask 31744   ;;  %v9422_v36 = vld [vmem:[%s11384_s3 + $0x10] sm:$0xff] }
  0x18   : > { %1009 = vmatprep.mubr.f32.mxu0 %v11397_v3  ;;  %1394 = vmatprep.mubr.f32.mxu1 %v11397_v3  ;;  %v9466_v49 = vld [vmem:[%s11384_s3 + $0x18] sm:$0xff]  ;;  %vm4075_vm2 = vcmask 64512   ;;  %vm6749_vm3 = vcmask 130048   ;;  %s11694_s1 = sld [smem:[#allocation101_spill]]  ;;  %vm7947_vm4 = vcmask 523264   ;;  %vm8168_vm5 = vcmask 261120  }
  0x19   : > { %s9324_s17 = scalar_select %p518_p10, %s9293_s8, 1  ;;  %v9326_v4 = vshrl.u32 %v548_v2, 7  ;;  %vm9184_vm6 = vmmov 0  }
  0x1a   : > { %s11696_s2 = sld [smem:[#allocation102_spill]] }
  0x1b   : > { %s8892_s18 = sshll.u32 %s9324_s17, 6  ;;  %v9330_v5 = vsub.s32 1, %v9326_v4  ;;  %v9333_v6 = vsub.s32 5, %v9326_v4  ;;  %v9344_v8 = vsub.s32 0, %v9326_v4  ;;  %v9353_v11 = vsub.s32 4, %v9326_v4 }
  0x1d   : > { %s9338_s21 = scalar_lea.vmem %s11462_s0, %s8892_s18  ;;  %11463 = vst [vmem:[#allocation7_spill] sm:$0xff] %v9344_v8  ;;  %s9183_s18 = smov 120  }
  0x1e   : > { %v9341_v7 = vld [vmem:[%s9338_s21] sm:$0xff]  ;;  %v9347_v9 = vld [vmem:[%s9338_s21 + $0x28] sm:$0xff]  ;;  %v9368_v16 = vld [vmem:[%s9338_s21 + $0x38] sm:$0xff] }
  0x1f   : > { %v9350_v10 = vld [vmem:[%s9338_s21 + $0x8] sm:$0xff]  ;;  %v9357_v12 = vcombine.high %v9341_v7, %v9341_v7  ;;  %v733_v13 = vrot.slane %v9341_v7, %v9333_v6  ;;  %v9363_v14 = vcombine.high %v9347_v9, %v9347_v9  ;;  %v773_v15 = vrot.slane %v9347_v9, %v9333_v6  ;;  %v9413_v33 = vld [vmem:[%s9338_s21 + $0x10] sm:$0xff]  ;;  %v9449_v45 = vld [vmem:[%s9338_s21 + $0x18] sm:$0xff] }
  0x20   : > { %v729_v17 = vrot.slane %v9341_v7, %v9330_v5  ;;  %v769_v18 = vrot.slane %v9347_v9, %v9330_v5  ;;  %v9376_v19 = vcombine.high %v9350_v10, %v9350_v10  ;;  %v741_v20 = vrot.slane %v9350_v10, %v9333_v6  ;;  %v9504_v60 = vld [vmem:[%s9338_s21 + $0x20] sm:$0xff] }
  0x21   : > { %v9381_v21 = vrot.slane %v733_v13, %v9330_v5  ;;  %v9384_v22 = vrot.slane %v773_v15, %v9330_v5  ;;  %v9388_v23 = vcombine.high %v9368_v16, %v9368_v16  ;;  %v789_v24 = vrot.slane %v9368_v16, %v9333_v6 }
  0x22   : > { %v9393_v25 = vrot.slane %v729_v17, %v9330_v5  ;;  %v9396_v26 = vrot.slane %v769_v18, %v9330_v5  ;;  %v9399_v27 = vrot.slane %v741_v20, %v9330_v5  ;;  %v737_v28 = vrot.slane %v9350_v10, %v9330_v5 }
  0x23   : > { %11464 = vst [vmem:[#allocation8_spill] sm:$0xff] %v9381_v21  ;;  %v871_v29 = vmul.f32 %v9381_v21, %v9357_v12  ;;  %v881_v30 = vmul.f32 %v9384_v22, %v9363_v14  ;;  %v9408_v31 = vrot.slane %v789_v24, %v9330_v5  ;;  %v785_v32 = vrot.slane %v9368_v16, %v9330_v5 }
  0x24   : > { %11465 = vst [vmem:[#allocation9_spill] sm:$0xff] %v9393_v25  ;;  %v870_v34 = vmul.f32 %v9393_v25, %v9341_v7  ;;  %v880_v35 = vmul.f32 %v9396_v26, %v9347_v9  ;;  %v873_v37 = vmul.f32 %v9399_v27, %v9376_v19  ;;  %v9427_v38 = vrot.slane %v737_v28, %v9330_v5 }
  0x25   : > { %8619 = vmatprep.subr.msk.mxu0 %vm896_vm0, %v871_v29  ;;  %8639 = vmatprep.subr.msk.mxu1 %vm896_vm0, %v881_v30  ;;  %v885_v39 = vmul.f32 %v9408_v31, %v9388_v23  ;;  %v9434_v40 = vrot.slane %v785_v32, %v9330_v5  ;;  %v9438_v41 = vcombine.high %v9413_v33, %v9413_v33  ;;  %v9560_v30 = vld [vmem:[%s9338_s21 + $0x30] sm:$0xff]  ;;  %v3962_v32 = vld [vmem:[%s11385_s4 + $0x8] sm:$0xff]  ;;  %s11146_s21 = sshll.u32 %s9293_s8, 4  ;;  %s531_s8 = scalar_lea.vmem %s11696_s2, %s9324_s17 }
  0x26   : > { %8620 = vmatpush1.msk.msra.mxu0 %vm896_vm0, %v870_v34  ;;  %8640 = vmatpush1.msk.msra.mxu1 %vm896_vm0, %v880_v35  ;;  %v872_v42 = vmul.f32 %v9427_v38, %v9350_v10  ;;  %v749_v43 = vrot.slane %v9413_v33, %v9333_v6  ;;  %v563_v44 = vrot.slane %v9350_v10, %v9353_v11  ;;  %v9570_v34 = vld [vmem:[%s11384_s3] sm:$0xff]  ;;  %p524_p11 = scmp.lt.s32.totalorder %s11146_s21, 31  ;;  %s11346_s27 = scalar_lea.hbm %s11395_s15, %s11146_s21 }
  0x27   : > { %8621 = vmatmul.mubr.msk.f32.vlgmr.msra.gmra.mxu0 %vm889_vm1, %v9422_v36  ;;  %8641 = vmatmul.mubr.msk.f32.vlgmr.msra.gmra.mxu1 %vm889_vm1, %v9422_v36  ;;  %v884_v46 = vmul.f32 %v9434_v40, %v9368_v16  ;;  %v745_v47 = vrot.slane %v9413_v33, %v9330_v5  ;;  %v559_v48 = vrot.slane %v9350_v10, %v9344_v8 }
  0x28   : > { %1015 = vmatprep.mubr.f32.mxu0 %v11397_v3  ;;  %1400 = vmatprep.mubr.f32.mxu1 %v11397_v3  ;;  %v9469_v50 = vrot.slane %v749_v43, %v9330_v5  ;;  %v9472_v51 = vrot.slane %v563_v44, %v9344_v8  ;;  %v9476_v52 = vcombine.high %v9449_v45, %v9449_v45  ;;  %v9182_v43 = vmov 0  }
  0x29   : > { %8623 = vmatprep.subr.msk.mxu0 %vm896_vm0, %v873_v37  ;;  %8647 = vmatprep.subr.msk.mxu1 %vm896_vm0, %v885_v39  ;;  %v9481_v53 = vrot.slane %v745_v47, %v9330_v5  ;;  %v9484_v54 = vrot.slane %v559_v48, %v9344_v8  ;;  %v757_v55 = vrot.slane %v9449_v45, %v9333_v6 }
  0x2a   : > { %11466 = vst [vmem:[#allocation10_spill] sm:$0xff] %v9469_v50  ;;  %8624 = vmatpush1.msk.msra.mxu0 %vm896_vm0, %v872_v42  ;;  %8648 = vmatpush1.msk.msra.mxu1 %vm896_vm0, %v884_v46  ;;  %v875_v56 = vmul.f32 %v9469_v50, %v9438_v41  ;;  %v711_v57 = vmul.f32 %v9376_v19, %v9472_v51 }
  0x2b   : > { %11467 = vst [vmem:[#allocation11_spill] sm:$0xff] %v9481_v53  ;;  %v579_v58 = vrot.slane %v9449_v45, %v9353_v11  ;;  %8622 = vmatmul.mubr.msk.f32.gmra.mxu0 %vm889_vm1, %v9466_v49  ;;  %8642 = vmatmul.mubr.msk.f32.gmra.mxu1 %vm889_vm1, %v9466_v49  ;;  %v9501_v59 = vrot.slane %v757_v55, %v9330_v5  ;;  %v9597_v55 = vld [vmem:[%s11384_s3 + $0x8] sm:$0xff] }
  0x2c   : > { %1086 = vmatprep.mubr.f32.mxu0 %v11397_v3  ;;  %1548 = vmatprep.mubr.f32.mxu1 %v11397_v3  ;;  %v874_v61 = vmul.f32 %v9481_v53, %v9413_v33  ;;  %v710_v63 = vmul.f32 %v9484_v54, %v9350_v10  ;;  %v753_v0 = vrot.slane %v9449_v45, %v9330_v5 }
  0x2d   : > { %v9511_v62 = vrot.slane %v579_v58, %v9344_v8  ;;  %8627 = vmatprep.subr.msk.mxu0 %vm896_vm0, %v875_v56  ;;  %8655 = vmatprep.subr.msk.mxu1 %vm896_vm0, %v711_v57  ;;  %v575_v1 = vrot.slane %v9449_v45, %v9344_v8  ;;  %v877_v2 = vmul.f32 %v9501_v59, %v9476_v52 }
  0x2e   : > { %v765_v15 = vrot.slane %v9504_v60, %v9333_v6  ;;  %v595_v17 = vrot.slane %v9347_v9, %v9353_v11  ;;  %v9538_v18 = vrot.slane %v753_v0, %v9330_v5  ;;  %v9547_v24 = vcombine.high %v9504_v60, %v9504_v60  ;;  %9104 = vset.pattern.permute.xlu0 %v9182_v43  ;;  %v6667_v0 = vld [vmem:[%s11387_s6 + $0x8] sm:$0xff] }
  0x2f   : > { %11468 = vst [vmem:[#allocation12_spill] sm:$0xff] %v9511_v62  ;;  %v715_v13 = vmul.f32 %v9476_v52, %v9511_v62  ;;  %8625 = vmatmul.mubr.msk.f32.vlgmr.msra.gmra.mxu0 %vm889_vm1, %v9422_v36  ;;  %8649 = vmatmul.mubr.msk.f32.vlgmr.msra.gmra.mxu1 %vm889_vm1, %v9422_v36  ;;  %v9541_v20 = vrot.slane %v575_v1, %v9344_v8 }
  0x30   : > { %1092 = vmatprep.mubr.f32.mxu0 %v11397_v3  ;;  %1554 = vmatprep.mubr.f32.mxu1 %v11397_v3  ;;  %v9550_v28 = vrot.slane %v765_v15, %v9330_v5  ;;  %v9553_v29 = vrot.slane %v595_v17, %v9344_v8  ;;  %v761_v35 = vrot.slane %v9504_v60, %v9330_v5 }
  0x31   : > { %8628 = vmatpush1.msk.msra.mxu0 %vm896_vm0, %v874_v61  ;;  %8656 = vmatpush1.msk.msra.mxu1 %vm896_vm0, %v710_v63  ;;  %11469 = vst [vmem:[#allocation13_spill] sm:$0xff] %v9541_v20  ;;  %v876_v37 = vmul.f32 %v9538_v18, %v9449_v45  ;;  %v714_v39 = vmul.f32 %v9541_v20, %v9449_v45  ;;  %v9620_v63 = vsub.s32 6, %v9326_v4 }
  0x32   : > { %8631 = vmatprep.subr.msk.mxu0 %vm896_vm0, %v877_v2  ;;  %8663 = vmatprep.subr.msk.mxu1 %vm896_vm0, %v715_v13  ;;  %11470 = vst [vmem:[#allocation14_spill] sm:$0xff] %v9550_v28  ;;  %11471 = vst [vmem:[#allocation15_spill] sm:$0xff] %v9553_v29  ;;  %v591_v42 = vrot.slane %v9347_v9, %v9344_v8  ;;  %v879_v44 = vmul.f32 %v9550_v28, %v9547_v24 }
  0x33   : > { %8626 = vmatmul.mubr.msk.f32.gmra.mxu0 %vm889_vm1, %v9466_v49  ;;  %8650 = vmatmul.mubr.msk.f32.gmra.mxu1 %vm889_vm1, %v9466_v49  ;;  %v719_v46 = vmul.f32 %v9363_v14, %v9553_v29  ;;  %v781_v47 = vrot.slane %v9560_v30, %v9333_v6  ;;  %v611_v48 = vrot.slane %v9368_v16, %v9353_v11 }
  0x34   : > { %1163 = vmatprep.mubr.f32.mxu0 %v11397_v3  ;;  %1756 = vmatprep.mubr.f32.mxu1 %v11397_v3  ;;  %v9600_v6 = vrot.slane %v761_v35, %v9330_v5  ;;  %v9605_v56 = vrot.slane %v591_v42, %v9344_v8  ;;  %v9611_v57 = vcombine.high %v9560_v30, %v9560_v30  ;;  %v9657_v42 = vsub.s32 7, %v9326_v4 }
  0x35   : > { %3970 = vperm.xlu0 %9104, %v3962_v32   ;;  %v9614_v58 = vrot.slane %v781_v47, %v9330_v5  ;;  %v9617_v61 = vrot.slane %v611_v48, %v9344_v8  ;;  %v777_v13 = vrot.slane %v9560_v30, %v9330_v5  ;;  %v607_v15 = vrot.slane %v9368_v16, %v9344_v8 }
  0x36   : > { %11472 = vst [vmem:[#allocation16_spill] sm:$0xff] %v9600_v6  ;;  %11473 = vst [vmem:[#allocation17_spill] sm:$0xff] %v9605_v56  ;;  %v878_v1 = vmul.f32 %v9600_v6, %v9504_v60  ;;  %v718_v2 = vmul.f32 %v9605_v56, %v9347_v9  ;;  %v555_v17 = vrot.slane %v9341_v7, %v9353_v11  ;;  %v9642_v32 = vsub.s32 2, %v9326_v4 }
  0x37   : > { %8629 = vmatmul.mubr.msk.f32.vlgmr.msra.gmra.mxu0 %vm889_vm1, %v9422_v36  ;;  %8657 = vmatmul.mubr.msk.f32.vlgmr.msra.gmra.mxu1 %vm889_vm1, %v9570_v34  ;;  %11474 = vst [vmem:[#allocation18_spill] sm:$0xff] %v9614_v58  ;;  %11475 = vst [vmem:[#allocation19_spill] sm:$0xff] %v9617_v61  ;;  %v883_v35 = vmul.f32 %v9614_v58, %v9611_v57  ;;  %v9671_v47 = vsub.s32 3, %v9326_v4  ;;  %v551_v4 = vrot.slane %v9341_v7, %v9344_v8 }
  0x38   : > { %1169 = vmatprep.mubr.f32.mxu0 %v11397_v3  ;;  %1762 = vmatprep.mubr.f32.mxu1 %v11397_v3  ;;  %v3143_v6 = vrot.slane %v9347_v9, %v9657_v42  ;;  %v3135_v20 = vrot.slane %v9504_v60, %v9657_v42  ;;  %v3151_v62 = vrot.slane %v9560_v30, %v9657_v42 }
  0x39   : > { %8632 = vmatpush1.msk.msra.mxu0 %vm896_vm0, %v876_v37  ;;  %8664 = vmatpush1.msk.msra.mxu1 %vm896_vm0, %v714_v39  ;;  %v723_v37 = vmul.f32 %v9388_v23, %v9617_v61  ;;  %v2246_v39 = vrot.slane %v9350_v10, %v9620_v63  ;;  %v3139_v61 = vrot.slane %v9347_v9, %v9671_v47 }
  0x3a   : > { %8635 = vmatprep.subr.msk.mxu0 %vm896_vm0, %v879_v44  ;;  %8671 = vmatprep.subr.msk.mxu1 %vm896_vm0, %v719_v46  ;;  %v9662_v44 = vrot.slane %v777_v13, %v9330_v5  ;;  %v9668_v46 = vrot.slane %v555_v17, %v9344_v8  ;;  %v3961_v5 = vld [vmem:[%s11385_s4] sm:$0xff]  ;;  %v571_v17 = vrot.slane %v9413_v33, %v9353_v11 }
  0x3b   : > { %8630 = vmatmul.mubr.msk.f32.gmra.mxu0 %vm889_vm1, %v9466_v49  ;;  %8658 = vmatmul.mubr.msk.f32.gmra.mxu1 %vm889_vm1, %v9597_v55  ;;  %v9676_v48 = vrot.slane %v2246_v39, %v9642_v32  ;;  %v3115_v29 = vrot.slane %v9413_v33, %v9671_v47  ;;  %v9880_v25 = vrot.slane %v3135_v20, %v9671_v47 }
  0x3c   : > { %1240 = vmatprep.mubr.f32.mxu0 %v11397_v3  ;;  %1910 = vmatprep.mubr.f32.mxu1 %v11397_v3  ;;  %11476 = vst [vmem:[#allocation20_spill] sm:$0xff] %v9662_v44  ;;  %11478 = vst [vmem:[#allocation22_spill] sm:$0xff] %v9668_v46 }
  0x3d   : > { %6675 = vperm.xlu0 %9104, %v6667_v0   ;;  %9105 = vset.pattern.permute.xlu1 %v9182_v43  ;;  %v9665_v43 = vrot.slane %v607_v15, %v9344_v8  ;;  %11479 = vst [vmem:[#allocation23_spill] sm:$0xff] %v9676_v48  ;;  %v2242_v0 = vrot.slane %v9350_v10, %v9642_v32  ;;  %11503 = vst [vmem:[#allocation46_spill] sm:$0xff] %v9880_v25 }
  0x3e   : > { %v709_v15 = vmul.f32 %v9357_v12, %v9668_v46  ;;  %v11482_v46 = vmov 0.0  }
  0x3f   : > { %8633 = vmatmul.mubr.msk.f32.vlgmr.msra.gmra.mxu0 %vm889_vm1, %v9422_v36  ;;  %8665 = vmatmul.mubr.msk.f32.vlgmr.msra.gmra.mxu1 %vm889_vm1, %v9570_v34  ;;  %11477 = vst [vmem:[#allocation21_spill] sm:$0xff] %v9665_v43  ;;  %v722_v13 = vmul.f32 %v9665_v43, %v9368_v16 }
  0x40   : > { %1246 = vmatprep.mubr.f32.mxu0 %v11397_v3  ;;  %1916 = vmatprep.mubr.f32.mxu1 %v11397_v3 }
  0x41   : > { %8636 = vmatpush1.msk.msra.mxu0 %vm896_vm0, %v878_v1  ;;  %8672 = vmatpush1.msk.msra.mxu1 %vm896_vm0, %v718_v2  ;;  %v3111_v1 = vrot.slane %v9350_v10, %v9657_v42  ;;  %v882_v2 = vmul.f32 %v9662_v44, %v9560_v30  ;;  %v9720_v44 = vrot.slane %v2242_v0, %v9642_v32 }
  0x42   : > { %8643 = vmatprep.subr.msk.mxu0 %vm896_vm0, %v883_v35  ;;  %8679 = vmatprep.subr.msk.mxu1 %vm896_vm0, %v723_v37  ;;  %v2378_v35 = vmul.f32 %v9676_v48, %v9376_v19  ;;  %v2262_v37 = vrot.slane %v9449_v45, %v9620_v63  ;;  %v2258_v48 = vrot.slane %v9449_v45, %v9642_v32 }
  0x43   : > { %8634 = vmatmul.mubr.msk.f32.gmra.mxu0 %vm889_vm1, %v9466_v49  ;;  %8666 = vmatmul.mubr.msk.f32.gmra.mxu1 %vm889_vm1, %v9597_v55  ;;  %v9706_v39 = vrot.slane %v3111_v1, %v9671_v47  ;;  %11483 = vst [vmem:[#allocation26_spill] sm:$0xff] %v9720_v44  ;;  %v567_v1 = vrot.slane %v9413_v33, %v9344_v8 }
  0x44   : > { %1317 = vmatprep.mubr.f32.mxu0 %v11397_v3  ;;  %2064 = vmatprep.mubr.f32.mxu1 %v11397_v3  ;;  %v3107_v3 = vrot.slane %v9350_v10, %v9671_v47  ;;  %v3127_v0 = vrot.slane %v9449_v45, %v9657_v42  ;;  %v2377_v28 = vmul.f32 %v9720_v44, %v9350_v10 }
  0x45   : > { %3965 = vperm.xlu0 %9104, %v3961_v5   ;;  %11480 = vst [vmem:[#allocation24_spill] sm:$0xff] %v9706_v39  ;;  %v9715_v5 = vrot.slane %v551_v4, %v9344_v8  ;;  %v9730_v4 = vrot.slane %v571_v17, %v9344_v8  ;;  %v8379_v17 = vld [vmem:[#allocation3] sm:$0x1]  ;;  %v9781_v44 = vrot.slane %v3143_v6, %v9671_v47 }
  0x46   : > { %v9725_v58 = vrot.slane %v3107_v3, %v9671_v47  ;;  %v9739_v3 = vrot.slane %v2262_v37, %v9642_v32  ;;  %v2278_v37 = vrot.slane %v9347_v9, %v9620_v63  ;;  %v2274_v6 = vrot.slane %v9347_v9, %v9642_v32 }
  0x47   : > { %8637 = vmatmul.mubr.msk.f32.vlgmr.msra.gmra.mxu0 %vm889_vm1, %v9422_v36  ;;  %8673 = vmatmul.mubr.msk.f32.vlgmr.msra.gmra.mxu1 %vm889_vm1, %v9570_v34  ;;  %11481 = vst [vmem:[#allocation25_spill] sm:$0xff] %v9715_v5  ;;  %11485 = vst [vmem:[#allocation28_spill] sm:$0xff] %v9730_v4 }
  0x48   : > { %1323 = vmatprep.mubr.f32.mxu0 %v11482_v46  ;;  %2070 = vmatprep.mubr.f32.mxu1 %v11482_v46  ;;  %11484 = vst [vmem:[#allocation27_spill] sm:$0xff] %v9725_v58  ;;  %11486 = vst [vmem:[#allocation29_spill] sm:$0xff] %v9739_v3  ;;  %v2382_v56 = vmul.f32 %v9739_v3, %v9476_v52 }
  0x49   : > { %8644 = vmatpush1.msk.msra.mxu0 %vm896_vm0, %v882_v2  ;;  %8680 = vmatpush1.msk.msra.mxu1 %vm896_vm0, %v722_v13  ;;  %v587_v2 = vrot.slane %v9504_v60, %v9353_v11  ;;  %v3123_v13 = vrot.slane %v9449_v45, %v9671_v47  ;;  %11492 = vst [vmem:[#allocation35_spill] sm:$0xff] %v9781_v44 }
  0x4a   : > { %8651 = vmatprep.subr.msk.mxu0 %vm896_vm0, %v709_v15  ;;  %8689 = vmatprep.subr.msk.mxu1 %vm896_vm0, %v2378_v35  ;;  %v708_v15 = vmul.f32 %v9715_v5, %v9341_v7  ;;  %v9752_v35 = vrot.slane %v3127_v0, %v9671_v47  ;;  %v9766_v5 = vrot.slane %v567_v1, %v9344_v8 }
  0x4b   : > { %8638 = vmatmul.mubr.msk.f32.gmra.mxu0 %vm889_vm1, %v9466_v49  ;;  %8674 = vmatmul.mubr.msk.f32.gmra.mxu1 %vm889_vm1, %v9597_v55  ;;  %v9759_v43 = vrot.slane %v3123_v13, %v9671_v47  ;;  %v9769_v0 = vrot.slane %v2258_v48, %v9642_v32  ;;  %v713_v13 = vmul.f32 %v9438_v41, %v9730_v4 }
  0x4c   : > { %11487 = vst [vmem:[#allocation30_spill] sm:$0xff] %v9752_v35  ;;  %1471 = vmatprep.mubr.f32.mxu0 %v11482_v46  ;;  %2218 = vmatprep.mubr.f32.mxu1 %v11482_v46  ;;  %11489 = vst [vmem:[#allocation32_spill] sm:$0xff] %v9766_v5  ;;  %v9778_v53 = vrot.slane %v587_v2, %v9344_v8  ;;  %v583_v48 = vrot.slane %v9504_v60, %v9344_v8 }
  0x4d   : > { %11488 = vst [vmem:[#allocation31_spill] sm:$0xff] %v9759_v43  ;;  %11490 = vst [vmem:[#allocation33_spill] sm:$0xff] %v9769_v0  ;;  %8382 = vperm.xlu0 %9104, %v8379_v17   ;;  %v9790_v1 = vrot.slane %v3139_v61, %v9671_v47  ;;  %v9795_v2 = vrot.slane %v2278_v37, %v9642_v32  ;;  %v712_v61 = vmul.f32 %v9766_v5, %v9413_v33 }
  0x4e   : > { %11491 = vst [vmem:[#allocation34_spill] sm:$0xff] %v9778_v53  ;;  %v2381_v17 = vmul.f32 %v9769_v0, %v9449_v45  ;;  %v2282_v37 = vrot.slane %v9560_v30, %v9642_v32  ;;  %v717_v3 = vmul.f32 %v9547_v24, %v9778_v53  ;;  %v3119_v53 = vrot.slane %v9413_v33, %v9657_v42 }
  0x4f   : > { %8645 = vmatmul.mubr.msk.f32.vlgmr.msra.gmra.mxu0 %vm889_vm1, %v9422_v36  ;;  %8681 = vmatmul.mubr.msk.f32.vlgmr.msra.gmra.mxu1 %vm889_vm1, %v9570_v34  ;;  %11493 = vst [vmem:[#allocation36_spill] sm:$0xff] %v9790_v1  ;;  %11494 = vst [vmem:[#allocation37_spill] sm:$0xff] %v9795_v2  ;;  %v3159_v36 = vrot.slane %v9368_v16, %v9657_v42  ;;  %v603_v5 = vrot.slane %v9560_v30, %v9353_v11 }
  0x50   : > { %1477 = vmatprep.mubr.f32.mxu0 %v11482_v46  ;;  %2224 = vmatprep.mubr.f32.mxu1 %v11482_v46  ;;  %v9823_v0 = vrot.slane %v2282_v37, %v9642_v32  ;;  %v3131_v11 = vrot.slane %v9504_v60, %v9671_v47 }
  0x51   : > { %8652 = vmatpush1.msk.msra.mxu0 %vm896_vm0, %v708_v15  ;;  %8690 = vmatpush1.msk.msra.mxu1 %vm896_vm0, %v2377_v28  ;;  %v9814_v15 = vrot.slane %v3159_v36, %v9671_v47  ;;  %v3155_v28 = vrot.slane %v9368_v16, %v9671_v47  ;;  %v2386_v36 = vmul.f32 %v9795_v2, %v9363_v14 }
  0x52   : > { %8659 = vmatprep.subr.msk.mxu0 %vm896_vm0, %v713_v13  ;;  %8697 = vmatprep.subr.msk.mxu1 %vm896_vm0, %v2382_v56  ;;  %11496 = vst [vmem:[#allocation39_spill] sm:$0xff] %v9823_v0  ;;  %v3103_v56 = vrot.slane %v9341_v7, %v9657_v42  ;;  %v3099_v13 = vrot.slane %v9341_v7, %v9671_v47 }
  0x53   : > { %11495 = vst [vmem:[#allocation38_spill] sm:$0xff] %v9814_v15  ;;  %8646 = vmatmul.mubr.msk.f32.gmra.mxu0 %vm889_vm1, %v9466_v49  ;;  %8682 = vmatmul.mubr.msk.f32.gmra.mxu1 %vm889_vm1, %v9597_v55  ;;  %v9834_v49 = vld [vmem:[%s11384_s3 + $0x20] sm:$0xff]  ;;  %v9839_v37 = vrot.slane %v3155_v28, %v9671_v47  ;;  %v2294_v2 = vrot.slane %v9368_v16, %v9620_v63 }
  0x54   : > { %1679 = vmatprep.mubr.f32.mxu0 %v11482_v46  ;;  %2589 = vmatprep.mubr.f32.mxu1 %v11482_v46  ;;  %v9846_v4 = vrot.slane %v3103_v56, %v9671_v47  ;;  %v9849_v50 = vrot.slane %v3099_v13, %v9671_v47  ;;  %v9856_v28 = vrot.slane %v3119_v53, %v9671_v47  ;;  %v9874_v53 = vld [vmem:[%s11384_s3 + $0x28] sm:$0xff] }
  0x55   : > { %11497 = vst [vmem:[#allocation40_spill] sm:$0xff] %v9839_v37  ;;  %v9867_v56 = vrot.slane %v3115_v29, %v9671_v47  ;;  %v9877_v13 = vrot.slane %v583_v48, %v9344_v8  ;;  %v9883_v21 = vrot.slane %v3131_v11, %v9671_v47  ;;  %v9888_v29 = vrot.slane %v2274_v6, %v9642_v32 }
  0x56   : > { %11498 = vst [vmem:[#allocation41_spill] sm:$0xff] %v9846_v4  ;;  %11499 = vst [vmem:[#allocation42_spill] sm:$0xff] %v9849_v50  ;;  %v3147_v48 = vrot.slane %v9560_v30, %v9671_v47  ;;  %v9897_v20 = vrot.slane %v603_v5, %v9344_v8  ;;  %v9907_v42 = vrot.slane %v3151_v62, %v9671_v47 }
  0x57   : > { %11500 = vst [vmem:[#allocation43_spill] sm:$0xff] %v9856_v28  ;;  %8653 = vmatmul.mubr.msk.f32.vlgmr.msra.gmra.mxu0 %vm889_vm1, %v9570_v34  ;;  %8691 = vmatmul.mubr.msk.f32.vlgmr.msra.gmra.mxu1 %vm889_vm1, %v9834_v49  ;;  %11501 = vst [vmem:[#allocation44_spill] sm:$0xff] %v9867_v56  ;;  %v716_v5 = vmul.f32 %v9877_v13, %v9504_v60  ;;  %v2290_v62 = vrot.slane %v9368_v16, %v9642_v32 }
  0x58   : > { %1685 = vmatprep.mubr.f32.mxu0 %v11482_v46  ;;  %2595 = vmatprep.mubr.f32.mxu1 %v11482_v46  ;;  %11502 = vst [vmem:[#allocation45_spill] sm:$0xff] %v9877_v13  ;;  %11504 = vst [vmem:[#allocation47_spill] sm:$0xff] %v9883_v21  ;;  %v9910_v6 = vrot.slane %v3147_v48, %v9671_v47  ;;  %v721_v47 = vmul.f32 %v9611_v57, %v9897_v20 }
  0x59   : > { %8660 = vmatpush1.msk.msra.mxu0 %vm896_vm0, %v712_v61  ;;  %8698 = vmatpush1.msk.msra.mxu1 %vm896_vm0, %v2381_v17  ;;  %11505 = vst [vmem:[#allocation48_spill] sm:$0xff] %v9888_v29  ;;  %11506 = vst [vmem:[#allocation49_spill] sm:$0xff] %v9897_v20  ;;  %v9900_v61 = vrot.slane %v2294_v2, %v9642_v32  ;;  %v599_v2 = vrot.slane %v9560_v30, %v9344_v8 }
  0x5a   : > { %8667 = vmatprep.subr.msk.mxu0 %vm896_vm0, %v717_v3  ;;  %8705 = vmatprep.subr.msk.mxu1 %vm896_vm0, %v2386_v36  ;;  %11508 = vst [vmem:[#allocation51_spill] sm:$0xff] %v9907_v42  ;;  %11509 = vst [vmem:[#allocation52_spill] sm:$0xff] %v9910_v6  ;;  %v2385_v3 = vmul.f32 %v9888_v29, %v9347_v9  ;;  %v2238_v36 = vrot.slane %v9341_v7, %v9620_v63 }
  0x5b   : > { %11507 = vst [vmem:[#allocation50_spill] sm:$0xff] %v9900_v61  ;;  %8654 = vmatmul.mubr.msk.f32.gmra.mxu0 %vm889_vm1, %v9597_v55  ;;  %8692 = vmatmul.mubr.msk.f32.gmra.mxu1 %vm889_vm1, %v9874_v53  ;;  %v2390_v17 = vmul.f32 %v9900_v61, %v9388_v23  ;;  %v9937_v11 = vrot.slane %v599_v2, %v9344_v8 }
  0x5c   : > { %1833 = vmatprep.mubr.f32.mxu0 %v11482_v46  ;;  %2743 = vmatprep.mubr.f32.mxu1 %v11482_v46  ;;  %v9940_v48 = vrot.slane %v2290_v62, %v9642_v32  ;;  %v9945_v61 = vrot.slane %v2238_v36, %v9642_v32  ;;  %v2234_v2 = vrot.slane %v9341_v7, %v9642_v32 }
  0x5d   : > { %11510 = vst [vmem:[#allocation53_spill] sm:$0xff] %v9937_v11 }
  0x5e   : > { %11511 = vst [vmem:[#allocation54_spill] sm:$0xff] %v9940_v48  ;;  %11512 = vst [vmem:[#allocation55_spill] sm:$0xff] %v9945_v61  ;;  %v2376_v62 = vmul.f32 %v9945_v61, %v9357_v12  ;;  %v9974_v36 = vrot.slane %v2234_v2, %v9642_v32  ;;  %v2250_v2 = vrot.slane %v9413_v33, %v9642_v32 }
  0x5f   : > { %8661 = vmatmul.mubr.msk.f32.vlgmr.msra.gmra.mxu0 %vm889_vm1, %v9570_v34  ;;  %8699 = vmatmul.mubr.msk.f32.vlgmr.msra.gmra.mxu1 %vm889_vm1, %v9834_v49 }
  0x60   : > { %1839 = vmatprep.mubr.f32.mxu0 %v11482_v46  ;;  %2749 = vmatprep.mubr.f32.mxu1 %v11482_v46  ;;  %11513 = vst [vmem:[#allocation56_spill] sm:$0xff] %v9974_v36 }
  0x61   : > { %8668 = vmatpush1.msk.msra.mxu0 %vm896_vm0, %v716_v5  ;;  %8706 = vmatpush1.msk.msra.mxu1 %vm896_vm0, %v2385_v3  ;;  %v720_v5 = vmul.f32 %v9937_v11, %v9560_v30  ;;  %v2389_v3 = vmul.f32 %v9940_v48, %v9368_v16 }
  0x62   : > { %8675 = vmatprep.subr.msk.mxu0 %vm896_vm0, %v721_v47  ;;  %8713 = vmatprep.subr.msk.mxu1 %vm896_vm0, %v2390_v17  ;;  %v3243_v47 = vmul.f32 %v9706_v39, %v9376_v19  ;;  %v2254_v17 = vrot.slane %v9413_v33, %v9620_v63 }
  0x63   : > { %8662 = vmatmul.mubr.msk.f32.gmra.mxu0 %vm889_vm1, %v9597_v55  ;;  %8700 = vmatmul.mubr.msk.f32.gmra.mxu1 %vm889_vm1, %v9874_v53 }
  0x64   : > { %1987 = vmatprep.mubr.f32.mxu0 %v11482_v46  ;;  %2897 = vmatprep.mubr.f32.mxu1 %v11482_v46  ;;  %v9979_v19 = vrot.slane %v2254_v17, %v9642_v32  ;;  %v2270_v17 = vrot.slane %v9504_v60, %v9620_v63 }
  0x66   : > { %11514 = vst [vmem:[#allocation57_spill] sm:$0xff] %v9979_v19 }
  0x67   : > { %8669 = vmatmul.mubr.msk.f32.vlgmr.msra.gmra.mxu0 %vm889_vm1, %v9570_v34  ;;  %8707 = vmatmul.mubr.msk.f32.vlgmr.msra.gmra.mxu1 %vm889_vm1, %v9834_v49 }
  0x68   : > { %1993 = vmatprep.mubr.f32.mxu0 %v11482_v46  ;;  %2903 = vmatprep.mubr.f32.mxu1 %v11482_v46 }
  0x69   : > { %8676 = vmatpush1.msk.msra.mxu0 %vm896_vm0, %v720_v5  ;;  %8714 = vmatpush1.msk.msra.mxu1 %vm896_vm0, %v2389_v3  ;;  %v2375_v5 = vmul.f32 %v9974_v36, %v9341_v7  ;;  %v3242_v3 = vmul.f32 %v9725_v58, %v9350_v10  ;;  %v10008_v10 = vrot.slane %v2250_v2, %v9642_v32 }
  0x6a   : > { %8685 = vmatprep.subr.msk.mxu0 %vm896_vm0, %v2376_v62  ;;  %8723 = vmatprep.subr.msk.mxu1 %vm896_vm0, %v3243_v47  ;;  %v2380_v62 = vmul.f32 %v9979_v19, %v9438_v41  ;;  %v3247_v47 = vmul.f32 %v9752_v35, %v9476_v52  ;;  %v10013_v52 = vrot.slane %v2270_v17, %v9642_v32 }
  0x6b   : > { %8670 = vmatmul.mubr.msk.f32.gmra.mxu0 %vm889_vm1, %v9597_v55  ;;  %8708 = vmatmul.mubr.msk.f32.gmra.mxu1 %vm889_vm1, %v9874_v53  ;;  %11515 = vst [vmem:[#allocation58_spill] sm:$0xff] %v10008_v10 }
  0x6c   : > { %2141 = vmatprep.mubr.f32.mxu0 %v11482_v46  ;;  %3051 = vmatprep.mubr.f32.mxu1 %v11482_v46  ;;  %11516 = vst [vmem:[#allocation59_spill] sm:$0xff] %v10013_v52  ;;  %v2384_v2 = vmul.f32 %v10013_v52, %v9547_v24 }
  0x6f   : > { %8677 = vmatmul.mubr.msk.f32.vlgmr.msra.gmra.mxu0 %vm889_vm1, %v9570_v34  ;;  %8715 = vmatmul.mubr.msk.f32.vlgmr.msra.gmra.mxu1 %vm889_vm1, %v9834_v49  ;;  %v10024_v34 = vld [vmem:[%s11384_s3 + $0x30] sm:$0xff] }
  0x70   : > { %2147 = vmatprep.mubr.f32.mxu0 %v11482_v46  ;;  %3057 = vmatprep.mubr.f32.mxu1 %v11482_v46 }
  0x71   : > { %8686 = vmatpush1.msk.msra.mxu0 %vm896_vm0, %v2375_v5  ;;  %8724 = vmatpush1.msk.msra.mxu1 %vm896_vm0, %v3242_v3  ;;  %v2379_v5 = vmul.f32 %v10008_v10, %v9413_v33  ;;  %v3246_v3 = vmul.f32 %v9759_v43, %v9449_v45  ;;  %v10047_v45 = vld [vmem:[%s11384_s3 + $0x38] sm:$0xff] }
  0x72   : > { %8693 = vmatprep.subr.msk.mxu0 %vm896_vm0, %v2380_v62  ;;  %8731 = vmatprep.subr.msk.mxu1 %vm896_vm0, %v3247_v47  ;;  %v3251_v62 = vmul.f32 %v9781_v44, %v9363_v14  ;;  %v2286_v47 = vrot.slane %v9560_v30, %v9620_v63 }
  0x73   : > { %8678 = vmatmul.mubr.msk.f32.gmra.mxu0 %vm889_vm1, %v9597_v55  ;;  %8716 = vmatmul.mubr.msk.f32.gmra.mxu1 %vm889_vm1, %v9874_v53  ;;  %v2266_v55 = vrot.slane %v9504_v60, %v9642_v32 }
  0x74   : > { %2512 = vmatprep.mubr.f32.mxu0 %v11482_v46  ;;  %3454 = vmatprep.mubr.f32.mxu1 %v11482_v46  ;;  %v10057_v63 = vrot.slane %v2286_v47, %v9642_v32 }
  0x75   : > { %v10052_v14 = vrot.slane %v2266_v55, %v9642_v32  ;;  %v3241_v55 = vmul.f32 %v9846_v4, %v9357_v12  ;;  %v3240_v12 = vmul.f32 %v9849_v50, %v9341_v7  ;;  %v3244_v7 = vmul.f32 %v9867_v56, %v9413_v33 }
  0x76   : > { %11518 = vst [vmem:[#allocation61_spill] sm:$0xff] %v10057_v63  ;;  %v2388_v32 = vmul.f32 %v10057_v63, %v9611_v57  ;;  %v3248_v33 = vmul.f32 %v9883_v21, %v9504_v60 }
  0x77   : > { %8687 = vmatmul.mubr.msk.f32.vlgmr.msra.gmra.mxu0 %vm889_vm1, %v9834_v49  ;;  %8725 = vmatmul.mubr.msk.f32.vlgmr.msra.gmra.mxu1 %vm889_vm1, %v10024_v34  ;;  %11517 = vst [vmem:[#allocation60_spill] sm:$0xff] %v10052_v14  ;;  %v2383_v17 = vmul.f32 %v10052_v14, %v9504_v60  ;;  %v3252_v60 = vmul.f32 %v9910_v6, %v9560_v30 }
  0x78   : > { %2518 = vmatprep.mubr.f32.mxu0 %v11482_v46  ;;  %3460 = vmatprep.mubr.f32.mxu1 %v11482_v46 }
  0x79   : > { %8694 = vmatpush1.msk.msra.mxu0 %vm896_vm0, %v2379_v5  ;;  %8732 = vmatpush1.msk.msra.mxu1 %vm896_vm0, %v3246_v3  ;;  %v3250_v5 = vmul.f32 %v9790_v1, %v9347_v9  ;;  %v3255_v3 = vmul.f32 %v9814_v15, %v9388_v23  ;;  %v2387_v9 = vmul.f32 %v9823_v0, %v9560_v30 }
  0x7a   : > { %8701 = vmatprep.subr.msk.mxu0 %vm896_vm0, %v2384_v2  ;;  %8739 = vmatprep.subr.msk.mxu1 %vm896_vm0, %v3251_v62  ;;  %v3254_v23 = vmul.f32 %v9839_v37, %v9368_v16  ;;  %v3245_v16 = vmul.f32 %v9856_v28, %v9438_v41  ;;  %v3249_v41 = vmul.f32 %v9880_v25, %v9547_v24 }
  0x7b   : > { %8688 = vmatmul.mubr.msk.f32.gmra.mxu0 %vm889_vm1, %v9874_v53  ;;  %8726 = vmatmul.mubr.msk.f32.gmra.mxu1 %vm889_vm1, %v10047_v45  ;;  %v3253_v24 = vmul.f32 %v9907_v42, %v9611_v57 }
  0x7c   : > { %2666 = vmatprep.mubr.f32.mxu0 %v11482_v46  ;;  %3608 = vmatprep.mubr.f32.mxu1 %v11482_v46 }
  0x7f   : > { %8695 = vmatmul.mubr.msk.f32.vlgmr.msra.gmra.mxu0 %vm889_vm1, %v9834_v49  ;;  %8733 = vmatmul.mubr.msk.f32.vlgmr.msra.gmra.mxu1 %vm889_vm1, %v10024_v34 }
  0x80   : > { %2672 = vmatprep.mubr.f32.mxu0 %v11482_v46  ;;  %3614 = vmatprep.mubr.f32.mxu1 %v11482_v46 }
  0x81   : > { %8702 = vmatpush1.msk.msra.mxu0 %vm896_vm0, %v2383_v17  ;;  %8740 = vmatpush1.msk.msra.mxu1 %vm896_vm0, %v3250_v5 }
  0x82   : > { %8709 = vmatprep.subr.msk.mxu0 %vm896_vm0, %v2388_v32  ;;  %8747 = vmatprep.subr.msk.mxu1 %vm896_vm0, %v3255_v3 }
  0x83   : > { %8696 = vmatmul.mubr.msk.f32.gmra.mxu0 %vm889_vm1, %v9874_v53  ;;  %8734 = vmatmul.mubr.msk.f32.gmra.mxu1 %vm889_vm1, %v10047_v45 }
  0x84   : > { %2820 = vmatprep.mubr.f32.mxu0 %v11482_v46  ;;  %3762 = vmatprep.mubr.f32.mxu1 %v11482_v46 }
  0x87   : > { %8703 = vmatmul.mubr.msk.f32.vlgmr.msra.gmra.mxu0 %vm889_vm1, %v9834_v49  ;;  %8741 = vmatmul.mubr.msk.f32.vlgmr.msra.gmra.mxu1 %vm889_vm1, %v10024_v34 }
  0x88   : > { %2826 = vmatprep.mubr.f32.mxu0 %v11482_v46  ;;  %3768 = vmatprep.mubr.f32.mxu1 %v11482_v46 }
  0x89   : > { %8710 = vmatpush1.msk.msra.mxu0 %vm896_vm0, %v2387_v9  ;;  %8748 = vmatpush1.msk.msra.mxu1 %vm896_vm0, %v3254_v23 }
  0x8a   : > { %8719 = vmatprep.subr.msk.mxu0 %vm896_vm0, %v3241_v55 }
  0x8b   : > { %8704 = vmatmul.mubr.msk.f32.gmra.mxu0 %vm889_vm1, %v9874_v53  ;;  %8742 = vmatmul.mubr.msk.f32.gmra.mxu1 %vm889_vm1, %v10047_v45 }
  0x8c   : > { %2974 = vmatprep.mubr.f32.mxu0 %v11482_v46  ;;  %3916 = vmatprep.mubr.f32.mxu1 %v11482_v46 }
  0x8f   : > { %8711 = vmatmul.mubr.msk.f32.vlgmr.msra.gmra.mxu0 %vm889_vm1, %v9834_v49  ;;  %8749 = vmatmul.mubr.msk.f32.vlgmr.msra.gmra.mxu1 %vm889_vm1, %v10024_v34 }
  0x90   : > { %2980 = vmatprep.mubr.f32.mxu0 %v11482_v46  ;;  %3922 = vmatprep.mubr.f32.mxu1 %v11482_v46 }
  0x91   : > { %8720 = vmatpush1.msk.msra.mxu0 %vm896_vm0, %v3240_v12 }
  0x92   : > { %8727 = vmatprep.subr.msk.mxu0 %vm896_vm0, %v3245_v16 }
  0x93   : > { %8712 = vmatmul.mubr.msk.f32.gmra.mxu0 %vm889_vm1, %v9874_v53  ;;  %8750 = vmatmul.mubr.msk.f32.gmra.mxu1 %vm889_vm1, %v10047_v45 }
  0x94   : > { %3377 = vmatprep.mubr.f32.mxu0 %v11482_v46  ;;  %4223 = vmatprep.mubr.f32.mxu1 %v11482_v46 }
  0x97   : > { %8721 = vmatmul.mubr.msk.f32.vlgmr.msra.gmra.mxu0 %vm889_vm1, %v10024_v34 }
  0x98   : > { %3383 = vmatprep.mubr.f32.mxu0 %v11482_v46  ;;  %8728 = vmatpush1.msk.msra.mxu0 %vm896_vm0, %v3244_v7 }
  0x99   : > { %8735 = vmatprep.subr.msk.mxu0 %vm896_vm0, %v3249_v41 }
  0x9b   : > { %8722 = vmatmul.mubr.msk.f32.gmra.mxu0 %vm889_vm1, %v10047_v45 }
  0x9c   : > { %3531 = vmatprep.mubr.f32.mxu0 %v11482_v46 }
  0x9f   : > { %8729 = vmatmul.mubr.msk.f32.vlgmr.msra.gmra.mxu0 %vm889_vm1, %v10024_v34 }
  0xa0   : > { %3537 = vmatprep.mubr.f32.mxu0 %v11482_v46  ;;  %8736 = vmatpush1.msk.msra.mxu0 %vm896_vm0, %v3248_v33 }
  0xa1   : > { %8743 = vmatprep.subr.msk.mxu0 %vm896_vm0, %v3253_v24 }
  0xa3   : > { %8730 = vmatmul.mubr.msk.f32.gmra.mxu0 %vm889_vm1, %v10047_v45 }
  0xa4   : > { %3685 = vmatprep.mubr.f32.mxu0 %v11482_v46 }
  0xa7   : > { %8737 = vmatmul.mubr.msk.f32.vlgmr.msra.gmra.mxu0 %vm889_vm1, %v10024_v34 }
  0xa8   : > { %3691 = vmatprep.mubr.f32.mxu0 %v11482_v46  ;;  %8744 = vmatpush1.msk.msra.mxu0 %vm896_vm0, %v3252_v60 }
  0xab   : > { %8738 = vmatmul.mubr.msk.f32.gmra.mxu0 %vm889_vm1, %v10047_v45 }
  0xac   : > { %3839 = vmatprep.mubr.f32.mxu0 %v11482_v46 }
  0xaf   : > { %8745 = vmatmul.mubr.msk.f32.vlgmr.msra.gmra.mxu0 %vm889_vm1, %v10024_v34 }
  0xb0   : > { %3845 = vmatprep.mubr.f32.mxu0 %v11482_v46 }
  0xb3   : > { %8746 = vmatmul.mubr.msk.f32.gmra.mxu0 %vm889_vm1, %v10047_v45 }
  0xb4   : > { %4146 = vmatprep.mubr.f32.mxu0 %v11482_v46 }
  0xe7   : > { %v1011_v30 = vpop.f32.mrf.mxu0  ;;  %v1396_v57 = vpop.f32.mrf.mxu1 }
  0xe9   : > { %v10167_v49 = vpop.f32.mrf.mxu0  ;;  %v10169_v53 = vpop.f32.mrf.mxu1 }
  0xea   : > { %11519 = vst [vmem:[#allocation62_spill] sm:$0xff] %v10167_v49  ;;  %11520 = vst [vmem:[#allocation63_spill] sm:$0xff] %v10169_v53 }
  0xeb   : > { %v10171_v2 = vpop.f32.mrf.mxu0  ;;  %v1402_v62 = vpop.f32.mrf.mxu1 }
  0xed   : > { %v10173_v47 = vpop.f32.mrf.mxu0  ;;  %v10175_v17 = vpop.f32.mrf.mxu1 }
  0xef   : > { %v1088_v34 = vpop.f32.mrf.mxu0  ;;  %v1550_v5 = vpop.f32.mrf.mxu1 }
  0xf1   : > { %v10177_v32 = vpop.f32.mrf.mxu0  ;;  %v10179_v45 = vpop.f32.mrf.mxu1 }
  0xf2   : > { %11521 = vst [vmem:[#allocation64_spill] sm:$0xff] %v10177_v32  ;;  %11522 = vst [vmem:[#allocation65_spill] sm:$0xff] %v10179_v45 }
  0xf3   : > { %v1094_v3 = vpop.f32.mrf.mxu0  ;;  %v10181_v9 = vpop.f32.mrf.mxu1 }
  0xf5   : > { %v10183_v23 = vpop.f32.mrf.mxu0  ;;  %v10185_v55 = vpop.f32.mrf.mxu1 }
  0xf7   : > { %v1165_v12 = vpop.f32.mrf.mxu0  ;;  %v1758_v16 = vpop.f32.mrf.mxu1 }
  0xf8   : > { %v1759_v7 = vadd.f32 %v1758_v16, %v1088_v34 }
  0xf9   : > { %v10187_v41 = vpop.f32.mrf.mxu0  ;;  %v10189_v33 = vpop.f32.mrf.mxu1 }
  0xfa   : > { %11523 = vst [vmem:[#allocation66_spill] sm:$0xff] %v10187_v41  ;;  %11524 = vst [vmem:[#allocation67_spill] sm:$0xff] %v10189_v33 }
  0xfb   : > { %v10191_v24 = vpop.f32.mrf.mxu0  ;;  %v1764_v60 = vpop.f32.mrf.mxu1 }
  0xfc   : > { %v10193_v49 = vadd.f32 %v1764_v60, %v1094_v3 }
  0xfd   : > { %v10195_v45 = vpop.f32.mrf.mxu0  ;;  %v10197_v53 = vpop.f32.mrf.mxu1 }
  0xff   : > { %v1242_v32 = vpop.f32.mrf.mxu0  ;;  %v1912_v6 = vpop.f32.mrf.mxu1 }
 0x100   : > { %v1913_v42 = vadd.f32 %v1912_v6, %v1242_v32 }
 0x101   : > { %v10199_v21 = vpop.f32.mrf.mxu0  ;;  %v10201_v25 = vpop.f32.mrf.mxu1 }
 0x102   : > { %11525 = vst [vmem:[#allocation68_spill] sm:$0xff] %v10199_v21  ;;  %11526 = vst [vmem:[#allocation69_spill] sm:$0xff] %v10201_v25 }
 0x103   : > { %v1248_v34 = vpop.f32.mrf.mxu0  ;;  %v1918_v16 = vpop.f32.mrf.mxu1 }
 0x104   : > { %v10203_v41 = vadd.f32 %v1918_v16, %v1248_v34 }
 0x105   : > { %v10205_v33 = vpop.f32.mrf.mxu0  ;;  %v10207_v56 = vpop.f32.mrf.mxu1 }
 0x107   : > { %v1319_v3 = vpop.f32.mrf.mxu0  ;;  %v2066_v60 = vpop.f32.mrf.mxu1 }
 0x108   : > { %v2067_v28 = vadd.f32 %v2066_v60, %v1396_v57 }
 0x109   : > { %v10209_v50 = vpop.f32.mrf.mxu0  ;;  %v10211_v4 = vpop.f32.mrf.mxu1 }
 0x10a   : > { %11527 = vst [vmem:[#allocation70_spill] sm:$0xff] %v10209_v50  ;;  %11528 = vst [vmem:[#allocation71_spill] sm:$0xff] %v10211_v4 }
 0x10b   : > { %v10213_v6 = vpop.f32.mrf.mxu0  ;;  %v2072_v32 = vpop.f32.mrf.mxu1 }
 0x10c   : > { %v10215_v21 = vadd.f32 %v2072_v32, %v1402_v62 }
 0x10d   : > { %v10217_v25 = vpop.f32.mrf.mxu0  ;;  %v10219_v34 = vpop.f32.mrf.mxu1 }
 0x10f   : > { %v1473_v16 = vpop.f32.mrf.mxu0  ;;  %v2220_v37 = vpop.f32.mrf.mxu1 }
 0x110   : > { %v2221_v0 = vadd.f32 %v2220_v37, %v1550_v5 }
 0x111   : > { %v10221_v15 = vpop.f32.mrf.mxu0  ;;  %v10223_v63 = vpop.f32.mrf.mxu1 }
 0x112   : > { %11529 = vst [vmem:[#allocation72_spill] sm:$0xff] %v10221_v15  ;;  %11530 = vst [vmem:[#allocation73_spill] sm:$0xff] %v10223_v63 }
 0x113   : > { %v10225_v57 = vpop.f32.mrf.mxu0  ;;  %v10227_v60 = vpop.f32.mrf.mxu1 }
 0x114   : > { %11531 = vst [vmem:[#allocation74_spill] sm:$0xff] %v10225_v57  ;;  %v10292_v57 = vpop.permute.xlu0 %3970 }
 0x115   : > { %v10229_v50 = vpop.f32.mrf.mxu0  ;;  %v10231_v4 = vpop.f32.mrf.mxu1 }
 0x116   : > { %11532 = vst [vmem:[#allocation75_spill] sm:$0xff] %v10229_v50 }
 0x117   : > { %v1681_v62 = vpop.f32.mrf.mxu0  ;;  %v2591_v32 = vpop.f32.mrf.mxu1 }
 0x118   : > { %v1682_v1 = vadd.f32 %v1681_v62, %v1011_v30  ;;  %v3066_v14 = vadd.f32 %v2591_v32, %v1759_v7 }
 0x119   : > { %v10233_v44 = vpop.f32.mrf.mxu0  ;;  %v10235_v52 = vpop.f32.mrf.mxu1 }
 0x11a   : > { %11533 = vst [vmem:[#allocation76_spill] sm:$0xff] %v10233_v44  ;;  %11534 = vst [vmem:[#allocation77_spill] sm:$0xff] %v10235_v52 }
 0x11b   : > { %v10237_v37 = vpop.f32.mrf.mxu0  ;;  %v2597_v5 = vpop.f32.mrf.mxu1 }
 0x11d   : > { %v10239_v15 = vpop.f32.mrf.mxu0  ;;  %v2599_v63 = vpop.f32.mrf.mxu1 }
 0x11f   : > { %v1835_v43 = vpop.f32.mrf.mxu0  ;;  %v2745_v10 = vpop.f32.mrf.mxu1 }
 0x120   : > { %v1836_v35 = vadd.f32 %v1835_v43, %v1165_v12  ;;  %v3070_v19 = vadd.f32 %v2745_v10, %v1913_v42 }
 0x121   : > { %v10241_v58 = vpop.f32.mrf.mxu0  ;;  %v10243_v36 = vpop.f32.mrf.mxu1 }
 0x122   : > { %11535 = vst [vmem:[#allocation78_spill] sm:$0xff] %v10241_v58  ;;  %11536 = vst [vmem:[#allocation79_spill] sm:$0xff] %v10243_v36 }
 0x123   : > { %v10245_v30 = vpop.f32.mrf.mxu0  ;;  %v2751_v7 = vpop.f32.mrf.mxu1 }
 0x125   : > { %v10247_v62 = vpop.f32.mrf.mxu0  ;;  %v2753_v32 = vpop.f32.mrf.mxu1 }
 0x127   : > { %v1989_v44 = vpop.f32.mrf.mxu0  ;;  %v2899_v52 = vpop.f32.mrf.mxu1 }
 0x128   : > { %v10249_v39 = vadd.f32 %v1989_v44, %v1319_v3  ;;  %v10251_v61 = vadd.f32 %v2899_v52, %v2067_v28 }
 0x129   : > { %v10253_v48 = vpop.f32.mrf.mxu0  ;;  %v10255_v43 = vpop.f32.mrf.mxu1 }
 0x12a   : > { %11537 = vst [vmem:[#allocation80_spill] sm:$0xff] %v10253_v48  ;;  %11538 = vst [vmem:[#allocation81_spill] sm:$0xff] %v10255_v43 }
 0x12b   : > { %v10257_v42 = vpop.f32.mrf.mxu0  ;;  %v2905_v10 = vpop.f32.mrf.mxu1 }
 0x12d   : > { %v10259_v12 = vpop.f32.mrf.mxu0  ;;  %v10261_v58 = vpop.f32.mrf.mxu1 }
 0x12e   : > { %11539 = vst [vmem:[#allocation82_spill] sm:$0xff] %v10259_v12 }
 0x12f   : > { %v2143_v36 = vpop.f32.mrf.mxu0  ;;  %v3053_v11 = vpop.f32.mrf.mxu1 }
 0x130   : > { %v10263_v20 = vadd.f32 %v2143_v36, %v1473_v16  ;;  %v10265_v29 = vadd.f32 %v3053_v11, %v2221_v0  ;;  %v1767_v16 = vadd.f32 %v10197_v53, %v10183_v23 }
 0x131   : > { %v10267_v44 = vpop.f32.mrf.mxu0  ;;  %v10269_v28 = vpop.f32.mrf.mxu1 }
 0x132   : > { %11540 = vst [vmem:[#allocation83_spill] sm:$0xff] %v10267_v44  ;;  %11541 = vst [vmem:[#allocation84_spill] sm:$0xff] %v10269_v28  ;;  %v3082_v44 = vadd.f32 %v2597_v5, %v10193_v49  ;;  %v3086_v5 = vadd.f32 %v2751_v7, %v10203_v41 }
 0x133   : > { %v10271_v52 = vpop.f32.mrf.mxu0  ;;  %v10273_v3 = vpop.f32.mrf.mxu1 }
 0x134   : > { %11542 = vst [vmem:[#allocation85_spill] sm:$0xff] %v10271_v52  ;;  %v3083_v52 = vadd.f32 %v2599_v63, %v1767_v16 }
 0x135   : > { %v10275_v48 = vpop.f32.mrf.mxu0  ;;  %v10277_v43 = vpop.f32.mrf.mxu1 }
 0x136   : > { %11543 = vst [vmem:[#allocation86_spill] sm:$0xff] %v10275_v48 }
 0x137   : > { %v2514_v13 = vpop.f32.mrf.mxu0  ;;  %v3456_v8 = vpop.f32.mrf.mxu1 }
 0x138   : > { %v10279_v50 = vadd.f32 %v2514_v13, %v1682_v1  ;;  %v10281_v36 = vadd.f32 %v3456_v8, %v3066_v14 }
 0x139   : > { %v10283_v0 = vpop.f32.mrf.mxu0  ;;  %v10285_v11 = vpop.f32.mrf.mxu1 }
 0x13a   : > { %11544 = vst [vmem:[#allocation87_spill] sm:$0xff] %v10281_v36  ;;  %11545 = vst [vmem:[#allocation88_spill] sm:$0xff] %v10283_v0 }
 0x13b   : > { %11546 = vst [vmem:[#allocation89_spill] sm:$0xff] %v10285_v11  ;;  %v10290_v28 = vpop.f32.mrf.mxu0  ;;  %v3462_v48 = vpop.f32.mrf.mxu1 }
 0x13c   : > { %v3947_v12 = vadd.f32 %v3462_v48, %v3082_v44  ;;  %v1921_v48 = vadd.f32 %v10207_v56, %v10205_v33  ;;  %v2075_v56 = vadd.f32 %v10219_v34, %v10175_v17 }
 0x13d   : > { %v10294_v1 = vpop.f32.mrf.mxu0  ;;  %v3464_v8 = vpop.f32.mrf.mxu1 }
 0x13e   : > { %v3991_v13 = vadd.f32 %v10292_v57, %v3947_v12  ;;  %v3948_v14 = vadd.f32 %v3464_v8, %v3083_v52 }
 0x13f   : > { %v2668_v0 = vpop.f32.mrf.mxu0  ;;  %v3610_v36 = vpop.f32.mrf.mxu1 }
 0x140   : > { %v3992_v11 = vadd.f32 %v10292_v57, %v3948_v14  ;;  %v10298_v53 = vadd.f32 %v2668_v0, %v1836_v35  ;;  %v10300_v49 = vadd.f32 %v3610_v36, %v3070_v19  ;;  %v10309_v44 = vmax.f32 %v3991_v13, 0.0 }
 0x141   : > { %v10302_v23 = vpop.f32.mrf.mxu0  ;;  %v10304_v63 = vpop.f32.mrf.mxu1  ;;  %v3087_v35 = vadd.f32 %v2753_v32, %v1921_v48  ;;  %v10327_v32 = vld [vmem:[%s11386_s5 + $0x10] sm:$0xff] }
 0x142   : > { %11547 = vst [vmem:[#allocation90_spill] sm:$0xff] %v10302_v23  ;;  %v10311_v12 = vmax.f32 %v3992_v11, 0.0  ;;  %v4058_v7 = vmul.f32 %v10309_v44, %v9427_v38 }
 0x143   : > { %v10313_v52 = vpop.f32.mrf.mxu0  ;;  %v3616_v16 = vpop.f32.mrf.mxu1 }
 0x144   : > { %v3951_v0 = vadd.f32 %v3616_v16, %v3086_v5  ;;  %v4059_v8 = vmul.f32 %v10311_v12, %v9399_v27  ;;  %v3090_v27 = vadd.f32 %v2905_v10, %v10215_v21  ;;  %v3091_v5 = vadd.f32 %v10261_v58, %v2075_v56 }
 0x145   : > { %v10315_v19 = vpop.f32.mrf.mxu0  ;;  %v3618_v36 = vpop.f32.mrf.mxu1  ;;  %v2229_v56 = vadd.f32 %v10231_v4, %v10185_v55 }
 0x146   : > { %v3995_v41 = vadd.f32 %v10292_v57, %v3951_v0  ;;  %v3952_v33 = vadd.f32 %v3618_v36, %v3087_v35  ;;  %4189 = vmatprep.subr.mxu1 %v4059_v8 }
 0x147   : > { %v2822_v11 = vpop.f32.mrf.mxu0  ;;  %v3764_v13 = vpop.f32.mrf.mxu1  ;;  %4190 = vmatpush1.msra.mxu1 %v4058_v7 }
 0x148   : > { %v3996_v14 = vadd.f32 %v10292_v57, %v3952_v33  ;;  %v10332_v17 = vadd.f32 %v2822_v11, %v10249_v39  ;;  %v10335_v34 = vadd.f32 %v3764_v13, %v10251_v61  ;;  %8755 = vmatmul.mubr.msk.f32.vlgmr.msra.gmra.mxu1 %vm4075_vm2, %v10327_v32  ;;  %v10344_v16 = vmax.f32 %v3995_v41, 0.0  ;;  %v10352_v39 = vld [vmem:[%s11386_s5 + $0x18] sm:$0xff] }
 0x149   : > { %v10339_v38 = vpop.f32.mrf.mxu0  ;;  %v10341_v48 = vpop.f32.mrf.mxu1  ;;  %4229 = vmatprep.mubr.f32.mxu1 %v11482_v46  ;;  %v2227_v61 = vadd.f32 %v10227_v60, %v10181_v9 }
 0x14a   : > { %11548 = vst [vmem:[#allocation91_spill] sm:$0xff] %v10335_v34  ;;  %11549 = vst [vmem:[#allocation92_spill] sm:$0xff] %v10339_v38  ;;  %v10346_v21 = vmax.f32 %v3996_v14, 0.0  ;;  %v4062_v9 = vmul.f32 %v10344_v16, %v9538_v18 }
 0x14b   : > { %v10356_v10 = vpop.f32.mrf.mxu0  ;;  %v3770_v35 = vpop.f32.mrf.mxu1  ;;  %v3094_v60 = vadd.f32 %v10273_v3, %v2227_v61  ;;  %v3095_v3 = vadd.f32 %v10277_v43, %v2229_v56 }
 0x14c   : > { %v3955_v0 = vadd.f32 %v3770_v35, %v3090_v27  ;;  %8756 = vmatmul.mubr.msk.f32.gmra.mxu1 %vm4075_vm2, %v10352_v39  ;;  %v4063_v8 = vmul.f32 %v10346_v21, %v9501_v59 }
 0x14d   : > { %v10360_v58 = vpop.f32.mrf.mxu0  ;;  %v3772_v36 = vpop.f32.mrf.mxu1  ;;  %4377 = vmatprep.mubr.f32.mxu1 %v11482_v46 }
 0x14e   : > { %v3999_v41 = vadd.f32 %v10292_v57, %v3955_v0  ;;  %v3956_v33 = vadd.f32 %v3772_v36, %v3091_v5  ;;  %4343 = vmatprep.subr.mxu1 %v4063_v8 }
 0x14f   : > { %v2976_v7 = vpop.f32.mrf.mxu0  ;;  %v3918_v11 = vpop.f32.mrf.mxu1  ;;  %4344 = vmatpush1.msra.mxu1 %v4062_v9 }
 0x150   : > { %v10371_v13 = vmax.f32 %v3999_v41, 0.0  ;;  %v4000_v59 = vadd.f32 %v10292_v57, %v3956_v33  ;;  %v10375_v27 = vadd.f32 %v2976_v7, %v10263_v20  ;;  %v10378_v4 = vadd.f32 %v3918_v11, %v10265_v29  ;;  %8759 = vmatmul.mubr.msk.f32.vlgmr.msra.gmra.mxu1 %vm4075_vm2, %v10327_v32 }
 0x151   : > { %v10382_v18 = vpop.f32.mrf.mxu0  ;;  %v10384_v55 = vpop.f32.mrf.mxu1  ;;  %4383 = vmatprep.mubr.f32.mxu1 %v11482_v46  ;;  %v1688_v41 = vadd.f32 %v10237_v37, %v10171_v2 }
 0x152   : > { %11550 = vst [vmem:[#allocation93_spill] sm:$0xff] %v10378_v4  ;;  %11551 = vst [vmem:[#allocation94_spill] sm:$0xff] %v10382_v18  ;;  %v10387_v14 = vmax.f32 %v4000_v59, 0.0  ;;  %v4066_v29 = vmul.f32 %v10371_v13, %v9396_v26 }
 0x153   : > { %11552 = vst [vmem:[#allocation95_spill] sm:$0xff] %v10384_v55  ;;  %v10390_v5 = vpop.f32.mrf.mxu0  ;;  %v3924_v20 = vpop.f32.mrf.mxu1  ;;  %v3080_v7 = vadd.f32 %v10290_v28, %v1688_v41  ;;  %v11558_v41 = vld [vmem:[#allocation8_spill] sm:$0xff] }
 0x154   : > { %v3959_v61 = vadd.f32 %v3924_v20, %v3094_v60  ;;  %8760 = vmatmul.mubr.msk.f32.gmra.mxu1 %vm4075_vm2, %v10352_v39  ;;  %v4067_v43 = vmul.f32 %v10387_v14, %v9384_v22  ;;  %v1690_v60 = vadd.f32 %v10239_v15, %v10173_v47  ;;  %v4041_v20 = vmul.f32 %v10311_v12, %v9472_v51 }
 0x155   : > { %v10396_v35 = vpop.f32.mrf.mxu0  ;;  %v3926_v0 = vpop.f32.mrf.mxu1  ;;  %4531 = vmatprep.mubr.f32.mxu1 %v11482_v46 }
 0x156   : > { %v4003_v36 = vadd.f32 %v10292_v57, %v3959_v61  ;;  %v3960_v8 = vadd.f32 %v3926_v0, %v3095_v3  ;;  %4497 = vmatprep.subr.mxu1 %v4067_v43  ;;  %v3081_v37 = vadd.f32 %v10294_v1, %v1690_v60  ;;  %v1842_v1 = vadd.f32 %v10245_v30, %v10191_v24  ;;  %v11557_v43 = vld [vmem:[#allocation12_spill] sm:$0xff]  ;;  %v6666_v60 = vld [vmem:[%s11387_s6] sm:$0xff] }
 0x157   : > { %v3379_v56 = vpop.f32.mrf.mxu0  ;;  %4498 = vmatpush1.msra.mxu1 %v4066_v29  ;;  %v4040_v29 = vmul.f32 %v10309_v44, %v9484_v54  ;;  %v1844_v24 = vadd.f32 %v10247_v62, %v10195_v45  ;;  %v11559_v62 = vld [vmem:[#allocation9_spill] sm:$0xff]  ;;  %6670 = vperm.xlu1 %9105, %v6666_v60  }
 0x158   : > { %v10404_v26 = vmax.f32 %v4003_v36, 0.0  ;;  %v4004_v33 = vadd.f32 %v10292_v57, %v3960_v8  ;;  %v10408_v9 = vadd.f32 %v3379_v56, %v10279_v50  ;;  %8763 = vmatmul.mubr.msk.f32.vlgmr.msra.gmra.mxu1 %vm4075_vm2, %v10327_v32  ;;  %v4045_v36 = vmul.f32 %v10346_v21, %v11557_v43  ;;  %v11568_v60 = vld [vmem:[#allocation85_spill] sm:$0xff] }
 0x159   : > { %v10412_v22 = vpop.f32.mrf.mxu0  ;;  %4537 = vmatprep.mubr.f32.mxu1 %v11482_v46  ;;  %v3084_v30 = vadd.f32 %v10313_v52, %v1842_v1  ;;  %v3085_v8 = vadd.f32 %v10315_v19, %v1844_v24  ;;  %v10468_v19 = vld [vmem:[%s11386_s5] sm:$0xff] }
 0x15a   : > { %11553 = vst [vmem:[#allocation96_spill] sm:$0xff] %v10408_v9  ;;  %11554 = vst [vmem:[#allocation97_spill] sm:$0xff] %v10412_v22  ;;  %v10417_v11 = vmax.f32 %v4004_v33, 0.0  ;;  %v4070_v50 = vmul.f32 %v10404_v26, %v9434_v40 }
 0x15b   : > { %v3385_v2 = vpop.f32.mrf.mxu0 }
 0x15c   : > { %v3945_v59 = vadd.f32 %v3385_v2, %v3080_v7  ;;  %v4071_v3 = vmul.f32 %v10417_v11, %v9408_v31  ;;  %8764 = vmatmul.mubr.msk.f32.gmra.mxu1 %vm4075_vm2, %v10352_v39 }
 0x15d   : > { %v3387_v15 = vpop.f32.mrf.mxu0  ;;  %4685 = vmatprep.mubr.f32.mxu1 %v11482_v46 }
 0x15e   : > { %v3989_v47 = vadd.f32 %v10292_v57, %v3945_v59  ;;  %v3946_v28 = vadd.f32 %v3387_v15, %v3081_v37  ;;  %4651 = vmatprep.subr.mxu1 %v4071_v3  ;;  %v1996_v37 = vadd.f32 %v10257_v42, %v10213_v6  ;;  %v11561_v15 = vld [vmem:[#allocation13_spill] sm:$0xff]  ;;  %v11564_v42 = vld [vmem:[#allocation82_spill] sm:$0xff] }
 0x15f   : > { %v3533_v40 = vpop.f32.mrf.mxu0  ;;  %4652 = vmatpush1.msra.mxu1 %v4070_v50 }
 0x160   : > { %v3990_v31 = vadd.f32 %v10292_v57, %v3946_v28  ;;  %v10435_v61 = vadd.f32 %v3533_v40, %v10298_v53  ;;  %4811 = vmatprep.subr.mxu1 %v4041_v20  ;;  %v10439_v0 = vmax.f32 %v3989_v47, 0.0  ;;  %8767 = vmatmul.mubr.msk.f32.vlgmr.msra.gmra.mxu1 %vm4075_vm2, %v10327_v32  ;;  %v4044_v47 = vmul.f32 %v10344_v16, %v11561_v15  ;;  %v11563_v40 = vld [vmem:[#allocation15_spill] sm:$0xff] }
 0x161   : > { %v10443_v51 = vpop.f32.mrf.mxu0  ;;  %4812 = vmatpush1.msra.mxu1 %v4040_v29  ;;  %4691 = vmatprep.mubr.f32.mxu1 %v11482_v46  ;;  %v4049_v6 = vmul.f32 %v10387_v14, %v11563_v40  ;;  %v3088_v1 = vadd.f32 %v10356_v10, %v1996_v37  ;;  %v10498_v29 = vld [vmem:[%s11386_s5 + $0x8] sm:$0xff] }
 0x162   : > { %11555 = vst [vmem:[#allocation98_spill] sm:$0xff] %v10435_v61  ;;  %11556 = vst [vmem:[#allocation99_spill] sm:$0xff] %v10443_v51  ;;  %v10450_v53 = vmax.f32 %v3990_v31, 0.0  ;;  %4965 = vmatprep.subr.mxu1 %v4045_v36  ;;  %v4056_v52 = vmul.f32 %v10439_v0, %v11559_v62 }
 0x163   : > { %v3539_v54 = vpop.f32.mrf.mxu0 }
 0x164   : > { %v3949_v56 = vadd.f32 %v3539_v54, %v3084_v30  ;;  %v4057_v33 = vmul.f32 %v10450_v53, %v11558_v41  ;;  %8768 = vmatmul.mubr.msk.f32.gmra.mxu1 %vm4075_vm2, %v10352_v39  ;;  %v11566_v54 = vld [vmem:[#allocation11_spill] sm:$0xff] }
 0x165   : > { %v3541_v45 = vpop.f32.mrf.mxu0  ;;  %4845 = vmatprep.mubr.f32.mxu1 %v11482_v46 }
 0x166   : > { %v3993_v7 = vadd.f32 %v10292_v57, %v3949_v56  ;;  %v3950_v2 = vadd.f32 %v3541_v45, %v3085_v8  ;;  %4112 = vmatprep.subr.mxu0 %v4057_v33  ;;  %v11567_v33 = vld [vmem:[#allocation74_spill] sm:$0xff] }
 0x167   : > { %v3687_v50 = vpop.f32.mrf.mxu0  ;;  %4113 = vmatpush1.msra.mxu0 %v4056_v52  ;;  %v2150_v45 = vadd.f32 %v11568_v60, %v11567_v33 }
 0x168   : > { %v3994_v59 = vadd.f32 %v10292_v57, %v3950_v2  ;;  %v10474_v3 = vadd.f32 %v3687_v50, %v10332_v17  ;;  %8753 = vmatmul.mubr.msk.f32.vlgmr.msra.gmra.mxu0 %vm4075_vm2, %v10327_v32  ;;  %v10480_v28 = vmax.f32 %v3993_v7, 0.0  ;;  %8771 = vmatmul.mubr.msk.f32.vlgmr.msra.gmra.mxu1 %vm4075_vm2, %v10468_v19  ;;  %v1998_v17 = vadd.f32 %v11564_v42, %v10217_v25  ;;  %v11565_v25 = vld [vmem:[#allocation10_spill] sm:$0xff]  ;;  %v11570_v7 = vld [vmem:[#allocation17_spill] sm:$0xff] }
 0x169   : > { %v10484_v20 = vpop.f32.mrf.mxu0  ;;  %4152 = vmatprep.mubr.f32.mxu0 %v11482_v46  ;;  %4966 = vmatpush1.msra.mxu1 %v4044_v47  ;;  %v4048_v2 = vmul.f32 %v10371_v13, %v11570_v7  ;;  %v11574_v47 = vld [vmem:[#allocation86_spill] sm:$0xff] }
 0x16a   : > { %11560 = vst [vmem:[#allocation12_spill] sm:$0xff] %v10474_v3  ;;  %11562 = vst [vmem:[#allocation8_spill] sm:$0xff] %v10484_v20  ;;  %v10492_v31 = vmax.f32 %v3994_v59, 0.0  ;;  %4851 = vmatprep.mubr.f32.mxu1 %v11482_v46  ;;  %5119 = vmatprep.subr.mxu1 %v4049_v6  ;;  %v3089_v36 = vadd.f32 %v10360_v58, %v1998_v17  ;;  %v4060_v8 = vmul.f32 %v10480_v28, %v11566_v54  ;;  %v11572_v59 = vld [vmem:[#allocation19_spill] sm:$0xff] }
 0x16b   : > { %v3693_v43 = vpop.f32.mrf.mxu0  ;;  %v4053_v15 = vmul.f32 %v10417_v11, %v11572_v59  ;;  %v3092_v6 = vadd.f32 %v10390_v5, %v2150_v45 }
 0x16c   : > { %v3953_v24 = vadd.f32 %v3693_v43, %v3088_v1  ;;  %8754 = vmatmul.mubr.msk.f32.gmra.mxu0 %vm4075_vm2, %v10352_v39  ;;  %v4061_v10 = vmul.f32 %v10492_v31, %v11565_v25  ;;  %8772 = vmatmul.mubr.msk.f32.gmra.mxu1 %vm4075_vm2, %v10498_v29  ;;  %v11576_v25 = vld [vmem:[#allocation16_spill] sm:$0xff] }
 0x16d   : > { %v3695_v30 = vpop.f32.mrf.mxu0  ;;  %4300 = vmatprep.mubr.f32.mxu0 %v11482_v46  ;;  %4999 = vmatprep.mubr.f32.mxu1 %v11482_v46 }
 0x16e   : > { %v3997_v56 = vadd.f32 %v10292_v57, %v3953_v24  ;;  %v3954_v41 = vadd.f32 %v3695_v30, %v3089_v36  ;;  %4266 = vmatprep.subr.mxu0 %v4061_v10  ;;  %v11575_v36 = vld [vmem:[#allocation14_spill] sm:$0xff] }
 0x16f   : > { %v3841_v58 = vpop.f32.mrf.mxu0  ;;  %4267 = vmatpush1.msra.mxu0 %v4060_v8  ;;  %v11577_v8 = vld [vmem:[#allocation21_spill] sm:$0xff] }
 0x170   : > { %v3998_v62 = vadd.f32 %v10292_v57, %v3954_v41  ;;  %v10516_v52 = vadd.f32 %v3841_v58, %v10375_v27  ;;  %8757 = vmatmul.mubr.msk.f32.vlgmr.msra.gmra.mxu0 %vm4075_vm2, %v10327_v32  ;;  %v10522_v50 = vmax.f32 %v3997_v56, 0.0  ;;  %8775 = vmatmul.mubr.msk.f32.vlgmr.msra.gmra.mxu1 %vm4075_vm2, %v10468_v19  ;;  %v11573_v27 = vld [vmem:[#allocation75_spill] sm:$0xff]  ;;  %v4052_v56 = vmul.f32 %v10404_v26, %v11577_v8  ;;  %v10621_v8 = vld [vmem:[%s11388_s7] sm:$0x1] }
 0x171   : > { %v10526_v37 = vpop.f32.mrf.mxu0  ;;  %4306 = vmatprep.mubr.f32.mxu0 %v11482_v46  ;;  %v2152_v40 = vadd.f32 %v11574_v47, %v11573_v27  ;;  %5120 = vmatpush1.msra.mxu1 %v4048_v2  ;;  %v11578_v58 = vld [vmem:[#allocation23_spill] sm:$0xff]  ;;  %v11581_v2 = vld [vmem:[#allocation22_spill] sm:$0xff]  ;;  %11590 = vst [vmem:[#allocation15_spill] sm:$0xff] %v10621_v8 }
 0x172   : > { %11569 = vst [vmem:[#allocation9_spill] sm:$0xff] %v10516_v52  ;;  %11571 = vst [vmem:[#allocation13_spill] sm:$0xff] %v10526_v37  ;;  %v10534_v42 = vmax.f32 %v3998_v62, 0.0  ;;  %5005 = vmatprep.mubr.f32.mxu1 %v11482_v46  ;;  %5273 = vmatprep.subr.mxu1 %v4053_v15  ;;  %v4064_v10 = vmul.f32 %v10522_v50, %v11576_v25  ;;  %v5323_v33 = vmul.f32 %v10311_v12, %v11578_v58  ;;  %v11580_v62 = vld [vmem:[#allocation20_spill] sm:$0xff]  ;;  %v11582_v15 = vld [vmem:[#allocation25_spill] sm:$0xff] }
 0x173   : > { %v3847_v17 = vpop.f32.mrf.mxu0  ;;  %v3093_v1 = vadd.f32 %v10396_v35, %v2152_v40  ;;  %v4039_v59 = vmul.f32 %v10450_v53, %v11581_v2  ;;  %v4038_v27 = vmul.f32 %v10439_v0, %v11582_v15  ;;  %v11583_v47 = vld [vmem:[#allocation26_spill] sm:$0xff] }
 0x174   : > { %v3957_v43 = vadd.f32 %v3847_v17, %v3092_v6  ;;  %8758 = vmatmul.mubr.msk.f32.gmra.mxu0 %vm4075_vm2, %v10352_v39  ;;  %v4065_v24 = vmul.f32 %v10534_v42, %v11575_v36  ;;  %8776 = vmatmul.mubr.msk.f32.gmra.mxu1 %vm4075_vm2, %v10498_v29  ;;  %v5322_v40 = vmul.f32 %v10309_v44, %v11583_v47  ;;  %v11584_v6 = vld [vmem:[#allocation28_spill] sm:$0xff]  ;;  %v11588_v25 = vld [vmem:[#allocation34_spill] sm:$0xff] }
 0x175   : > { %v3849_v5 = vpop.f32.mrf.mxu0  ;;  %4454 = vmatprep.mubr.f32.mxu0 %v11482_v46  ;;  %5153 = vmatprep.mubr.f32.mxu1 %v11482_v46  ;;  %v4043_v17 = vmul.f32 %v10492_v31, %v11584_v6  ;;  %v11586_v36 = vld [vmem:[#allocation32_spill] sm:$0xff] }
 0x176   : > { %v4001_v30 = vadd.f32 %v10292_v57, %v3957_v43  ;;  %v3958_v54 = vadd.f32 %v3849_v5, %v3093_v1  ;;  %4420 = vmatprep.subr.mxu0 %v4065_v24  ;;  %v11585_v1 = vld [vmem:[#allocation29_spill] sm:$0xff]  ;;  %v4042_v24 = vmul.f32 %v10480_v28, %v11586_v36 }
 0x177   : > { %4421 = vmatpush1.msra.mxu0 %v4064_v10  ;;  %v5327_v43 = vmul.f32 %v10346_v21, %v11585_v1  ;;  %v11587_v5 = vld [vmem:[#allocation33_spill] sm:$0xff]  ;;  %v4047_v10 = vmul.f32 %v10534_v42, %v11588_v25 }
 0x178   : > { %v4002_v35 = vadd.f32 %v10292_v57, %v3958_v54  ;;  %8761 = vmatmul.mubr.msk.f32.vlgmr.msra.gmra.mxu0 %vm4075_vm2, %v10327_v32  ;;  %v10554_v41 = vmax.f32 %v4001_v30, 0.0  ;;  %8779 = vmatmul.mubr.msk.f32.vlgmr.msra.gmra.mxu1 %vm4075_vm2, %v10468_v19  ;;  %v11579_v57 = vld [vmem:[#allocation18_spill] sm:$0xff]  ;;  %v11589_v30 = vld [vmem:[#allocation37_spill] sm:$0xff] }
 0x179   : > { %4460 = vmatprep.mubr.f32.mxu0 %v11482_v46  ;;  %5274 = vmatpush1.msra.mxu1 %v4052_v56  ;;  %v5331_v54 = vmul.f32 %v10387_v14, %v11589_v30  ;;  %v11591_v56 = vld [vmem:[#allocation7_spill] sm:$0xff]  ;;  %v11602_v25 = vld [vmem:[#allocation57_spill] sm:$0xff]  ;;  %v11603_v30 = vld [vmem:[#allocation30_spill] sm:$0xff] }
 0x17a   : > { %v10561_v60 = vmax.f32 %v4002_v35, 0.0  ;;  %5159 = vmatprep.mubr.f32.mxu1 %v11482_v46  ;;  %5452 = vmatprep.subr.mxu1 %v5323_v33  ;;  %v4068_v7 = vmul.f32 %v10554_v41, %v11580_v62  ;;  %v10616_v35 = vld [vmem:[%s11386_s5 + $0x28] sm:$0xff]  ;;  %v6746_v58 = vrot.slane %v10621_v8, %v11591_v56  ;;  %v11592_v33 = vld [vmem:[#allocation45_spill] sm:$0xff] }
 0x17c   : > { %8762 = vmatmul.mubr.msk.f32.gmra.mxu0 %vm4075_vm2, %v10352_v39  ;;  %v4069_v45 = vmul.f32 %v10561_v60, %v11579_v57  ;;  %8780 = vmatmul.mubr.msk.f32.gmra.mxu1 %vm4075_vm2, %v10498_v29  ;;  %v4046_v57 = vmul.f32 %v10522_v50, %v11592_v33 }
 0x17d   : > { %4608 = vmatprep.mubr.f32.mxu0 %v11482_v46  ;;  %5307 = vmatprep.mubr.f32.mxu1 %v11482_v46 }
 0x17e   : > { %4574 = vmatprep.subr.mxu0 %v4069_v45  ;;  %6747 = vrot.lane.b32.xlu1 %v6746_v58, %s9183_s18  ;;  %v11593_v45 = vld [vmem:[#allocation48_spill] sm:$0xff]  ;;  %s525_s18 = scalar_select %p524_p11, %s11146_s21, 31 }
 0x17f   : > { %4575 = vmatpush1.msra.mxu0 %v4068_v7  ;;  %v5330_v62 = vmul.f32 %v10371_v13, %v11593_v45  ;;  %v11594_v7 = vld [vmem:[#allocation49_spill] sm:$0xff] }
 0x180   : > { %8765 = vmatmul.mubr.msk.f32.vlgmr.msra.gmra.mxu0 %vm4075_vm2, %v10327_v32  ;;  %4734 = vmatprep.subr.mxu0 %v4039_v59  ;;  %v10599_v32 = vld [vmem:[%s11386_s5 + $0x20] sm:$0xff]  ;;  %v4051_v2 = vmul.f32 %v10561_v60, %v11594_v7  ;;  %s8616_s19 = sshll.u32 %s525_s18, 3  ;;  %s516_s18 = sand.u32 1, %s9171_s23  }
 0x181   : > { %8783 = vmatmul.mubr.msk.f32.vlgmr.msra.gmra.mxu1 %vm4075_vm2, %v10468_v19  ;;  %4735 = vmatpush1.msra.mxu0 %v4038_v27  ;;  %v11595_v59 = vld [vmem:[#allocation50_spill] sm:$0xff]  ;;  %v11596_v27 = vld [vmem:[#allocation53_spill] sm:$0xff]  ;;  %s11176_s28 = scalar_lea.vmem %s11694_s1, %s8616_s19  ;;  %s517_s17 = scalar_lea.vmem [#allocation4], %s516_s18 }
 0x182   : > { %5453 = vmatpush1.msra.mxu1 %v5322_v40  ;;  %4888 = vmatprep.subr.mxu0 %v4043_v17  ;;  %v5335_v15 = vmul.f32 %v10417_v11, %v11595_v59  ;;  %v4050_v47 = vmul.f32 %v10554_v41, %v11596_v27  ;;  %v11597_v40 = vld [vmem:[#allocation54_spill] sm:$0xff]  ;;  %v11598_v17 = vld [vmem:[#allocation55_spill] sm:$0xff]  ;;  %v11609_v59 = vld [vmem:[#allocation36_spill] sm:$0xff]  ;;  %s8533_s20 = sshll.u32 %s517_s17, 4  ;;  %s8534_s20 = int_to_ptr.vmem [resolvable:$true] %s8533_s20 }
 0x183   : > { %5606 = vmatprep.subr.mxu1 %v5327_v43  ;;  %4614 = vmatprep.mubr.f32.mxu0 %v11482_v46  ;;  %v5334_v6 = vmul.f32 %v10404_v26, %v11597_v40  ;;  %v5321_v1 = vmul.f32 %v10450_v53, %v11598_v17  ;;  %v11599_v43 = vld [vmem:[#allocation24_spill] sm:$0xff]  ;;  %v11610_v27 = vld [vmem:[#allocation61_spill] sm:$0xff]  ;;  %v11611_v40 = vld [vmem:[#allocation38_spill] sm:$0xff]  ;;  %s9119_s0 = scalar_lea.vmem %s8534_s20, 16 }
 0x184   : > { %5313 = vmatprep.mubr.f32.mxu1 %v11482_v46  ;;  %8766 = vmatmul.mubr.msk.f32.gmra.mxu0 %vm4075_vm2, %v10352_v39  ;;  %v5326_v39 = vmul.f32 %v10344_v16, %v11587_v5  ;;  %v5996_v36 = vmul.f32 %v10311_v12, %v11599_v43  ;;  %v11601_v5 = vld [vmem:[#allocation27_spill] sm:$0xff]  ;;  %v11613_v17 = vld [vmem:[#allocation40_spill] sm:$0xff]  ;;  %v11614_v43 = vld [vmem:[#allocation41_spill] sm:$0xff]  ;;  %p9120_p12 = scmp.ne.s32.totalorder %s8534_s20, %s9119_s0 }
 0x185   : > { %8784 = vmatmul.mubr.msk.f32.gmra.mxu1 %vm4075_vm2, %v10498_v29  ;;  %4768 = vmatprep.mubr.f32.mxu0 %v11482_v46 }
 0x186   : > { %5486 = vmatprep.mubr.f32.mxu1 %v11482_v46  ;;  %p9121_p13 = pnand %p9120_p12, %p9310_p5 }
 0x188   : > { %8769 = vmatmul.mubr.msk.f32.vlgmr.msra.gmra.mxu0 %vm4075_vm2, %v10468_v19  ;;  %p9122_p0 = pneg %p9121_p13 }
 0x189   : > { %4889 = vmatpush1.msra.mxu0 %v4042_v24  ;;  %8789 = vmatmul.mubr.msk.f32.vlgmr.msra.gmra.mxu1 %vm4075_vm2, %v10599_v32  ;;  %v11600_v24 = vld [vmem:[#allocation56_spill] sm:$0xff] }
 0x18a   : > { %5607 = vmatpush1.msra.mxu1 %v5326_v39  ;;  %5042 = vmatprep.subr.mxu0 %v4047_v10  ;;  %v5320_v12 = vmul.f32 %v10439_v0, %v11600_v24  ;;  %v5995_v39 = vmul.f32 %v10309_v44, %v11601_v5  ;;  %v5325_v10 = vmul.f32 %v10492_v31, %v11602_v25  ;;  %v7905_v44 = vld [vmem:[#allocation2] sm:$0x1]  ;;  %v11616_v24 = vld [vmem:[#allocation43_spill] sm:$0xff] }
 0x18b   : > { %5760 = vmatprep.subr.mxu1 %v5331_v54  ;;  %4774 = vmatprep.mubr.f32.mxu0 %v11482_v46  ;;  %v6000_v54 = vmul.f32 %v10346_v21, %v11603_v30  ;;  %v10696_v21 = vld [vmem:[%s11386_s5 + $0x30] sm:$0xff] }
 0x18c   : > { %5492 = vmatprep.mubr.f32.mxu1 %v11482_v46  ;;  %8770 = vmatmul.mubr.msk.f32.gmra.mxu0 %vm4075_vm2, %v10498_v29 }
 0x18d   : > { %8790 = vmatmul.mubr.msk.f32.gmra.mxu1 %vm4075_vm2, %v10616_v35  ;;  %4922 = vmatprep.mubr.f32.mxu0 %v11482_v46 }
 0x18e   : > { %5640 = vmatprep.mubr.f32.mxu1 %v11482_v46  ;;  %7908 = vperm.xlu1 %9105, %v7905_v44  }
 0x190   : > { %8773 = vmatmul.mubr.msk.f32.vlgmr.msra.gmra.mxu0 %vm4075_vm2, %v10468_v19 }
 0x191   : > { %5043 = vmatpush1.msra.mxu0 %v4046_v57  ;;  %8793 = vmatmul.mubr.msk.f32.vlgmr.msra.gmra.mxu1 %vm4075_vm2, %v10599_v32  ;;  %v11606_v57 = vld [vmem:[#allocation59_spill] sm:$0xff] }
 0x192   : > { %5761 = vmatpush1.msra.mxu1 %v5330_v62  ;;  %5196 = vmatprep.subr.mxu0 %v4051_v2  ;;  %v5329_v45 = vmul.f32 %v10534_v42, %v11606_v57  ;;  %v11607_v62 = vld [vmem:[#allocation35_spill] sm:$0xff]  ;;  %v10713_v2 = vld [vmem:[%s11386_s5 + $0x38] sm:$0xff] }
 0x193   : > { %5914 = vmatprep.subr.mxu1 %v5335_v15  ;;  %4928 = vmatprep.mubr.f32.mxu0 %v11482_v46  ;;  %v6004_v7 = vmul.f32 %v10387_v14, %v11607_v62  ;;  %v6003_v15 = vmul.f32 %v10371_v13, %v11609_v59  ;;  %v11612_v13 = vld [vmem:[#allocation39_spill] sm:$0xff] }
 0x194   : > { %5646 = vmatprep.mubr.f32.mxu1 %v11482_v46  ;;  %8774 = vmatmul.mubr.msk.f32.gmra.mxu0 %vm4075_vm2, %v10498_v29 }
 0x195   : > { %8794 = vmatmul.mubr.msk.f32.gmra.mxu1 %vm4075_vm2, %v10616_v35  ;;  %5076 = vmatprep.mubr.f32.mxu0 %v11482_v46 }
 0x196   : > { %5794 = vmatprep.mubr.f32.mxu1 %v11482_v46 }
 0x198   : > { %8777 = vmatmul.mubr.msk.f32.vlgmr.msra.gmra.mxu0 %vm4075_vm2, %v10468_v19 }
 0x199   : > { %5197 = vmatpush1.msra.mxu0 %v4050_v47  ;;  %8797 = vmatmul.mubr.msk.f32.vlgmr.msra.gmra.mxu1 %vm4075_vm2, %v10599_v32  ;;  %v5333_v47 = vmul.f32 %v10561_v60, %v11610_v27 }
 0x19a   : > { %5915 = vmatpush1.msra.mxu1 %v5334_v6  ;;  %5375 = vmatprep.subr.mxu0 %v5321_v1  ;;  %v6008_v6 = vmul.f32 %v10417_v11, %v11611_v40  ;;  %v5332_v11 = vmul.f32 %v10554_v41, %v11612_v13  ;;  %v6007_v1 = vmul.f32 %v10404_v26, %v11613_v17  ;;  %v11615_v26 = vld [vmem:[#allocation42_spill] sm:$0xff] }
 0x19b   : > { %6125 = vmatprep.subr.mxu1 %v5996_v36  ;;  %5082 = vmatprep.mubr.f32.mxu0 %v11482_v46  ;;  %v5994_v36 = vmul.f32 %v10450_v53, %v11614_v43  ;;  %v5993_v53 = vmul.f32 %v10439_v0, %v11615_v26  ;;  %v11617_v0 = vld [vmem:[#allocation44_spill] sm:$0xff] }
 0x19c   : > { %5800 = vmatprep.mubr.f32.mxu1 %v11482_v46  ;;  %8778 = vmatmul.mubr.msk.f32.gmra.mxu0 %vm4075_vm2, %v10498_v29 }
 0x19d   : > { %8798 = vmatmul.mubr.msk.f32.gmra.mxu1 %vm4075_vm2, %v10616_v35  ;;  %5230 = vmatprep.mubr.f32.mxu0 %v11482_v46 }
 0x19e   : > { %5948 = vmatprep.mubr.f32.mxu1 %v11482_v46 }
 0x1a0   : > { %8781 = vmatmul.mubr.msk.f32.vlgmr.msra.gmra.mxu0 %vm4075_vm2, %v10468_v19  ;;  %v11604_v19 = vld [vmem:[#allocation58_spill] sm:$0xff] }
 0x1a1   : > { %5376 = vmatpush1.msra.mxu0 %v5320_v12  ;;  %8801 = vmatmul.mubr.msk.f32.vlgmr.msra.gmra.mxu1 %vm4075_vm2, %v10599_v32  ;;  %v5324_v58 = vmul.f32 %v10480_v28, %v11604_v19  ;;  %v5998_v12 = vmul.f32 %v10492_v31, %v11616_v24  ;;  %v5997_v31 = vmul.f32 %v10480_v28, %v11617_v0  ;;  %v11620_v28 = vld [vmem:[#allocation51_spill] sm:$0xff] }
 0x1a2   : > { %6126 = vmatpush1.msra.mxu1 %v5995_v39  ;;  %5529 = vmatprep.subr.mxu0 %v5325_v10  ;;  %v6006_v25 = vmul.f32 %v10561_v60, %v11620_v28 }
 0x1a3   : > { %6279 = vmatprep.subr.mxu1 %v6000_v54  ;;  %5236 = vmatprep.mubr.f32.mxu0 %v11482_v46 }
 0x1a4   : > { %5954 = vmatprep.mubr.f32.mxu1 %v11482_v46  ;;  %8782 = vmatmul.mubr.msk.f32.gmra.mxu0 %vm4075_vm2, %v10498_v29  ;;  %v11605_v29 = vld [vmem:[#allocation31_spill] sm:$0xff] }
 0x1a5   : > { %8802 = vmatmul.mubr.msk.f32.gmra.mxu1 %vm4075_vm2, %v10616_v35  ;;  %5409 = vmatprep.mubr.f32.mxu0 %v11482_v46  ;;  %v5999_v33 = vmul.f32 %v10344_v16, %v11605_v29  ;;  %v11608_v16 = vld [vmem:[#allocation60_spill] sm:$0xff] }
 0x1a6   : > { %6159 = vmatprep.mubr.f32.mxu1 %v11482_v46  ;;  %v5328_v14 = vmul.f32 %v10522_v50, %v11608_v16 }
 0x1a8   : > { %8787 = vmatmul.mubr.msk.f32.vlgmr.msra.gmra.mxu0 %vm4075_vm2, %v10599_v32 }
 0x1a9   : > { %5530 = vmatpush1.msra.mxu0 %v5324_v58  ;;  %8807 = vmatmul.mubr.msk.f32.vlgmr.msra.gmra.mxu1 %vm4075_vm2, %v10696_v21 }
 0x1aa   : > { %6280 = vmatpush1.msra.mxu1 %v5999_v33  ;;  %5683 = vmatprep.subr.mxu0 %v5329_v45 }
 0x1ab   : > { %6433 = vmatprep.subr.mxu1 %v6004_v7  ;;  %5415 = vmatprep.mubr.f32.mxu0 %v11482_v46 }
 0x1ac   : > { %6165 = vmatprep.mubr.f32.mxu1 %v11482_v46  ;;  %8788 = vmatmul.mubr.msk.f32.gmra.mxu0 %vm4075_vm2, %v10616_v35 }
 0x1ad   : > { %8808 = vmatmul.mubr.msk.f32.gmra.mxu1 %vm4075_vm2, %v10713_v2  ;;  %5563 = vmatprep.mubr.f32.mxu0 %v11482_v46 }
 0x1ae   : > { %6313 = vmatprep.mubr.f32.mxu1 %v11482_v46 }
 0x1b0   : > { %8791 = vmatmul.mubr.msk.f32.vlgmr.msra.gmra.mxu0 %vm4075_vm2, %v10599_v32 }
 0x1b1   : > { %5684 = vmatpush1.msra.mxu0 %v5328_v14  ;;  %8811 = vmatmul.mubr.msk.f32.vlgmr.msra.gmra.mxu1 %vm4075_vm2, %v10696_v21 }
 0x1b2   : > { %6434 = vmatpush1.msra.mxu1 %v6003_v15  ;;  %5837 = vmatprep.subr.mxu0 %v5333_v47 }
 0x1b3   : > { %6587 = vmatprep.subr.mxu1 %v6008_v6  ;;  %5569 = vmatprep.mubr.f32.mxu0 %v11482_v46 }
 0x1b4   : > { %6319 = vmatprep.mubr.f32.mxu1 %v11482_v46  ;;  %8792 = vmatmul.mubr.msk.f32.gmra.mxu0 %vm4075_vm2, %v10616_v35 }
 0x1b5   : > { %8812 = vmatmul.mubr.msk.f32.gmra.mxu1 %vm4075_vm2, %v10713_v2  ;;  %5717 = vmatprep.mubr.f32.mxu0 %v11482_v46 }
 0x1b6   : > { %6467 = vmatprep.mubr.f32.mxu1 %v11482_v46 }
 0x1b8   : > { %8795 = vmatmul.mubr.msk.f32.vlgmr.msra.gmra.mxu0 %vm4075_vm2, %v10599_v32 }
 0x1b9   : > { %5838 = vmatpush1.msra.mxu0 %v5332_v11  ;;  %8815 = vmatmul.mubr.msk.f32.vlgmr.msra.gmra.mxu1 %vm4075_vm2, %v10696_v21 }
 0x1ba   : > { %6588 = vmatpush1.msra.mxu1 %v6007_v1  ;;  %6048 = vmatprep.subr.mxu0 %v5994_v36 }
 0x1bb   : > { %5723 = vmatprep.mubr.f32.mxu0 %v11482_v46  ;;  %6473 = vmatprep.mubr.f32.mxu1 %v11482_v46 }
 0x1bc   : > { %8796 = vmatmul.mubr.msk.f32.gmra.mxu0 %vm4075_vm2, %v10616_v35 }
 0x1bd   : > { %8816 = vmatmul.mubr.msk.f32.gmra.mxu1 %vm4075_vm2, %v10713_v2  ;;  %5871 = vmatprep.mubr.f32.mxu0 %v11482_v46 }
 0x1be   : > { %6621 = vmatprep.mubr.f32.mxu1 %v11482_v46 }
 0x1c0   : > { %8799 = vmatmul.mubr.msk.f32.vlgmr.msra.gmra.mxu0 %vm4075_vm2, %v10599_v32  ;;  %v11618_v32 = vld [vmem:[#allocation46_spill] sm:$0xff] }
 0x1c1   : > { %6049 = vmatpush1.msra.mxu0 %v5993_v53  ;;  %8819 = vmatmul.mubr.msk.f32.vlgmr.msra.gmra.mxu1 %vm4075_vm2, %v10696_v21  ;;  %v6002_v5 = vmul.f32 %v10534_v42, %v11618_v32  ;;  %v11621_v42 = vld [vmem:[#allocation52_spill] sm:$0xff] }
 0x1c2   : > { %6202 = vmatprep.subr.mxu0 %v5998_v12  ;;  %5877 = vmatprep.mubr.f32.mxu0 %v11482_v46  ;;  %v6005_v10 = vmul.f32 %v10554_v41, %v11621_v42 }
 0x1c3   : > { %6627 = vmatprep.mubr.f32.mxu1 %v11482_v46 }
 0x1c4   : > { %8800 = vmatmul.mubr.msk.f32.gmra.mxu0 %vm4075_vm2, %v10616_v35  ;;  %v11619_v35 = vld [vmem:[#allocation47_spill] sm:$0xff] }
 0x1c5   : > { %8820 = vmatmul.mubr.msk.f32.gmra.mxu1 %vm4075_vm2, %v10713_v2  ;;  %6082 = vmatprep.mubr.f32.mxu0 %v11482_v46  ;;  %v6001_v39 = vmul.f32 %v10522_v50, %v11619_v35 }
 0x1c6   : > { %6887 = vmatprep.mubr.f32.mxu1 %v11482_v46 }
 0x1c8   : > { %8805 = vmatmul.mubr.msk.f32.vlgmr.msra.gmra.mxu0 %vm4075_vm2, %v10696_v21 }
 0x1c9   : > { %6203 = vmatpush1.msra.mxu0 %v5997_v31  ;;  %6088 = vmatprep.mubr.f32.mxu0 %v11482_v46 }
 0x1ca   : > { %6356 = vmatprep.subr.mxu0 %v6002_v5 }
 0x1cc   : > { %8806 = vmatmul.mubr.msk.f32.gmra.mxu0 %vm4075_vm2, %v10713_v2 }
 0x1cd   : > { %6236 = vmatprep.mubr.f32.mxu0 %v11482_v46 }
 0x1d0   : > { %8809 = vmatmul.mubr.msk.f32.vlgmr.msra.gmra.mxu0 %vm4075_vm2, %v10696_v21 }
 0x1d1   : > { %6357 = vmatpush1.msra.mxu0 %v6001_v39  ;;  %6242 = vmatprep.mubr.f32.mxu0 %v11482_v46 }
 0x1d2   : > { %6510 = vmatprep.subr.mxu0 %v6006_v25 }
 0x1d4   : > { %8810 = vmatmul.mubr.msk.f32.gmra.mxu0 %vm4075_vm2, %v10713_v2 }
 0x1d5   : > { %6390 = vmatprep.mubr.f32.mxu0 %v11482_v46 }
 0x1d8   : > { %8813 = vmatmul.mubr.msk.f32.vlgmr.msra.gmra.mxu0 %vm4075_vm2, %v10696_v21 }
 0x1d9   : > { %6511 = vmatpush1.msra.mxu0 %v6005_v10  ;;  %6396 = vmatprep.mubr.f32.mxu0 %v11482_v46 }
 0x1dc   : > { %8814 = vmatmul.mubr.msk.f32.gmra.mxu0 %vm4075_vm2, %v10713_v2 }
 0x1dd   : > { %6544 = vmatprep.mubr.f32.mxu0 %v11482_v46 }
 0x1e0   : > { %8817 = vmatmul.mubr.msk.f32.vlgmr.msra.gmra.mxu0 %vm4075_vm2, %v10696_v21 }
 0x1e1   : > { %6550 = vmatprep.mubr.f32.mxu0 %v11482_v46 }
 0x1e4   : > { %8818 = vmatmul.mubr.msk.f32.gmra.mxu0 %vm4075_vm2, %v10713_v2 }
 0x1e5   : > { %6816 = vmatprep.mubr.f32.mxu0 %v11482_v46 }
 0x208   : > { %v4225_v50 = vpop.f32.mrf.mxu1 }
 0x20a   : > { %v4227_v41 = vpop.f32.mrf.mxu1 }
 0x20c   : > { %v10811_v60 = vpop.f32.mrf.mxu1 }
 0x20e   : > { %v10813_v30 = vpop.f32.mrf.mxu1 }
 0x210   : > { %v4379_v54 = vpop.f32.mrf.mxu1 }
 0x212   : > { %v4381_v44 = vpop.f32.mrf.mxu1 }
 0x214   : > { %v10815_v19 = vpop.f32.mrf.mxu1 }
 0x216   : > { %v10817_v58 = vpop.f32.mrf.mxu1 }
 0x218   : > { %v4533_v21 = vpop.f32.mrf.mxu1 }
 0x21a   : > { %v4535_v29 = vpop.f32.mrf.mxu1 }
 0x21c   : > { %v10819_v33 = vpop.f32.mrf.mxu1 }
 0x21e   : > { %v10821_v57 = vpop.f32.mrf.mxu1 }
 0x220   : > { %v4687_v45 = vpop.f32.mrf.mxu1 }
 0x222   : > { %v4689_v62 = vpop.f32.mrf.mxu1 }
 0x224   : > { %v10823_v7 = vpop.f32.mrf.mxu1 }
 0x226   : > { %v10825_v2 = vpop.f32.mrf.mxu1 }
 0x228   : > { %v4148_v16 = vpop.f32.mrf.mxu0  ;;  %v4847_v14 = vpop.f32.mrf.mxu1 }
 0x229   : > { %v10827_v59 = vadd.f32 %v4847_v14, %v4225_v50 }
 0x22a   : > { %v4150_v15 = vpop.f32.mrf.mxu0  ;;  %v4849_v27 = vpop.f32.mrf.mxu1 }
 0x22b   : > { %v10829_v47 = vadd.f32 %v4849_v27, %v4227_v41 }
 0x22c   : > { %v10831_v40 = vpop.f32.mrf.mxu0  ;;  %v10833_v6 = vpop.f32.mrf.mxu1 }
 0x22e   : > { %v10835_v13 = vpop.f32.mrf.mxu0  ;;  %v10837_v11 = vpop.f32.mrf.mxu1 }
 0x230   : > { %v4302_v17 = vpop.f32.mrf.mxu0  ;;  %v5001_v1 = vpop.f32.mrf.mxu1 }
 0x231   : > { %v10839_v43 = vadd.f32 %v5001_v1, %v4379_v54 }
 0x232   : > { %v4304_v36 = vpop.f32.mrf.mxu0  ;;  %v5003_v26 = vpop.f32.mrf.mxu1 }
 0x233   : > { %v10841_v53 = vadd.f32 %v5003_v26, %v4381_v44 }
 0x234   : > { %v10843_v24 = vpop.f32.mrf.mxu0  ;;  %v10845_v12 = vpop.f32.mrf.mxu1 }
 0x236   : > { %v10847_v0 = vpop.f32.mrf.mxu0  ;;  %v10849_v31 = vpop.f32.mrf.mxu1 }
 0x237   : > { %11622 = vst [vmem:[#allocation82_spill] sm:$0xff] %v10847_v0 }
 0x238   : > { %v4456_v32 = vpop.f32.mrf.mxu0  ;;  %v5155_v5 = vpop.f32.mrf.mxu1 }
 0x239   : > { %v10851_v35 = vadd.f32 %v5155_v5, %v4533_v21 }
 0x23a   : > { %v4458_v39 = vpop.f32.mrf.mxu0  ;;  %v5157_v28 = vpop.f32.mrf.mxu1 }
 0x23b   : > { %v10853_v25 = vadd.f32 %v5157_v28, %v4535_v29 }
 0x23c   : > { %v10855_v42 = vpop.f32.mrf.mxu0  ;;  %v10857_v10 = vpop.f32.mrf.mxu1 }
 0x23d   : > { %11623 = vst [vmem:[#allocation10_spill] sm:$0xff] %v10855_v42 }
 0x23e   : > { %v10859_v50 = vpop.f32.mrf.mxu0  ;;  %v10861_v41 = vpop.f32.mrf.mxu1 }
 0x23f   : > { %11624 = vst [vmem:[#allocation11_spill] sm:$0xff] %v10859_v50 }
 0x240   : > { %v4610_v54 = vpop.f32.mrf.mxu0 }
 0x241   : > { %v5309_v44 = vpop.f32.mrf.mxu1 }
 0x242   : > { %v10863_v14 = vadd.f32 %v5309_v44, %v4687_v45  ;;  %v4612_v27 = vpop.f32.mrf.mxu0 }
 0x243   : > { %v5311_v1 = vpop.f32.mrf.mxu1 }
 0x244   : > { %v10865_v21 = vadd.f32 %v5311_v1, %v4689_v62  ;;  %v10867_v26 = vpop.f32.mrf.mxu0 }
 0x245   : > { %11625 = vst [vmem:[#allocation74_spill] sm:$0xff] %v10867_v26  ;;  %v10869_v29 = vpop.f32.mrf.mxu1 }
 0x246   : > { %v10871_v5 = vpop.f32.mrf.mxu0 }
 0x247   : > { %11626 = vst [vmem:[#allocation85_spill] sm:$0xff] %v10871_v5  ;;  %v10873_v28 = vpop.f32.mrf.mxu1 }
 0x248   : > { %v4770_v56 = vpop.f32.mrf.mxu0 }
 0x249   : > { %v10875_v52 = vadd.f32 %v4770_v56, %v4148_v16  ;;  %v5488_v3 = vpop.f32.mrf.mxu1 }
 0x24a   : > { %v4772_v37 = vpop.f32.mrf.mxu0 }
 0x24b   : > { %v10877_v61 = vadd.f32 %v4772_v37, %v4150_v15  ;;  %v5490_v45 = vpop.f32.mrf.mxu1 }
 0x24c   : > { %v10879_v44 = vpop.f32.mrf.mxu0 }
 0x24d   : > { %v5494_v62 = vpop.f32.mrf.mxu1 }
 0x24e   : > { %v10881_v1 = vpop.f32.mrf.mxu0 }
 0x24f   : > { %v5496_v18 = vpop.f32.mrf.mxu1 }
 0x250   : > { %v4924_v20 = vpop.f32.mrf.mxu0 }
 0x251   : > { %v10883_v9 = vadd.f32 %v4924_v20, %v4302_v17  ;;  %v5642_v38 = vpop.f32.mrf.mxu1 }
 0x252   : > { %v4926_v51 = vpop.f32.mrf.mxu0 }
 0x253   : > { %11627 = vst [vmem:[#allocation17_spill] sm:$0xff] %v10883_v9  ;;  %v10885_v22 = vadd.f32 %v4926_v51, %v4304_v36  ;;  %v5644_v56 = vpop.f32.mrf.mxu1 }
 0x254   : > { %v10887_v16 = vpop.f32.mrf.mxu0 }
 0x255   : > { %11628 = vst [vmem:[#allocation19_spill] sm:$0xff] %v10885_v22  ;;  %11629 = vst [vmem:[#allocation75_spill] sm:$0xff] %v10887_v16  ;;  %v5648_v23 = vpop.f32.mrf.mxu1  ;;  %v10935_v16 = vpop.permute.xlu1 %6670 }
 0x256   : > { %v10889_v37 = vpop.f32.mrf.mxu0 }
 0x257   : > { %11630 = vst [vmem:[#allocation86_spill] sm:$0xff] %v10889_v37  ;;  %v5650_v15 = vpop.f32.mrf.mxu1 }
 0x258   : > { %v5078_v5 = vpop.f32.mrf.mxu0 }
 0x259   : > { %v10891_v26 = vadd.f32 %v5078_v5, %v4456_v32  ;;  %v10893_v50 = vpop.f32.mrf.mxu1 }
 0x25a   : > { %v5080_v42 = vpop.f32.mrf.mxu0 }
 0x25b   : > { %11631 = vst [vmem:[#allocation14_spill] sm:$0xff] %v10891_v26  ;;  %v10895_v4 = vadd.f32 %v5080_v42, %v4458_v39  ;;  %v10897_v20 = vpop.f32.mrf.mxu1 }
 0x25c   : > { %v10899_v17 = vpop.f32.mrf.mxu0 }
 0x25d   : > { %11632 = vst [vmem:[#allocation16_spill] sm:$0xff] %v10895_v4  ;;  %11633 = vst [vmem:[#allocation21_spill] sm:$0xff] %v10899_v17  ;;  %v10901_v51 = vpop.f32.mrf.mxu1  ;;  %v4854_v17 = vadd.f32 %v10833_v6, %v10811_v60 }
 0x25e   : > { %v10903_v36 = vpop.f32.mrf.mxu0 }
 0x25f   : > { %11634 = vst [vmem:[#allocation23_spill] sm:$0xff] %v10903_v36  ;;  %v10905_v8 = vpop.f32.mrf.mxu1 }
 0x260   : > { %v5232_v9 = vpop.f32.mrf.mxu0 }
 0x261   : > { %v10907_v34 = vadd.f32 %v5232_v9, %v4610_v54  ;;  %v10909_v32 = vpop.f32.mrf.mxu1  ;;  %v4856_v9 = vadd.f32 %v10837_v11, %v10813_v30  ;;  %v5964_v54 = vadd.f32 %v5490_v45, %v10829_v47  ;;  %v5008_v30 = vadd.f32 %v10845_v12, %v10815_v19 }
 0x262   : > { %v5234_v5 = vpop.f32.mrf.mxu0  ;;  %v5010_v45 = vadd.f32 %v10849_v31, %v10817_v58 }
 0x263   : > { %11635 = vst [vmem:[#allocation18_spill] sm:$0xff] %v10907_v34  ;;  %v10911_v26 = vadd.f32 %v5234_v5, %v4612_v27  ;;  %v10913_v39 = vpop.f32.mrf.mxu1  ;;  %v5963_v5 = vadd.f32 %v5488_v3, %v10827_v59  ;;  %v5980_v0 = vadd.f32 %v5496_v18, %v4856_v9  ;;  %v10941_v59 = vpop.permute.xlu0 %6675  ;;  %v5968_v18 = vadd.f32 %v5644_v56, %v10841_v53 }
 0x264   : > { %v10915_v42 = vpop.f32.mrf.mxu0  ;;  %v5984_v31 = vadd.f32 %v5650_v15, %v5010_v45  ;;  %v5164_v15 = vadd.f32 %v10861_v41, %v10821_v57  ;;  %v5972_v45 = vadd.f32 %v10897_v20, %v10853_v25 }
 0x265   : > { %11636 = vst [vmem:[#allocation20_spill] sm:$0xff] %v10911_v26  ;;  %11637 = vst [vmem:[#allocation22_spill] sm:$0xff] %v10915_v42  ;;  %v10917_v4 = vpop.f32.mrf.mxu1  ;;  %v5979_v26 = vadd.f32 %v5494_v62, %v4854_v17  ;;  %v5967_v17 = vadd.f32 %v5642_v38, %v10839_v43 }
 0x266   : > { %v10921_v36 = vpop.f32.mrf.mxu0 }
 0x267   : > { %11638 = vst [vmem:[#allocation25_spill] sm:$0xff] %v10921_v36  ;;  %v10923_v22 = vpop.f32.mrf.mxu1 }
 0x268   : > { %v10928_v27 = vpop.f32.mrf.mxu0 }
 0x269   : > { %v6161_v34 = vpop.f32.mrf.mxu1 }
 0x26a   : > { %v10931_v42 = vpop.f32.mrf.mxu0  ;;  %v6636_v36 = vadd.f32 %v6161_v34, %v5963_v5 }
 0x26b   : > { %v6163_v37 = vpop.f32.mrf.mxu1 }
 0x26c   : > { %v6637_v60 = vadd.f32 %v6163_v37, %v5964_v54  ;;  %v10933_v6 = vpop.f32.mrf.mxu0  ;;  %v6680_v12 = vadd.f32 %v10935_v16, %v6636_v36 }
 0x26d   : > { %v6167_v55 = vpop.f32.mrf.mxu1 }
 0x26e   : > { %v6652_v47 = vadd.f32 %v6167_v55, %v5979_v26  ;;  %v10939_v11 = vpop.f32.mrf.mxu0  ;;  %v6681_v34 = vadd.f32 %v10935_v16, %v6637_v60  ;;  %v5983_v26 = vadd.f32 %v5648_v23, %v5008_v30  ;;  %v6712_v43 = vmax.f32 %v6680_v12, 0.0 }
 0x26f   : > { %v6169_v3 = vpop.f32.mrf.mxu1 }
 0x270   : > { %v6653_v62 = vadd.f32 %v6169_v3, %v5980_v0  ;;  %v10946_v37 = vpop.f32.mrf.mxu0  ;;  %v6696_v19 = vadd.f32 %v10941_v59, %v6652_v47  ;;  %v6713_v5 = vmax.f32 %v6681_v34, 0.0  ;;  %v5162_v47 = vadd.f32 %v10857_v10, %v10819_v33 }
 0x271   : > { %v6315_v55 = vpop.f32.mrf.mxu1  ;;  %v5971_v10 = vadd.f32 %v10893_v50, %v10851_v35  ;;  %v5988_v35 = vadd.f32 %v10905_v8, %v5164_v15  ;;  %v5318_v8 = vadd.f32 %v10873_v28, %v10825_v2 }
 0x272   : > { %v6697_v9 = vadd.f32 %v10941_v59, %v6653_v62  ;;  %v10953_v54 = vpop.f32.mrf.mxu0  ;;  %v6728_v60 = vmax.f32 %v6696_v19, 0.0  ;;  %v6640_v3 = vadd.f32 %v6315_v55, %v5967_v17  ;;  %v10961_v62 = vpop.permute.xlu1 %6747  ;;  %v5987_v57 = vadd.f32 %v10901_v51, %v5162_v47 }
 0x273   : > { %v6317_v58 = vpop.f32.mrf.mxu1 }
 0x274   : > { %v6729_v53 = vmax.f32 %v6697_v9, 0.0  ;;  %v6641_v0 = vadd.f32 %v6317_v58, %v5968_v18  ;;  %v10955_v56 = vpop.f32.mrf.mxu0  ;;  %v6684_v55 = vadd.f32 %v10935_v16, %v6640_v3 }
 0x275   : > { %v6321_v38 = vpop.f32.mrf.mxu1 }
 0x276   : > { %v6656_v36 = vadd.f32 %v6321_v38, %v5983_v26  ;;  %6851 = vmatprep.subr.mxu1 %v6729_v53  ;;  %v10959_v23 = vpop.f32.mrf.mxu0  ;;  %v6685_v33 = vadd.f32 %v10935_v16, %v6641_v0  ;;  %v6716_v53 = vmax.f32 %v6684_v55, 0.0  ;;  %v5316_v0 = vadd.f32 %v10869_v29, %v10823_v7 }
 0x277   : > { %v6323_v30 = vpop.f32.mrf.mxu1  ;;  %6852 = vmatpush1.msra.mxu1 %v6728_v60  ;;  %v5976_v38 = vadd.f32 %v10913_v39, %v10865_v21  ;;  %v5975_v7 = vadd.f32 %v10909_v32, %v10863_v14  ;;  %v11639_v39 = vld [vmem:[#allocation64_spill] sm:$0xff]  ;;  %v5992_v14 = vadd.f32 %v10923_v22, %v5318_v8  ;;  %v11647_v8 = vld [vmem:[#allocation79_spill] sm:$0xff] }
 0x278   : > { %v6657_v18 = vadd.f32 %v6323_v30, %v5984_v31  ;;  %v10967_v34 = vpop.f32.mrf.mxu0  ;;  %6853 = vmatprep.subr.mxu1 %v6713_v5  ;;  %v6700_v17 = vadd.f32 %v10941_v59, %v6656_v36  ;;  %v6717_v9 = vmax.f32 %v6685_v33, 0.0  ;;  %v5991_v2 = vadd.f32 %v10917_v4, %v5316_v0  ;;  %v11641_v4 = vld [vmem:[#allocation77_spill] sm:$0xff] }
 0x279   : > { %v6469_v19 = vpop.f32.mrf.mxu1  ;;  %6854 = vmatpush1.msra.mxu1 %v6712_v43  ;;  %v11646_v0 = vld [vmem:[#allocation89_spill] sm:$0xff] }
 0x27a   : > { %v6701_v41 = vadd.f32 %v10941_v59, %v6657_v18  ;;  %v10976_v25 = vpop.f32.mrf.mxu0  ;;  %8822 = vmatmul.mubr.msk.f32.vlgmr.msra.gmra.mxu1 %vm6749_vm3, %v10961_v62  ;;  %v6732_v58 = vmax.f32 %v6700_v17, 0.0  ;;  %v6644_v31 = vadd.f32 %v6469_v19, %v5971_v10 }
 0x27b   : > { %v6471_v20 = vpop.f32.mrf.mxu1  ;;  %7029 = vmatprep.mubr.f32.mxu1 %v11482_v46 }
 0x27c   : > { %v6733_v50 = vmax.f32 %v6701_v41, 0.0  ;;  %v6645_v12 = vadd.f32 %v6471_v20, %v5972_v45  ;;  %v10982_v26 = vpop.f32.mrf.mxu0  ;;  %v6688_v29 = vadd.f32 %v10935_v16, %v6644_v31  ;;  %v11640_v45 = vld [vmem:[#allocation67_spill] sm:$0xff] }
 0x27d   : > { %v6475_v51 = vpop.f32.mrf.mxu1  ;;  %v1761_v18 = vadd.f32 %v11640_v45, %v11639_v39  ;;  %v11645_v31 = vld [vmem:[#allocation71_spill] sm:$0xff] }
 0x27e   : > { %v6660_v5 = vadd.f32 %v6475_v51, %v5987_v57  ;;  %6993 = vmatprep.subr.mxu1 %v6733_v50  ;;  %v10986_v60 = vpop.f32.mrf.mxu0  ;;  %v6689_v43 = vadd.f32 %v10935_v16, %v6645_v12  ;;  %v6720_v57 = vmax.f32 %v6688_v29, 0.0  ;;  %v11642_v50 = vld [vmem:[#allocation68_spill] sm:$0xff]  ;;  %v11643_v12 = vld [vmem:[#allocation69_spill] sm:$0xff] }
 0x27f   : > { %v6477_v3 = vpop.f32.mrf.mxu1  ;;  %6994 = vmatpush1.msra.mxu1 %v6732_v58  ;;  %v3067_v55 = vadd.f32 %v11641_v4, %v1761_v18  ;;  %v11644_v58 = vld [vmem:[#allocation63_spill] sm:$0xff]  ;;  %v11650_v18 = vld [vmem:[#allocation81_spill] sm:$0xff] }
 0x280   : > { %v6661_v47 = vadd.f32 %v6477_v3, %v5988_v35  ;;  %v10993_v36 = vpop.f32.mrf.mxu0  ;;  %6995 = vmatprep.subr.mxu1 %v6717_v9  ;;  %v6704_v30 = vadd.f32 %v10941_v59, %v6660_v5  ;;  %v6721_v32 = vmax.f32 %v6689_v43, 0.0  ;;  %v1915_v9 = vadd.f32 %v11643_v12, %v11642_v50  ;;  %v11020_v43 = vpop.permute.xlu0 %3965 }
 0x281   : > { %v6623_v15 = vpop.f32.mrf.mxu1  ;;  %6996 = vmatpush1.msra.mxu1 %v6716_v53  ;;  %v2069_v51 = vadd.f32 %v11645_v31, %v11644_v58  ;;  %v3932_v5 = vadd.f32 %v11646_v0, %v3067_v55  ;;  %v11651_v55 = vld [vmem:[#allocation87_spill] sm:$0xff] }
 0x282   : > { %v6705_v28 = vadd.f32 %v10941_v59, %v6661_v47  ;;  %v11001_v21 = vpop.f32.mrf.mxu0  ;;  %8824 = vmatmul.mubr.msk.f32.vlgmr.msra.gmra.mxu1 %vm6749_vm3, %v10961_v62  ;;  %v6736_v41 = vmax.f32 %v6704_v30, 0.0  ;;  %v6648_v20 = vadd.f32 %v6623_v15, %v5975_v7  ;;  %v11648_v30 = vld [vmem:[#allocation65_spill] sm:$0xff] }
 0x283   : > { %v6625_v33 = vpop.f32.mrf.mxu1  ;;  %7171 = vmatprep.mubr.f32.mxu1 %v11482_v46  ;;  %v11649_v15 = vld [vmem:[#allocation73_spill] sm:$0xff] }
 0x284   : > { %v6737_v10 = vmax.f32 %v6705_v28, 0.0  ;;  %v6649_v17 = vadd.f32 %v6625_v33, %v5976_v38  ;;  %v11009_v19 = vpop.f32.mrf.mxu0  ;;  %v3071_v38 = vadd.f32 %v11647_v8, %v1915_v9  ;;  %v2223_v28 = vadd.f32 %v11649_v15, %v11648_v30 }
 0x285   : > { %v6629_v35 = vpop.f32.mrf.mxu1  ;;  %v6692_v39 = vadd.f32 %v10935_v16, %v6648_v20  ;;  %v3075_v33 = vadd.f32 %v11650_v18, %v2069_v51 }
 0x286   : > { %v6664_v53 = vadd.f32 %v6629_v35, %v5991_v2  ;;  %7135 = vmatprep.subr.mxu1 %v6737_v10  ;;  %v11016_v22 = vpop.f32.mrf.mxu0  ;;  %v6693_v47 = vadd.f32 %v10935_v16, %v6649_v17  ;;  %v4777_v2 = vadd.f32 %v10879_v44, %v10831_v40  ;;  %v3936_v10 = vadd.f32 %v10304_v63, %v3071_v38 }
 0x287   : > { %v6631_v3 = vpop.f32.mrf.mxu1  ;;  %7136 = vmatpush1.msra.mxu1 %v6736_v41  ;;  %v3976_v40 = vadd.f32 %v11020_v43, %v3932_v5  ;;  %v5962_v44 = vadd.f32 %v10931_v42, %v10877_v61  ;;  %v3975_v63 = vadd.f32 %v11020_v43, %v11651_v55  ;;  %v6724_v35 = vmax.f32 %v6692_v39, 0.0  ;;  %v11652_v61 = vld [vmem:[#allocation84_spill] sm:$0xff]  ;;  %v11653_v5 = vld [vmem:[#allocation75_spill] sm:$0xff] }
 0x288   : > { %v6665_v7 = vadd.f32 %v6631_v3, %v5992_v14  ;;  %v6084_v29 = vpop.f32.mrf.mxu0  ;;  %7137 = vmatprep.subr.mxu1 %v6721_v32  ;;  %v6708_v45 = vadd.f32 %v10941_v59, %v6664_v53  ;;  %v4779_v14 = vadd.f32 %v10881_v1, %v10835_v13  ;;  %v5977_v4 = vadd.f32 %v10933_v6, %v4777_v2  ;;  %v11657_v39 = vld [vmem:[#allocation19_spill] sm:$0xff] }
 0x289   : > { %7138 = vmatpush1.msra.mxu1 %v6720_v57  ;;  %v5961_v13 = vadd.f32 %v10928_v27, %v10875_v52  ;;  %v6725_v57 = vmax.f32 %v6693_v47, 0.0  ;;  %v3079_v42 = vadd.f32 %v11652_v61, %v2223_v28  ;;  %v3980_v6 = vadd.f32 %v11020_v43, %v3936_v10  ;;  %v11655_v28 = vld [vmem:[#allocation82_spill] sm:$0xff] }
 0x28a   : > { %v6709_v32 = vadd.f32 %v10941_v59, %v6665_v7  ;;  %v6086_v17 = vpop.f32.mrf.mxu0  ;;  %8826 = vmatmul.mubr.msk.f32.vlgmr.msra.gmra.mxu1 %vm6749_vm3, %v10961_v62  ;;  %v5978_v1 = vadd.f32 %v10939_v11, %v4779_v14  ;;  %v6740_v50 = vmax.f32 %v6708_v45, 0.0  ;;  %v3940_v58 = vadd.f32 %v10341_v48, %v3075_v33  ;;  %v11658_v14 = vld [vmem:[#allocation91_spill] sm:$0xff] }
 0x28b   : > { %7313 = vmatprep.mubr.f32.mxu1 %v11482_v46  ;;  %v6635_v12 = vadd.f32 %v6086_v17, %v5962_v44  ;;  %v6634_v31 = vadd.f32 %v6084_v29, %v5961_v13  ;;  %v3979_v52 = vadd.f32 %v11020_v43, %v10300_v49  ;;  %v4008_v0 = vmax.f32 %v3976_v40, 0.0  ;;  %v11654_v29 = vld [vmem:[#allocation95_spill] sm:$0xff]  ;;  %v11659_v17 = vld [vmem:[#allocation17_spill] sm:$0xff] }
 0x28c   : > { %v6741_v41 = vmax.f32 %v6709_v32, 0.0  ;;  %v6090_v20 = vpop.f32.mrf.mxu0  ;;  %v4931_v3 = vadd.f32 %v11653_v5, %v10843_v24  ;;  %v4007_v38 = vmax.f32 %v3975_v63, 0.0  ;;  %v4012_v47 = vmax.f32 %v3980_v6, 0.0  ;;  %v11656_v24 = vld [vmem:[#allocation86_spill] sm:$0xff]  ;;  %v11663_v6 = vld [vmem:[#allocation21_spill] sm:$0xff] }
 0x28d   : > { %v6650_v9 = vadd.f32 %v6090_v20, %v5977_v4  ;;  %v6679_v8 = vadd.f32 %v10935_v16, %v6635_v12  ;;  %v3984_v7 = vadd.f32 %v11020_v43, %v3940_v58  ;;  %v3944_v30 = vadd.f32 %v11654_v29, %v3079_v42  ;;  %v11660_v20 = vld [vmem:[#allocation15_spill] sm:$0xff]  ;;  %v11662_v42 = vld [vmem:[#allocation10_spill] sm:$0xff] }
 0x28e   : > { %7277 = vmatprep.subr.mxu1 %v6741_v41  ;;  %v6092_v51 = vpop.f32.mrf.mxu0  ;;  %v6678_v49 = vadd.f32 %v10935_v16, %v6634_v31  ;;  %v4933_v2 = vadd.f32 %v11656_v24, %v11655_v28  ;;  %v5966_v45 = vadd.f32 %v10953_v54, %v11657_v39  ;;  %v5981_v18 = vadd.f32 %v10955_v56, %v4931_v3  ;;  %v11666_v3 = vld [vmem:[#allocation16_spill] sm:$0xff] }
 0x28f   : > { %v6651_v53 = vadd.f32 %v6092_v51, %v5978_v1  ;;  %7278 = vmatpush1.msra.mxu1 %v6740_v50  ;;  %v6694_v27 = vadd.f32 %v10941_v59, %v6650_v9  ;;  %v4011_v10 = vmax.f32 %v3979_v52, 0.0  ;;  %v3983_v32 = vadd.f32 %v11020_v43, %v11658_v14  ;;  %v11661_v50 = vld [vmem:[#allocation93_spill] sm:$0xff] }
 0x290   : > { %7279 = vmatprep.subr.mxu1 %v6725_v57  ;;  %v6238_v11 = vpop.f32.mrf.mxu0  ;;  %v5965_v40 = vadd.f32 %v10946_v37, %v11659_v17  ;;  %v5982_v55 = vadd.f32 %v10959_v23, %v4933_v2  ;;  %v6711_v63 = vmax.f32 %v6679_v8, 0.0  ;;  %v4016_v56 = vmax.f32 %v3984_v7, 0.0  ;;  %v11667_v7 = vld [vmem:[#allocation14_spill] sm:$0xff] }
 0x291   : > { %v6695_v48 = vadd.f32 %v10941_v59, %v6651_v53  ;;  %7280 = vmatpush1.msra.mxu1 %v6724_v35  ;;  %v6726_v44 = vmax.f32 %v6694_v27, 0.0  ;;  %v3988_v1 = vadd.f32 %v11020_v43, %v3944_v30  ;;  %v6710_v57 = vmax.f32 %v6678_v49, 0.0  ;;  %v11670_v17 = vld [vmem:[#allocation62_spill] sm:$0xff] }
 0x292   : > { %8828 = vmatmul.mubr.msk.f32.vlgmr.msra.gmra.mxu1 %vm6749_vm3, %v10961_v62  ;;  %7423 = vmatprep.subr.mxu1 %v4008_v0  ;;  %v6240_v15 = vpop.f32.mrf.mxu0  ;;  %v6638_v41 = vadd.f32 %v6238_v11, %v5965_v40  ;;  %v3987_v23 = vadd.f32 %v11020_v43, %v11661_v50  ;;  %v4015_v61 = vmax.f32 %v3983_v32, 0.0  ;;  %v5085_v58 = vadd.f32 %v11663_v6, %v11662_v42  ;;  %v11664_v11 = vld [vmem:[#allocation11_spill] sm:$0xff]  ;;  %v11671_v40 = vld [vmem:[#allocation76_spill] sm:$0xff] }
 0x293   : > { %v6727_v33 = vmax.f32 %v6695_v48, 0.0  ;;  %7424 = vmatpush1.msra.mxu1 %v4007_v38  ;;  %7457 = vmatprep.mubr.f32.mxu1 %v11482_v46  ;;  %v6639_v54 = vadd.f32 %v6240_v15, %v5966_v45  ;;  %v4020_v53 = vmax.f32 %v3988_v1, 0.0  ;;  %v11665_v0 = vld [vmem:[#allocation23_spill] sm:$0xff]  ;;  %v5970_v8 = vadd.f32 %v10976_v25, %v11666_v3  ;;  %v11681_v3 = vld [vmem:[#allocation70_spill] sm:$0xff] }
 0x294   : > { %7565 = vmatprep.subr.mxu1 %v4012_v47  ;;  %v6244_v4 = vpop.f32.mrf.mxu0  ;;  %v6682_v52 = vadd.f32 %v10935_v16, %v6638_v41  ;;  %v5087_v5 = vadd.f32 %v11665_v0, %v11664_v11  ;;  %v5985_v48 = vadd.f32 %v10982_v26, %v5085_v58  ;;  %v4019_v47 = vmax.f32 %v3987_v23, 0.0  ;;  %v11677_v23 = vld [vmem:[#allocation88_spill] sm:$0xff]  ;;  %v11680_v11 = vld [vmem:[#allocation97_spill] sm:$0xff] }
 0x295   : > { %v6654_v13 = vadd.f32 %v6244_v4, %v5981_v18  ;;  %6780 = vmatprep.subr.mxu0 %v6727_v33  ;;  %v6683_v31 = vadd.f32 %v10935_v16, %v6639_v54  ;;  %v5969_v29 = vadd.f32 %v10967_v34, %v11667_v7  ;;  %v11669_v33 = vld [vmem:[#allocation22_spill] sm:$0xff]  ;;  %v11673_v54 = vld [vmem:[#allocation25_spill] sm:$0xff] }
 0x296   : > { %8830 = vmatmul.mubr.msk.f32.vlgmr.msra.gmra.mxu1 %vm4075_vm2, %v11660_v20  ;;  %v6246_v35 = vpop.f32.mrf.mxu0  ;;  %6781 = vmatpush1.msra.mxu0 %v6726_v44  ;;  %v5986_v15 = vadd.f32 %v10986_v60, %v5087_v5  ;;  %v6714_v25 = vmax.f32 %v6682_v52, 0.0  ;;  %v11668_v60 = vld [vmem:[#allocation74_spill] sm:$0xff]  ;;  %v1684_v44 = vadd.f32 %v11671_v40, %v11670_v17 }
 0x297   : > { %7566 = vmatpush1.msra.mxu1 %v4011_v10  ;;  %v6655_v37 = vadd.f32 %v6246_v35, %v5982_v55  ;;  %6782 = vmatprep.subr.mxu0 %v6711_v63  ;;  %v6698_v12 = vadd.f32 %v10941_v59, %v6654_v13  ;;  %v6715_v28 = vmax.f32 %v6683_v31, 0.0  ;;  %v5239_v10 = vadd.f32 %v11669_v33, %v11668_v60  ;;  %v11672_v63 = vld [vmem:[#allocation85_spill] sm:$0xff]  ;;  %v11675_v35 = vld [vmem:[#allocation66_spill] sm:$0xff] }
 0x298   : > { %7707 = vmatprep.subr.mxu1 %v4016_v56  ;;  %v6392_v9 = vpop.f32.mrf.mxu0  ;;  %6783 = vmatpush1.msra.mxu0 %v6710_v57  ;;  %v5241_v13 = vadd.f32 %v11673_v54, %v11672_v63  ;;  %v11674_v56 = vld [vmem:[#allocation20_spill] sm:$0xff]  ;;  %v11679_v52 = vld [vmem:[#allocation90_spill] sm:$0xff] }
 0x299   : > { %v6699_v51 = vadd.f32 %v10941_v59, %v6655_v37  ;;  %7599 = vmatprep.mubr.f32.mxu1 %v11482_v46  ;;  %8821 = vmatmul.mubr.msk.f32.vlgmr.msra.gmra.mxu0 %vm6749_vm3, %v10961_v62  ;;  %v6730_v30 = vmax.f32 %v6698_v12, 0.0  ;;  %v6642_v39 = vadd.f32 %v6392_v9, %v5969_v29  ;;  %v5974_v1 = vadd.f32 %v11001_v21, %v11674_v56  ;;  %v11676_v37 = vld [vmem:[#allocation78_spill] sm:$0xff] }
 0x29a   : > { %8832 = vmatmul.mubr.msk.f32.vlgmr.msra.gmra.mxu1 %vm4075_vm2, %v11660_v20  ;;  %v6394_v27 = vpop.f32.mrf.mxu0  ;;  %6958 = vmatprep.mubr.f32.mxu0 %v11482_v46  ;;  %v5989_v57 = vadd.f32 %v11009_v19, %v5239_v10  ;;  %v1838_v50 = vadd.f32 %v11676_v37, %v11675_v35  ;;  %v3065_v12 = vadd.f32 %v11677_v23, %v1684_v44  ;;  %v11678_v9 = vld [vmem:[#allocation18_spill] sm:$0xff]  ;;  %v11693_v35 = vld [vmem:[#allocation9_spill] sm:$0xff] }
 0x29b   : > { %v6731_v38 = vmax.f32 %v6699_v51, 0.0  ;;  %7708 = vmatpush1.msra.mxu1 %v4015_v61  ;;  %7741 = vmatprep.mubr.f32.mxu1 %v11482_v46  ;;  %v6643_v24 = vadd.f32 %v6394_v27, %v5970_v8  ;;  %v6686_v4 = vadd.f32 %v10935_v16, %v6642_v39  ;;  %v5973_v61 = vadd.f32 %v10993_v36, %v11678_v9  ;;  %v11682_v8 = vld [vmem:[#allocation80_spill] sm:$0xff]  ;;  %v11689_v33 = vld [vmem:[#allocation94_spill] sm:$0xff] }
 0x29c   : > { %7849 = vmatprep.subr.mxu1 %v4020_v53  ;;  %v6398_v49 = vpop.f32.mrf.mxu0  ;;  %v3069_v27 = vadd.f32 %v11679_v52, %v1838_v50  ;;  %v3930_v0 = vadd.f32 %v11680_v11, %v3065_v12  ;;  %v11686_v39 = vld [vmem:[#allocation72_spill] sm:$0xff]  ;;  %v11690_v17 = vld [vmem:[#allocation98_spill] sm:$0xff]  ;;  %v3985_v37 = vadd.f32 %v11020_v43, %v11693_v35 }
 0x29d   : > { %v6658_v2 = vadd.f32 %v6398_v49, %v5985_v48  ;;  %6922 = vmatprep.subr.mxu0 %v6731_v38  ;;  %v6687_v14 = vadd.f32 %v10935_v16, %v6643_v24  ;;  %v6718_v21 = vmax.f32 %v6686_v4, 0.0  ;;  %v11683_v48 = vld [vmem:[#allocation99_spill] sm:$0xff]  ;;  %v11685_v24 = vld [vmem:[#allocation96_spill] sm:$0xff]  ;;  %v3977_v40 = vadd.f32 %v11020_v43, %v11690_v17  ;;  %v7939_v12 = vld [vmem:[%s11390_s9 + $0x38] sm:$0xff] }
 0x29e   : > { %8834 = vmatmul.mubr.msk.f32.vlgmr.msra.gmra.mxu1 %vm4075_vm2, %v11660_v20  ;;  %v6400_v26 = vpop.f32.mrf.mxu0  ;;  %6923 = vmatpush1.msra.mxu0 %v6730_v30  ;;  %v3934_v38 = vadd.f32 %v11683_v48, %v3069_v27  ;;  %v11684_v30 = vld [vmem:[#allocation92_spill] sm:$0xff]  ;;  %v4017_v23 = vmax.f32 %v3985_v37, 0.0  ;;  %v7923_v11 = vld [vmem:[%s11176_s28 + $0x38] sm:$0xff] }
 0x29f   : > { %7850 = vmatpush1.msra.mxu1 %v4019_v47  ;;  %v6659_v45 = vadd.f32 %v6400_v26, %v5986_v15  ;;  %6924 = vmatprep.subr.mxu0 %v6715_v28  ;;  %v6702_v34 = vadd.f32 %v10941_v59, %v6658_v2  ;;  %v6719_v58 = vmax.f32 %v6687_v14, 0.0  ;;  %v3974_v15 = vadd.f32 %v11020_v43, %v3930_v0  ;;  %v11687_v26 = vld [vmem:[#allocation83_spill] sm:$0xff]  ;;  %v7938_v9 = vld [vmem:[%s11390_s9 + $0x30] sm:$0xff] }
 0x2a0   : > { %v6546_v18 = vpop.f32.mrf.mxu0  ;;  %6925 = vmatpush1.msra.mxu0 %v6714_v25  ;;  %7883 = vmatprep.mubr.f32.mxu1 %v11482_v46  ;;  %v3973_v2 = vadd.f32 %v11020_v43, %v11685_v24  ;;  %v4009_v54 = vmax.f32 %v3977_v40, 0.0  ;;  %v7921_v52 = vld [vmem:[%s11176_s28 + $0x28] sm:$0xff]  ;;  %v7922_v27 = vld [vmem:[%s11176_s28 + $0x30] sm:$0xff]  ;;  %v7924_v0 = vld [vmem:[%s11176_s28 + $0x40] sm:$0xff] }
 0x2a1   : > { %v6703_v32 = vadd.f32 %v10941_v59, %v6659_v45  ;;  %8823 = vmatmul.mubr.msk.f32.vlgmr.msra.gmra.mxu0 %vm6749_vm3, %v10961_v62  ;;  %v6734_v42 = vmax.f32 %v6702_v34, 0.0  ;;  %v6646_v53 = vadd.f32 %v6546_v18, %v5973_v61  ;;  %v3978_v45 = vadd.f32 %v11020_v43, %v3934_v38  ;;  %v11688_v34 = vld [vmem:[#allocation8_spill] sm:$0xff]  ;;  %v7931_v38 = vld [vmem:[%s11176_s28 + $0x78] sm:$0xff] }
 0x2a2   : > { %v6548_v55 = vpop.f32.mrf.mxu0  ;;  %7100 = vmatprep.mubr.f32.mxu0 %v11482_v46  ;;  %8836 = vmatmul.mubr.msk.f32.vlgmr.msra.gmra.mxu1 %vm4075_vm2, %v11660_v20  ;;  %v5990_v20 = vadd.f32 %v11016_v22, %v5241_v13  ;;  %v1992_v22 = vadd.f32 %v11682_v8, %v11681_v3  ;;  %v4006_v14 = vmax.f32 %v3974_v15, 0.0  ;;  %v11692_v13 = vld [vmem:[#allocation12_spill] sm:$0xff]  ;;  %v7927_v3 = vld [vmem:[%s11176_s28 + $0x58] sm:$0xff]  ;;  %v7928_v8 = vld [vmem:[%s11176_s28 + $0x60] sm:$0xff] }
 0x2a3   : > { %v6735_v41 = vmax.f32 %v6703_v32, 0.0  ;;  %v6647_v31 = vadd.f32 %v6548_v55, %v5974_v1  ;;  %v6690_v29 = vadd.f32 %v10935_v16, %v6646_v53  ;;  %v4005_v32 = vmax.f32 %v3973_v2, 0.0  ;;  %v11691_v55 = vld [vmem:[#allocation13_spill] sm:$0xff]  ;;  %v7937_v61 = vld [vmem:[%s11390_s9 + $0x28] sm:$0xff] }
 0x2a4   : > { %v6552_v6 = vpop.f32.mrf.mxu0  ;;  %v3073_v49 = vadd.f32 %v11684_v30, %v1992_v22  ;;  %v4010_v44 = vmax.f32 %v3978_v45, 0.0  ;;  %v3981_v56 = vadd.f32 %v11020_v43, %v11692_v13  ;;  %v7919_v53 = vld [vmem:[%s11176_s28 + $0x18] sm:$0xff]  ;;  %v7929_v22 = vld [vmem:[%s11176_s28 + $0x68] sm:$0xff]  ;;  %v7930_v48 = vld [vmem:[%s11176_s28 + $0x70] sm:$0xff] }
 0x2a5   : > { %v6662_v51 = vadd.f32 %v6552_v6, %v5989_v57  ;;  %7064 = vmatprep.subr.mxu0 %v6735_v41  ;;  %v6691_v47 = vadd.f32 %v10935_v16, %v6647_v31  ;;  %v6722_v16 = vmax.f32 %v6690_v29, 0.0  ;;  %v9118_v41 = vld [vmem:[%s11388_s7] sm:$0x1]  ;;  %v7935_v6 = vld [vmem:[%s11390_s9 + $0x18] sm:$0xff]  ;;  %v8158_v29 = vld [vmem:[%s11392_s11 + $0x8] sm:$0xff] }
 0x2a6   : > { %v6554_v19 = vpop.f32.mrf.mxu0  ;;  %7065 = vmatpush1.msra.mxu0 %v6734_v42  ;;  %v3938_v18 = vadd.f32 %v11688_v34, %v3073_v49  ;;  %v7936_v42 = vld [vmem:[%s11390_s9 + $0x20] sm:$0xff] }
 0x2a7   : > { %v6663_v5 = vadd.f32 %v6554_v19, %v5990_v20  ;;  %7066 = vmatprep.subr.mxu0 %v6719_v58  ;;  %v6706_v36 = vadd.f32 %v10941_v59, %v6662_v51  ;;  %v6723_v60 = vmax.f32 %v6691_v47, 0.0  ;;  %v7934_v20 = vld [vmem:[%s11390_s9 + $0x10] sm:$0xff]  ;;  %v7933_v58 = vld [vmem:[%s11390_s9 + $0x8] sm:$0xff]  ;;  %v7932_v31 = vld [vmem:[%s11390_s9] sm:$0xff] }
 0x2a8   : > { %7067 = vmatpush1.msra.mxu0 %v6718_v21  ;;  %v3982_v4 = vadd.f32 %v11020_v43, %v3938_v18  ;;  %v7917_v51 = vld [vmem:[%s11176_s28 + $0x8] sm:$0xff]  ;;  %v7918_v21 = vld [vmem:[%s11176_s28 + $0x10] sm:$0xff]  ;;  %v7920_v19 = vld [vmem:[%s11176_s28 + $0x20] sm:$0xff] }
 0x2a9   : > { %v6707_v7 = vadd.f32 %v10941_v59, %v6663_v5  ;;  %8825 = vmatmul.mubr.msk.f32.vlgmr.msra.gmra.mxu0 %vm6749_vm3, %v10961_v62  ;;  %v6738_v25 = vmax.f32 %v6706_v36, 0.0  ;;  %v2146_v59 = vadd.f32 %v11687_v26, %v11686_v39  ;;  %v7925_v5 = vld [vmem:[%s11176_s28 + $0x48] sm:$0xff]  ;;  %v7926_v36 = vld [vmem:[%s11176_s28 + $0x50] sm:$0xff]  ;;  %v8160_v47 = vld [vmem:[%s11392_s11 + $0x18] sm:$0xff] }
 0x2aa   : > { %7242 = vmatprep.mubr.f32.mxu0 %v11482_v46  ;;  %v4014_v1 = vmax.f32 %v3982_v4, 0.0  ;;  %8994 = vmatprep.subr.mxu1 %v8160_v47  ;;  %v8157_v30 = vld [vmem:[%s11392_s11] sm:$0xff] }
 0x2ab   : > { %v6739_v28 = vmax.f32 %v6707_v7, 0.0  ;;  %v3077_v10 = vadd.f32 %v11689_v33, %v2146_v59  ;;  %8995 = vmatpush3.msra.mxu1 %v8160_v47  ;;  %v8159_v7 = vld [vmem:[%s11392_s11 + $0x10] sm:$0xff] }
 0x2ac   : > { %8996 = vmatprep.subr.mxu1 %v8159_v7 }
 0x2ad   : > { %7206 = vmatprep.subr.mxu0 %v6739_v28  ;;  %v3942_v63 = vadd.f32 %v11691_v55, %v3077_v10  ;;  %8997 = vmatpush3.msra.mxu1 %v8159_v7 }
 0x2ae   : > { %7207 = vmatpush1.msra.mxu0 %v6738_v25  ;;  %8998 = vmatprep.subr.mxu1 %v8158_v29 }
 0x2af   : > { %7208 = vmatprep.subr.mxu0 %v6723_v60  ;;  %v3986_v57 = vadd.f32 %v11020_v43, %v3942_v63  ;;  %v7916_v43 = vld [vmem:[%s11176_s28] sm:$0xff]  ;;  %8999 = vmatpush3.msra.mxu1 %v8158_v29  ;;  %s8521_s28 = scalar_lea.sflag [#allocation5], %s516_s18 }
 0x2b0   : > { %7209 = vmatpush1.msra.mxu0 %v6722_v16  ;;  %9000 = vmatprep.subr.mxu1 %v8157_v30 }
 0x2b1   : > { %8827 = vmatmul.mubr.msk.f32.vlgmr.msra.gmra.mxu0 %vm6749_vm3, %v10961_v62  ;;  %7352 = vmatprep.subr.mxu0 %v4006_v14  ;;  %v4013_v62 = vmax.f32 %v3981_v56, 0.0  ;;  %v4018_v50 = vmax.f32 %v3986_v57, 0.0 }
 0x2b2   : > { %7353 = vmatpush1.msra.mxu0 %v4005_v32  ;;  %7386 = vmatprep.mubr.f32.mxu0 %v11482_v46 }
 0x2b3   : > { %7494 = vmatprep.subr.mxu0 %v4010_v44  ;;  %9001 = vmatpush3.msra.mxu1 %v8157_v30 }
 0x2b4   : > { %9026 = vmatprep.subr.mxu1 %v11482_v46 }
 0x2b5   : > { %8829 = vmatmul.mubr.msk.f32.vlgmr.msra.gmra.mxu0 %vm4075_vm2, %v9118_v41 }
 0x2b6   : > { %7495 = vmatpush1.msra.mxu0 %v4009_v54  ;;  %7528 = vmatprep.mubr.f32.mxu0 %v11482_v46 }
 0x2b7   : > { %7636 = vmatprep.subr.mxu0 %v4014_v1 }
 0x2b9   : > { %8831 = vmatmul.mubr.msk.f32.vlgmr.msra.gmra.mxu0 %vm4075_vm2, %v9118_v41 }
 0x2ba   : > { %7637 = vmatpush1.msra.mxu0 %v4013_v62  ;;  %7670 = vmatprep.mubr.f32.mxu0 %v11482_v46 }
 0x2bb   : > { %7778 = vmatprep.subr.mxu0 %v4018_v50 }
 0x2bd   : > { %8833 = vmatmul.mubr.msk.f32.vlgmr.msra.gmra.mxu0 %vm4075_vm2, %v9118_v41 }
 0x2be   : > { %7779 = vmatpush1.msra.mxu0 %v4017_v23  ;;  %7812 = vmatprep.mubr.f32.mxu0 %v11482_v46 }
 0x2bf   : > { %8954 = vmatprep.subr.mxu0 %v7939_v12 }
 0x2c1   : > { %8835 = vmatmul.mubr.msk.f32.vlgmr.msra.gmra.mxu0 %vm4075_vm2, %v9118_v41 }
 0x2c2   : > { %8955 = vmatpush3.msra.mxu0 %v7939_v12  ;;  %8970 = vmatprep.mubr.msk.f32.mxu0 %vm7947_vm4, %v7916_v43 }
 0x2c3   : > { %8956 = vmatprep.subr.mxu0 %v7938_v9 }
 0x2c4   : > { %8957 = vmatpush3.msra.mxu0 %v7938_v9 }
 0x2c5   : > { %8958 = vmatprep.subr.mxu0 %v7937_v61 }
 0x2c6   : > { %8959 = vmatpush3.msra.mxu0 %v7937_v61 }
 0x2c7   : > { %8960 = vmatprep.subr.mxu0 %v7936_v42 }
 0x2c8   : > { %8961 = vmatpush3.msra.mxu0 %v7936_v42 }
 0x2c9   : > { %8962 = vmatprep.subr.mxu0 %v7935_v6 }
 0x2ca   : > { %8963 = vmatpush3.msra.mxu0 %v7935_v6 }
 0x2cb   : > { %8964 = vmatprep.subr.mxu0 %v7934_v20 }
 0x2cc   : > { %8965 = vmatpush3.msra.mxu0 %v7934_v20 }
 0x2cd   : > { %8966 = vmatprep.subr.mxu0 %v7933_v58 }
 0x2ce   : > { %8967 = vmatpush3.msra.mxu0 %v7933_v58 }
 0x2cf   : > { %8968 = vmatprep.subr.mxu0 %v7932_v31 }
 0x2d0   : > { %8969 = vmatpush3.msra.mxu0 %v7932_v31 }
 0x2d1   : > { %8971 = vmatmul.mubr.msk.f32.vlgmr.msra.gmra.mxu0 %vm7947_vm4, %v7917_v51 }
 0x2d2   : > { %8973 = vmatprep.mubr.msk.f32.mxu0 %vm7947_vm4, %v7918_v21 }
 0x2d5   : > { %8974 = vmatmul.mubr.msk.f32.gmra.mxu0 %vm7947_vm4, %v7919_v53 }
 0x2d6   : > { %8976 = vmatprep.mubr.msk.f32.mxu0 %vm7947_vm4, %v7920_v19 }
 0x2d9   : > { %8977 = vmatmul.mubr.msk.f32.gmra.mxu0 %vm7947_vm4, %v7921_v52 }
 0x2da   : > { %8979 = vmatprep.mubr.msk.f32.mxu0 %vm7947_vm4, %v7922_v27 }
 0x2dd   : > { %8980 = vmatmul.mubr.msk.f32.gmra.mxu0 %vm7947_vm4, %v7923_v11 }
 0x2de   : > { %8982 = vmatprep.mubr.msk.f32.mxu0 %vm7947_vm4, %v7924_v0 }
 0x2e1   : > { %8983 = vmatmul.mubr.msk.f32.gmra.mxu0 %vm7947_vm4, %v7925_v5 }
 0x2e2   : > { %8985 = vmatprep.mubr.msk.f32.mxu0 %vm7947_vm4, %v7926_v36 }
 0x2e5   : > { %8986 = vmatmul.mubr.msk.f32.gmra.mxu0 %vm7947_vm4, %v7927_v3 }
 0x2e6   : > { %8988 = vmatprep.mubr.msk.f32.mxu0 %vm7947_vm4, %v7928_v8 }
 0x2e9   : > { %8989 = vmatmul.mubr.msk.f32.gmra.mxu0 %vm7947_vm4, %v7929_v22 }
 0x2ea   : > { %8991 = vmatprep.mubr.msk.f32.mxu0 %vm7947_vm4, %v7930_v48 }
 0x2ed   : > { %8992 = vmatmul.mubr.msk.f32.gmra.mxu0 %vm7947_vm4, %v7931_v38  ;;  %v11250_v38 = vld [vmem:[%s11391_s10] ss:$0 sm:$0xff] }
 0x33a   : > { %v6889_v49 = vpop.f32.mrf.mxu1 }
 0x33c   : > { %v6891_v15 = vpop.f32.mrf.mxu1 }
 0x342   : > { %v7031_v28 = vpop.f32.mrf.mxu1 }
 0x344   : > { %v7033_v24 = vpop.f32.mrf.mxu1 }
 0x34a   : > { %v7173_v2 = vpop.f32.mrf.mxu1 }
 0x34c   : > { %v7175_v25 = vpop.f32.mrf.mxu1 }
 0x352   : > { %v7315_v39 = vpop.f32.mrf.mxu1 }
 0x354   : > { %v7317_v26 = vpop.f32.mrf.mxu1 }
 0x356   : > { %v7459_v59 = vpop.f32.mrf.mxu1 }
 0x357   : > { %v7460_v45 = vadd.f32 %v7459_v59, %v6889_v49 }
 0x358   : > { %v7461_v34 = vpop.f32.mrf.mxu1 }
 0x359   : > { %v7462_v18 = vadd.f32 %v7461_v34, %v6891_v15  ;;  %v6818_v10 = vpop.f32.mrf.mxu0 }
 0x35a   : > { %v7601_v60 = vpop.f32.mrf.mxu1 }
 0x35b   : > { %v7602_v16 = vadd.f32 %v7601_v60, %v7031_v28  ;;  %v6820_v44 = vpop.f32.mrf.mxu0 }
 0x35c   : > { %v7603_v33 = vpop.f32.mrf.mxu1 }
 0x35d   : > { %v7604_v14 = vadd.f32 %v7603_v33, %v7033_v24 }
 0x35e   : > { %v7743_v32 = vpop.f32.mrf.mxu1 }
 0x35f   : > { %v7744_v17 = vadd.f32 %v7743_v32, %v7173_v2 }
 0x360   : > { %v7745_v40 = vpop.f32.mrf.mxu1 }
 0x361   : > { %v7746_v4 = vadd.f32 %v7745_v40, %v7175_v25  ;;  %v6960_v54 = vpop.f32.mrf.mxu0 }
 0x362   : > { %v7885_v55 = vpop.f32.mrf.mxu1 }
 0x363   : > { %v7886_v63 = vadd.f32 %v7885_v55, %v7315_v39  ;;  %v6962_v13 = vpop.f32.mrf.mxu0 }
 0x364   : > { %v7887_v47 = vpop.f32.mrf.mxu1 }
 0x365   : > { %v7888_v15 = vadd.f32 %v7887_v47, %v7317_v26 }
 0x369   : > { %v7102_v56 = vpop.f32.mrf.mxu0 }
 0x36b   : > { %v7104_v1 = vpop.f32.mrf.mxu0 }
 0x371   : > { %v7244_v57 = vpop.f32.mrf.mxu0 }
 0x373   : > { %v7246_v41 = vpop.f32.mrf.mxu0 }
 0x375   : > { %v7388_v62 = vpop.f32.mrf.mxu0 }
 0x376   : > { %v7389_v35 = vadd.f32 %v7388_v62, %v6818_v10 }
 0x377   : > { %v7390_v37 = vpop.f32.mrf.mxu0 }
 0x378   : > { %v7391_v50 = vadd.f32 %v7390_v37, %v6820_v44 }
 0x379   : > { %v7530_v23 = vpop.f32.mrf.mxu0 }
 0x37a   : > { %v7890_v12 = vadd.f32 %v7391_v50, %v7389_v35  ;;  %v7531_v43 = vadd.f32 %v7530_v23, %v6960_v54 }
 0x37b   : > { %v7532_v9 = vpop.f32.mrf.mxu0 }
 0x37c   : > { %v7891_v61 = vadd.f32 %v7890_v12, %v7460_v45  ;;  %v7533_v42 = vadd.f32 %v7532_v9, %v6962_v13 }
 0x37d   : > { %v7672_v6 = vpop.f32.mrf.mxu0 }
 0x37e   : > { %v7892_v20 = vadd.f32 %v7891_v61, %v7462_v18  ;;  %v7673_v58 = vadd.f32 %v7672_v6, %v7102_v56 }
 0x37f   : > { %v7674_v31 = vpop.f32.mrf.mxu0 }
 0x380   : > { %v7893_v51 = vadd.f32 %v7892_v20, %v7531_v43  ;;  %v7675_v21 = vadd.f32 %v7674_v31, %v7104_v1 }
 0x381   : > { %v7814_v53 = vpop.f32.mrf.mxu0 }
 0x382   : > { %v7894_v19 = vadd.f32 %v7893_v51, %v7533_v42  ;;  %v7815_v52 = vadd.f32 %v7814_v53, %v7244_v57 }
 0x383   : > { %v7816_v27 = vpop.f32.mrf.mxu0 }
 0x384   : > { %v7895_v11 = vadd.f32 %v7894_v19, %v7602_v16  ;;  %v7817_v0 = vadd.f32 %v7816_v27, %v7246_v41 }
 0x386   : > { %v7896_v5 = vadd.f32 %v7895_v11, %v7604_v14 }
 0x388   : > { %v7897_v36 = vadd.f32 %v7896_v5, %v7673_v58 }
 0x38a   : > { %v7898_v3 = vadd.f32 %v7897_v36, %v7675_v21 }
 0x38c   : > { %v7899_v8 = vadd.f32 %v7898_v3, %v7744_v17 }
 0x38e   : > { %v7900_v22 = vadd.f32 %v7899_v8, %v7746_v4 }
 0x390   : > { %v7901_v48 = vadd.f32 %v7900_v22, %v7815_v52 }
 0x391   : > { %v8972_v7 = vpop.f32.mrf.mxu0 }
 0x392   : > { %v7902_v29 = vadd.f32 %v7901_v48, %v7817_v0  ;;  %v8068_v30 = vadd.f32 %v8972_v7, %v11250_v38 }
 0x393   : > { %v8062_v49 = vpop.f32.mrf.mxu0 }
 0x394   : > { %v7903_v28 = vadd.f32 %v7902_v29, %v7886_v63  ;;  %v8063_v24 = vadd.f32 %v11250_v38, %v8062_v49  ;;  %v8142_v59 = vmax.f32 %v8068_v30, 0.0  ;;  %v8854_v49 = vld [vmem:[%s11393_s12] ss:$0 sm:$0xff] }
 0x395   : > { %v8975_v2 = vpop.f32.mrf.mxu0 }
 0x396   : > { %v11254_v25 = vadd.f32 %v7903_v28, %v7888_v15  ;;  %v8141_v39 = vmax.f32 %v8063_v24, 0.0  ;;  %v8078_v45 = vadd.f32 %v8975_v2, %v11250_v38 }
 0x397   : > { %v8072_v34 = vpop.f32.mrf.mxu0 }
 0x398   : > { %v8073_v18 = vadd.f32 %v11250_v38, %v8072_v34  ;;  %9002 = vmatprep.mubr.msk.f32.mxu1 %vm8168_vm5, %v8141_v39  ;;  %v8144_v16 = vmax.f32 %v8078_v45, 0.0 }
 0x399   : > { %v8978_v60 = vpop.f32.mrf.mxu0  ;;  %9003 = vmatmul.mubr.msk.f32.vlgmr.msra.gmra.mxu1 %vm8168_vm5, %v8142_v59 }
 0x39a   : > { %v8143_v26 = vmax.f32 %v8073_v18, 0.0  ;;  %v8088_v33 = vadd.f32 %v8978_v60, %v11250_v38 }
 0x39b   : > { %v8082_v10 = vpop.f32.mrf.mxu0 }
 0x39c   : > { %v8083_v14 = vadd.f32 %v11250_v38, %v8082_v10  ;;  %9005 = vmatprep.mubr.msk.f32.mxu1 %vm8168_vm5, %v8143_v26  ;;  %v8146_v40 = vmax.f32 %v8088_v33, 0.0 }
 0x39d   : > { %v8981_v32 = vpop.f32.mrf.mxu0  ;;  %9006 = vmatmul.mubr.msk.f32.gmra.mxu1 %vm8168_vm5, %v8144_v16 }
 0x39e   : > { %v8145_v17 = vmax.f32 %v8083_v14, 0.0  ;;  %v8098_v44 = vadd.f32 %v8981_v32, %v11250_v38 }
 0x39f   : > { %v8092_v4 = vpop.f32.mrf.mxu0 }
 0x3a0   : > { %v8093_v55 = vadd.f32 %v11250_v38, %v8092_v4  ;;  %9008 = vmatprep.mubr.msk.f32.mxu1 %vm8168_vm5, %v8145_v17  ;;  %v8148_v13 = vmax.f32 %v8098_v44, 0.0 }
 0x3a1   : > { %v8984_v63 = vpop.f32.mrf.mxu0  ;;  %9009 = vmatmul.mubr.msk.f32.gmra.mxu1 %vm8168_vm5, %v8146_v40 }
 0x3a2   : > { %v8147_v54 = vmax.f32 %v8093_v55, 0.0  ;;  %v8108_v56 = vadd.f32 %v8984_v63, %v11250_v38 }
 0x3a3   : > { %v8102_v1 = vpop.f32.mrf.mxu0 }
 0x3a4   : > { %v8103_v57 = vadd.f32 %v11250_v38, %v8102_v1  ;;  %9011 = vmatprep.mubr.msk.f32.mxu1 %vm8168_vm5, %v8147_v54  ;;  %v8150_v35 = vmax.f32 %v8108_v56, 0.0 }
 0x3a5   : > { %v8987_v41 = vpop.f32.mrf.mxu0  ;;  %9012 = vmatmul.mubr.msk.f32.gmra.mxu1 %vm8168_vm5, %v8148_v13 }
 0x3a6   : > { %v8149_v62 = vmax.f32 %v8103_v57, 0.0  ;;  %v8118_v37 = vadd.f32 %v8987_v41, %v11250_v38 }
 0x3a7   : > { %v8112_v50 = vpop.f32.mrf.mxu0 }
 0x3a8   : > { %v8113_v23 = vadd.f32 %v11250_v38, %v8112_v50  ;;  %9014 = vmatprep.mubr.msk.f32.mxu1 %vm8168_vm5, %v8149_v62  ;;  %v8152_v9 = vmax.f32 %v8118_v37, 0.0 }
 0x3a9   : > { %v8990_v12 = vpop.f32.mrf.mxu0  ;;  %9015 = vmatmul.mubr.msk.f32.gmra.mxu1 %vm8168_vm5, %v8150_v35 }
 0x3aa   : > { %v8151_v43 = vmax.f32 %v8113_v23, 0.0  ;;  %v8128_v61 = vadd.f32 %v8990_v12, %v11250_v38 }
 0x3ab   : > { %v8122_v42 = vpop.f32.mrf.mxu0 }
 0x3ac   : > { %v8123_v6 = vadd.f32 %v11250_v38, %v8122_v42  ;;  %9017 = vmatprep.mubr.msk.f32.mxu1 %vm8168_vm5, %v8151_v43  ;;  %v8154_v31 = vmax.f32 %v8128_v61, 0.0  ;;  %v8378_v43 = vld [vmem:[%s11394_s13] sm:$0x1]  ;;  %v11695_v61 = vld [vmem:[#allocation7_spill] sm:$0xff] }
 0x3ad   : > { %v8993_v20 = vpop.f32.mrf.mxu0  ;;  %9018 = vmatmul.mubr.msk.f32.gmra.mxu1 %vm8168_vm5, %v8152_v9  ;;  %v7909_v9 = vpop.permute.xlu1 %7908 }
 0x3ae   : > { %v8153_v58 = vmax.f32 %v8123_v6, 0.0  ;;  %v8138_v51 = vadd.f32 %v8993_v20, %v11250_v38  ;;  %v7914_v42 = vrot.slane %v7909_v9, %v11695_v61  ;;  %v8383_v6 = vpop.permute.xlu0 %8382  ;;  %v8510_v20 = vld [vmem:[%s531_s8] sm:$0x1]  ;;  %s9185_s8 = smov [#allocation4]  }
 0x3af   : > { %v8132_v21 = vpop.f32.mrf.mxu0  ;;  %s9123_s1 = sshll.u32 %s9185_s8, 4  ;;  %s9124_s1 = int_to_ptr.vmem [resolvable:$false] %s9123_s1 }
 0x3b0   : > { %v8133_v53 = vadd.f32 %v11250_v38, %v8132_v21  ;;  %9020 = vmatprep.mubr.msk.f32.mxu1 %vm8168_vm5, %v8153_v58  ;;  %v8156_v52 = vmax.f32 %v8138_v51, 0.0  ;;  %v8388_v58 = vrot.slane %v8383_v6, %v11695_v61  ;;  %s9125_s2 = scalar_lea.vmem %s9124_s1, 32  ;;  %p9126_p1 = scmp.lt.s32.totalorder %s8534_s20, %s9124_s1 }
 0x3b1   : > { %9021 = vmatmul.mubr.msk.f32.gmra.mxu1 %vm8168_vm5, %v8154_v31  ;;  %p9127_p2 = scmp.lt.s32.totalorder %s9125_s2, %s9119_s0 }
 0x3b2   : > { %v8155_v19 = vmax.f32 %v8133_v53, 0.0 }
 0x3b3   : > { %p9128_p3 = por %p9127_p2, %p9126_p1 }
 0x3b4   : > { %9023 = vmatprep.mubr.msk.f32.mxu1 %vm8168_vm5, %v8155_v19 }
 0x3b5   : > { %9024 = vmatmul.mubr.msk.f32.gmra.mxu1 %vm8168_vm5, %v8156_v52  ;;  %p9129_p4 = pnand %p9128_p3, %p9122_p0 }
 0x3b6   : > { %9058 = vmatprep.mubr.msk.f32.mxu1 %vm9184_vm6, %v11482_v46 }
 0x459   : > { %v11287_v27 = vpop.f32.mrf.mxu1 }
 0x45a   : > { %v8289_v35 = vadd.f32 %v11287_v27, %v8854_v49 }
 0x45b   : > { %v11289_v11 = vpop.f32.mrf.mxu1 }
 0x45c   : > { %v8363_v50 = vmax.f32 %v8289_v35, 0.0  ;;  %v8284_v23 = vadd.f32 %v8854_v49, %v11289_v11 }
 0x45d   : > { %v9007_v0 = vpop.f32.mrf.mxu1 }
 0x45e   : > { %v8299_v1 = vadd.f32 %v9007_v0, %v8854_v49  ;;  %v8362_v12 = vmax.f32 %v8284_v23, 0.0 }
 0x45f   : > { %v11291_v5 = vpop.f32.mrf.mxu1 }
 0x460   : > { %v8365_v41 = vmax.f32 %v8299_v1, 0.0  ;;  %v8294_v62 = vadd.f32 %v8854_v49, %v11291_v5 }
 0x461   : > { %v9010_v36 = vpop.f32.mrf.mxu1 }
 0x462   : > { %v8309_v63 = vadd.f32 %v9010_v36, %v8854_v49  ;;  %v8364_v37 = vmax.f32 %v8294_v62, 0.0 }
 0x463   : > { %v8303_v3 = vpop.f32.mrf.mxu1 }
 0x464   : > { %v8367_v13 = vmax.f32 %v8309_v63, 0.0  ;;  %v8304_v56 = vadd.f32 %v8854_v49, %v8303_v3 }
 0x465   : > { %v9013_v8 = vpop.f32.mrf.mxu1 }
 0x466   : > { %v8319_v40 = vadd.f32 %v9013_v8, %v8854_v49  ;;  %v8366_v57 = vmax.f32 %v8304_v56, 0.0 }
 0x467   : > { %v8313_v22 = vpop.f32.mrf.mxu1 }
 0x468   : > { %v8369_v4 = vmax.f32 %v8319_v40, 0.0  ;;  %v8314_v55 = vadd.f32 %v8854_v49, %v8313_v22 }
 0x469   : > { %v9016_v48 = vpop.f32.mrf.mxu1 }
 0x46a   : > { %v8329_v10 = vadd.f32 %v9016_v48, %v8854_v49  ;;  %v8368_v54 = vmax.f32 %v8314_v55, 0.0 }
 0x46b   : > { %v8323_v38 = vpop.f32.mrf.mxu1 }
 0x46c   : > { %v8371_v32 = vmax.f32 %v8329_v10, 0.0  ;;  %v8324_v17 = vadd.f32 %v8854_v49, %v8323_v38 }
 0x46d   : > { %v9019_v47 = vpop.f32.mrf.mxu1 }
 0x46e   : > { %v8339_v60 = vadd.f32 %v9019_v47, %v8854_v49  ;;  %v8370_v44 = vmax.f32 %v8324_v17, 0.0 }
 0x46f   : > { %v8333_v7 = vpop.f32.mrf.mxu1 }
 0x470   : > { %v8373_v16 = vmax.f32 %v8339_v60, 0.0  ;;  %v8334_v33 = vadd.f32 %v8854_v49, %v8333_v7 }
 0x471   : > { %v9022_v29 = vpop.f32.mrf.mxu1 }
 0x472   : > { %v8349_v59 = vadd.f32 %v9022_v29, %v8854_v49  ;;  %v8372_v14 = vmax.f32 %v8334_v33, 0.0 }
 0x473   : > { %v8343_v30 = vpop.f32.mrf.mxu1 }
 0x474   : > { %v8375_v34 = vmax.f32 %v8349_v59, 0.0  ;;  %v8344_v18 = vadd.f32 %v8854_v49, %v8343_v30 }
 0x475   : > { %v9025_v15 = vpop.f32.mrf.mxu1 }
 0x476   : > { %v8359_v28 = vadd.f32 %v9025_v15, %v8854_v49  ;;  %v8374_v26 = vmax.f32 %v8344_v18, 0.0 }
 0x477   : > { %v8353_v24 = vpop.f32.mrf.mxu1 }
 0x478   : > { %v8377_v2 = vmax.f32 %v8359_v28, 0.0  ;;  %v8354_v39 = vadd.f32 %v8854_v49, %v8353_v24 }
 0x47a   : > { %9027 = vmatpush3.xpose.msk.msra.mxu1 %vm6749_vm3, %v8377_v2  ;;  %v8376_v45 = vmax.f32 %v8354_v39, 0.0 }
 0x47b   : > { %9028 = vmatprep.subr.mxu1 %v11482_v46 }
 0x47e   : > { %9029 = vmatpush3.xpose.msk.msra.mxu1 %vm6749_vm3, %v8376_v45 }
 0x47f   : > { %9030 = vmatprep.subr.mxu1 %v11482_v46 }
 0x482   : > { %9031 = vmatpush3.xpose.msk.msra.mxu1 %vm6749_vm3, %v8375_v34 }
 0x483   : > { %9032 = vmatprep.subr.mxu1 %v11482_v46 }
 0x486   : > { %9033 = vmatpush3.xpose.msk.msra.mxu1 %vm6749_vm3, %v8374_v26 }
 0x487   : > { %9034 = vmatprep.subr.mxu1 %v11482_v46 }
 0x48a   : > { %9035 = vmatpush3.xpose.msk.msra.mxu1 %vm6749_vm3, %v8373_v16 }
 0x48b   : > { %9036 = vmatprep.subr.mxu1 %v11482_v46 }
 0x48e   : > { %9037 = vmatpush3.xpose.msk.msra.mxu1 %vm6749_vm3, %v8372_v14 }
 0x48f   : > { %9038 = vmatprep.subr.mxu1 %v11482_v46 }
 0x492   : > { %9039 = vmatpush3.xpose.msk.msra.mxu1 %vm6749_vm3, %v8371_v32 }
 0x493   : > { %9040 = vmatprep.subr.mxu1 %v11482_v46 }
 0x496   : > { %9041 = vmatpush3.xpose.msk.msra.mxu1 %vm6749_vm3, %v8370_v44 }
 0x497   : > { %9042 = vmatprep.subr.mxu1 %v11482_v46 }
 0x49a   : > { %9043 = vmatpush3.xpose.msk.msra.mxu1 %vm6749_vm3, %v8369_v4 }
 0x49b   : > { %9044 = vmatprep.subr.mxu1 %v11482_v46 }
 0x49e   : > { %9045 = vmatpush3.xpose.msk.msra.mxu1 %vm6749_vm3, %v8368_v54 }
 0x49f   : > { %9046 = vmatprep.subr.mxu1 %v11482_v46 }
 0x4a2   : > { %9047 = vmatpush3.xpose.msk.msra.mxu1 %vm6749_vm3, %v8367_v13 }
 0x4a3   : > { %9048 = vmatprep.subr.mxu1 %v11482_v46 }
 0x4a6   : > { %9049 = vmatpush3.xpose.msk.msra.mxu1 %vm6749_vm3, %v8366_v57 }
 0x4a7   : > { %9050 = vmatprep.subr.mxu1 %v11482_v46 }
 0x4aa   : > { %9051 = vmatpush3.xpose.msk.msra.mxu1 %vm6749_vm3, %v8365_v41 }
 0x4ab   : > { %9052 = vmatprep.subr.mxu1 %v11482_v46 }
 0x4ae   : > { %9053 = vmatpush3.xpose.msk.msra.mxu1 %vm6749_vm3, %v8364_v37 }
 0x4af   : > { %9054 = vmatprep.subr.mxu1 %v11482_v46 }
 0x4b2   : > { %9055 = vmatpush3.xpose.msk.msra.mxu1 %vm6749_vm3, %v8363_v50 }
 0x4b3   : > { %9056 = vmatprep.subr.mxu1 %v11482_v46  ;;  %v7915_v46 = vadd.f32 %v7914_v42, %v11254_v25 }
 0x4b5   : > { %v8511_v21 = vadd.f32 %v8510_v20, %v7915_v46 }
 0x4b6   : > { %9057 = vmatpush3.xpose.msk.msra.mxu1 %vm6749_vm3, %v8362_v12 }
 0x4b9   : > { %9059 = vmatmul.mubr.msk.f32.vlgmr.msra.gmra.mxu1 %vm6749_vm3, %v8378_v43 }
 0x579   : > { %v8506_v31 = vpop.f32.mrf.mxu1 }
 0x57a   : > { %v8507_v51 = vadd.f32 %v8506_v31, %v8388_v58 }
 0x57b   : > { %v9060_v53 = vpop.f32.mrf.mxu1 }
 0x57c   : > { %v8512_v19 = vadd.f32 %v8511_v21, %v8507_v51 }
 0x57e   : > { %v8888_v52 = vmul.f32 -1.442695, %v8512_v19 }
 0x580   : > { %9114 = vpow2.f32 %v8888_v52 }
 0x58d   : > { %v9115_v27 = vpop.eup %9114 }
 0x58e   : > { %v8516_v11 = vadd.f32 1.0, %v9115_v27 }
 0x590   : > { %9116 = vrcp.f32 %v8516_v11 }
 0x59d   : > { %v9117_v25 = vpop.eup %9116 }
 0x59e   : > { %8519 = vst [vmem:[%s517_s17] sm:$0x1] %v9117_v25 }
 0x59f   : > { %9132 = shalt.err (!%p9129_p4)
}
 0x5a0   : > { %s9133_s21 = scalar_lea.hbm %s11346_s27, 16  ;;  %s9137_s14 = scalar_lea.hbm %s11395_s15, 32 }
 0x5a1   : > { %p9134_p7 = scmp.ne.s32.totalorder %s11346_s27, %s9133_s21  ;;  %p9138_p10 = scmp.lt.s32.totalorder %s11346_s27, %s11395_s15 }
 0x5a2   : > { %p9139_p11 = scmp.lt.s32.totalorder %s9137_s14, %s9133_s21 }
 0x5a3   : > { %p9135_p8 = pnand %p9134_p7, %p9310_p5 }
 0x5a4   : > { %p9140_p12 = por %p9139_p11, %p9138_p10 }
 0x5a5   : > { %p9136_p9 = pneg %p9135_p8 }
 0x5a7   : > { %p9141_p13 = pnand %p9140_p12, %p9136_p9 }
 0x5a9   : > { %9144 = shalt.err (!%p9141_p13)
}
 0x5aa   : > { %9061 = dma.vmem_to_hbm [thread:$0]  (%p9310_p5), %s8534_s20, 16, %s11346_s27, %s8521_s28  }
 0x5ab PF: > { %p9067_p0 = scmp.ge.s32.totalorder %s9179_s25, 2  ;;  %s8545_s1 = sand.u32 1, %s9167_s22  }
 0x5ac   : > { %s8546_s2 = scalar_lea.sflag [#allocation5], %s8545_s1 }
 0x5ad   : > { %p9064_p1 = pnand %p9067_p0, %p9314_p6 }
 0x5af   : > { %p9065_p2 = pneg %p9064_p1 }
 0x5b1   : > { %9162 = dma.done.wait (%p9065_p2), %s8546_s2, 16  }
 0x5b2   : > { %9164 = vsyncadd (%p9065_p2), %s8546_s2, 4294967280  ;;  %p29_p3 = scmp.ge.s32.totalorder %s9297_s26, 4   ;;  %s11697_s22 = smov %s9171_s23 }
 0x5b3   : > { %s11698_s23 = smov %s9175_s24  ;;  %s11699_s24 = smov %s9308_s29 }
 0x5b4   : > { %s11700_s25 = smov %s9297_s26  ;;  %31 = sbr.rel (!%p29_p3) target bundleno = 7 (0x7), region = 127 }
 0x5b9   :  { %8550 = vsyncpa [#allocation5], 1 }
 0x5ba   :  { %8552 = vsyncpa [#allocation5 + $0x1], 1 }

</bundles_post_ra>
